<compile_context>
chip_gen: v7x
topology: tpu7x:2x2x1
jax: 0.10.0
libtpu: 0.0.40
codegen_flags: <defaults>
</compile_context>

<pallas_src>
import numpy as np

import jax
import jax.numpy as jnp
from jax import lax
from jax.experimental import pallas as pl
from jax.experimental.pallas import tpu as pltpu

NB = 16                 # images per grid step (multiple of 16 -> bf16-tile aligned slices)
BF = jnp.bfloat16       # MXU input dtype; accumulation stays f32


# --------------------------------- kernel -----------------------------------

def _lenet_kernel(x_ref, w1, b1, h1, p1, w2, b2, h2, p2, w3, b3,
                  w4, b4, w5, b5, out_ref):
    """Whole LeNet forward for NB images.

    Activations: 2-D bf16/f32 values, rows = h*NB + img, lanes = w*C + c.
    """

    def rowconv(act_bf, w_ref, b_ref, h_out):
        # One im2col matmul: LHS row (h, img) = concat of input rows h..h+4
        # (aligned slices at multiples of NB=16, lane offsets multiples of 128).
        rows = h_out * NB
        lhs = jnp.concatenate(
            [act_bf[i * NB:i * NB + rows, :] for i in range(5)], axis=1)
        y = jnp.dot(lhs, w_ref[...], preferred_element_type=jnp.float32)
        return jnp.maximum(y + b_ref[...], 0.0)                    # f32

    def avgpool(act_f32, h_ref, p_ref):
        # width pairs via constant (256,128) 0.25-matrix, then height pairs
        # via constant kron(pairs, I_NB) matrix -- one matmul each, all images.
        wp = jnp.dot(act_f32.astype(BF), p_ref[...],
                     preferred_element_type=jnp.float32)
        hp = jnp.dot(h_ref[...], wp.astype(BF),
                     preferred_element_type=jnp.float32)
        return hp.astype(BF)

    a1 = rowconv(x_ref[...], w1, b1, 28)       # (28*NB, 256)  conv1 + ReLU
    q1 = avgpool(a1, h1, p1)                   # (14*NB, 128)  pool1
    a2 = rowconv(q1, w2, b2, 10)               # (10*NB, 256)  conv2 + ReLU
    q2 = avgpool(a2, h2, p2)                   # ( 5*NB, 128)  pool2
    a3 = rowconv(q2, w3, b3, 1)                # (   NB, 128)  conv3 (== FC) + ReLU

    z1 = jnp.dot(a3.astype(BF), w4[...], preferred_element_type=jnp.float32)
    z1 = jnp.maximum(z1 + b4[...], 0.0)                                  # fc1 + ReLU
    z2 = jnp.dot(z1.astype(BF), w5[...], preferred_element_type=jnp.float32)
    out_ref[...] = z2 + b5[...]                                          # fc2 logits


# ------------------------------ parameter prep -------------------------------

def _wpool_matrix(w_in, ch):
    """(256,128) width-pool matrix: [w*ch+c, (w//2)*ch+c] = 0.25."""
    m = np.zeros((256, 128), np.float32)
    for w in range(w_in):
        for c in range(ch):
            m[w * ch + c, (w // 2) * ch + c] = 0.25
    return m


def _hpool_matrix(h_out):
    """(h_out*NB, 2*h_out*NB) height-pair-sum matrix = kron(pairs, I_NB)."""
    pair = np.zeros((h_out, 2 * h_out), np.float32)
    pair[np.arange(h_out), 2 * np.arange(h_out)] = 1.0
    pair[np.arange(h_out), 2 * np.arange(h_out) + 1] = 1.0
    return np.kron(pair, np.eye(NB, dtype=np.float32))


def _prep_weights(params):
    f32 = jnp.float32

    # conv1 -> (640, 256): row i*128+wi, col wo*6+co = W1[co,0,i,wi-wo]
    w1 = params["conv1_w"].astype(f32)                 # (6,1,5,5)
    w1t = jnp.transpose(w1[:, 0], (1, 2, 0))           # (5,5,6) [i,j,co]
    wi = np.arange(128)
    wo = np.arange(28)
    j = wi[:, None] - wo[None, :]
    valid = ((j >= 0) & (j <= 4) & (wi[:, None] < 32)).astype(np.float32)
    jc = np.clip(j, 0, 4)
    big = w1t[:, jc, :] * jnp.asarray(valid)[None, :, :, None]   # (5,128,28,6)
    w1big = jnp.pad(big.reshape(640, 168), ((0, 0), (0, 88))).astype(BF)

    # conv2 -> (640, 256): row i*128+w*6+ci, col wo*16+co = W2[co,ci,i,w-wo]
    w2 = params["conv2_w"].astype(f32)                 # (16,6,5,5)
    w2t = jnp.transpose(w2, (2, 3, 1, 0))              # (5,5,6,16) [i,j,ci,co]
    w_in = np.arange(14)
    wo2 = np.arange(10)
    j2 = w_in[:, None] - wo2[None, :]
    valid2 = ((j2 >= 0) & (j2 <= 4)).astype(np.float32)
    jc2 = np.clip(j2, 0, 4)
    big2 = w2t[:, jc2, :, :] * jnp.asarray(valid2)[None, :, :, None, None]
    big2 = jnp.transpose(big2, (0, 1, 3, 2, 4))        # (5,14,6,10,16)
    big2 = jnp.pad(big2.reshape(5, 84, 160), ((0, 0), (0, 44), (0, 0)))
    w2big = jnp.pad(big2.reshape(640, 160), ((0, 0), (0, 96))).astype(BF)

    # conv3 (a 400-in FC) -> (640, 128): row i*128+w*16+ci, col co = W3[co,ci,i,w]
    w3 = params["conv3_w"].astype(f32)                 # (120,16,5,5)
    w3t = jnp.transpose(w3, (2, 3, 1, 0))              # (5,5,16,120)
    big3 = jnp.pad(w3t.reshape(5, 80, 120), ((0, 0), (0, 48), (0, 0)))
    w3big = jnp.pad(big3.reshape(640, 120), ((0, 0), (0, 8))).astype(BF)

    # linear layers -> (128, 128)
    w4big = jnp.pad(params["lin1_w"].astype(f32).T, ((0, 8), (0, 44))).astype(BF)
    w5big = jnp.pad(params["lin2_w"].astype(f32).T, ((0, 44), (0, 118))).astype(BF)

    # biases (f32, broadcast over rows); padded lanes are exactly zero
    b1big = jnp.pad(jnp.tile(params["conv1_b"].astype(f32), 28), (0, 88)).reshape(1, 256)
    b2big = jnp.pad(jnp.tile(params["conv2_b"].astype(f32), 10), (0, 96)).reshape(1, 256)
    b3big = jnp.pad(params["conv3_b"].astype(f32), (0, 8)).reshape(1, 128)
    b4big = jnp.pad(params["lin1_b"].astype(f32), (0, 44)).reshape(1, 128)
    b5big = jnp.pad(params["lin2_b"].astype(f32), (0, 118)).reshape(1, 128)

    # constant pooling matrices (trace-time numpy constants)
    p1 = jnp.asarray(_wpool_matrix(28, 6), BF)         # (256, 128)
    p2 = jnp.asarray(_wpool_matrix(10, 16), BF)        # (256, 128)
    h1 = jnp.asarray(_hpool_matrix(14), BF)            # (14*NB, 28*NB)
    h2 = jnp.asarray(_hpool_matrix(5), BF)             # ( 5*NB, 10*NB)

    return (w1big, b1big, h1, p1, w2big, b2big, h2, p2,
            w3big, b3big, w4big, b4big, w5big, b5big)


def _pinned(ndim):
    return lambda s: (0,) * ndim


# ---------------------------------- wrapper -----------------------------------

def lenet_forward(params, x):
    """x: (B, 1, 32, 32) float32 NCHW (as in the PyTorch module). Returns (B, 10)."""
    B = x.shape[0]
    assert x.shape[1:] == (1, 32, 32), x.shape

    Bp = -(-B // NB) * NB                 # pad batch to a multiple of NB
    nsteps = Bp // NB

    # Boundary glue: rows ordered h-major / image-minor, width padded to 128 lanes.
    xr = x[:, 0].astype(jnp.float32)                                   # (B, 32, 32)
    xr = jnp.pad(xr, ((0, Bp - B), (0, 0), (0, 128 - 32)))             # (Bp, 32, 128)
    xr = xr.reshape(nsteps, NB, 32, 128).transpose(0, 2, 1, 3)         # (s, h, img, w)
    xr = xr.reshape(nsteps, 32 * NB, 128).astype(BF)

    weight_args = _prep_weights(params)

    in_specs = [pl.BlockSpec((None, 32 * NB, 128), lambda s: (s, 0, 0))]
    for a in weight_args:
        # Constant block index -> weights stay resident in VMEM across grid steps.
        in_specs.append(pl.BlockSpec(a.shape, _pinned(a.ndim)))

    grid_spec = pltpu.PrefetchScalarGridSpec(
        num_scalar_prefetch=0,
        grid=(nsteps,),
        in_specs=in_specs,
        out_specs=pl.BlockSpec((None, NB, 128), lambda s: (s, 0, 0)),
    )

    m1, m2 = 28 * NB, 10 * NB
    flops_per_step = 2 * (
        m1 * 640 * 256            # conv1
        + m1 * 256 * 128          # pool1 width
        + (14 * NB) * m1 * 128    # pool1 height
        + m2 * 640 * 256          # conv2
        + m2 * 256 * 128          # pool2 width
        + (5 * NB) * m2 * 128     # pool2 height
        + NB * 640 * 128          # conv3 (FC)
        + 2 * NB * 128 * 128)     # fc1 + fc2
    weight_bytes = sum(int(a.size) * int(np.dtype(a.dtype).itemsize) for a in weight_args)
    bytes_accessed = int(xr.size) * 2 + weight_bytes + nsteps * NB * 128 * 4

    out = pl.pallas_call(
        _lenet_kernel,
        out_shape=jax.ShapeDtypeStruct((nsteps, NB, 128), jnp.float32),
        grid_spec=grid_spec,
        compiler_params=pltpu.CompilerParams(
            dimension_semantics=("parallel",)),
        cost_estimate=pl.CostEstimate(
            flops=int(nsteps * flops_per_step), transcendentals=0,
            bytes_accessed=int(bytes_accessed)),
    )(xr, *weight_args)

    return out.reshape(Bp, 128)[:B, :10]


# ----------------------------- LeNet parameters -------------------------------

def init_params(key):
    ks = jax.random.split(key, 10)

    def u(k, shape, fan_in):
        bound = 1.0 / np.sqrt(fan_in)
        return jax.random.uniform(k, shape, jnp.float32, -bound, bound)

    return {
        "conv1_w": u(ks[0], (6, 1, 5, 5), 25),
        "conv1_b": u(ks[1], (6,), 25),
        "conv2_w": u(ks[2], (16, 6, 5, 5), 150),
        "conv2_b": u(ks[3], (16,), 150),
        "conv3_w": u(ks[4], (120, 16, 5, 5), 400),
        "conv3_b": u(ks[5], (120,), 400),
        "lin1_w": u(ks[6], (84, 120), 120),
        "lin1_b": u(ks[7], (84,), 120),
        "lin2_w": u(ks[8], (10, 84), 84),
        "lin2_b": u(ks[9], (10,), 84),
    }


# ---------------------------- plain-JAX reference -----------------------------

def _ref_conv_relu(x, w, b):
    dn = lax.conv_dimension_numbers(x.shape, w.shape, ("NCHW", "OIHW", "NCHW"))
    y = lax.conv_general_dilated(x, w, (1, 1), "VALID", dimension_numbers=dn,
                                 precision=lax.Precision.HIGHEST)
    return jax.nn.relu(y + b[None, :, None, None])


def _ref_pool(x):
    return 0.25 * (x[:, :, 0::2, 0::2] + x[:, :, 0::2, 1::2]
                   + x[:, :, 1::2, 0::2] + x[:, :, 1::2, 1::2])


def lenet_reference(params, x):
    x = _ref_conv_relu(x, params["conv1_w"], params["conv1_b"])
    x = _ref_pool(x)
    x = _ref_conv_relu(x, params["conv2_w"], params["conv2_b"])
    x = _ref_pool(x)
    x = _ref_conv_relu(x, params["conv3_w"], params["conv3_b"])
    x = x.reshape(x.shape[0], -1)
    x = jax.nn.relu(jnp.dot(x, params["lin1_w"].T,
                            precision=lax.Precision.HIGHEST) + params["lin1_b"])
    return jnp.dot(x, params["lin2_w"].T,
                   precision=lax.Precision.HIGHEST) + params["lin2_b"]


# ------------------------------------ main -------------------------------------

if __name__ == "__main__":
    key = jax.random.PRNGKey(0)
    k_param, k_x = jax.random.split(key)
    params = init_params(k_param)
    # LeNet's 32->28->14->10->5->1 spatial pipeline requires 32x32 inputs.
    # B=24 exercises both multi-step grid (2 steps of NB=16) and batch padding.
    B = 24
    x = jax.random.normal(k_x, (B, 1, 32, 32), jnp.float32)

    out = jax.block_until_ready(jax.jit(lenet_forward)(params, x))
    assert out.shape == (B, 10), out.shape
    assert out.dtype == jnp.float32

    ref = jax.block_until_ready(jax.jit(lenet_reference)(params, x))
    # bf16 MXU inputs with f32 accumulation -> loosened tolerance vs f32 reference.
    np.testing.assert_allclose(np.asarray(out), np.asarray(ref), rtol=5e-2, atol=5e-2)

    print("KERNEL_OK")
</pallas_src>

<mosaic_0001>
module attributes {stable_mosaic.version = 11 : i64} {
  func.func @_lenet_kernel(%arg0: i32, %arg1: memref<1x512x128xbf16, #tpu.memory_space<vmem>>, %arg2: memref<640x256xbf16, #tpu.memory_space<vmem>>, %arg3: memref<1x256xf32, #tpu.memory_space<vmem>>, %arg4: memref<224x448xbf16, #tpu.memory_space<vmem>>, %arg5: memref<256x128xbf16, #tpu.memory_space<vmem>>, %arg6: memref<640x256xbf16, #tpu.memory_space<vmem>>, %arg7: memref<1x256xf32, #tpu.memory_space<vmem>>, %arg8: memref<80x160xbf16, #tpu.memory_space<vmem>>, %arg9: memref<256x128xbf16, #tpu.memory_space<vmem>>, %arg10: memref<640x128xbf16, #tpu.memory_space<vmem>>, %arg11: memref<1x128xf32, #tpu.memory_space<vmem>>, %arg12: memref<128x128xbf16, #tpu.memory_space<vmem>>, %arg13: memref<1x128xf32, #tpu.memory_space<vmem>>, %arg14: memref<128x128xbf16, #tpu.memory_space<vmem>>, %arg15: memref<1x128xf32, #tpu.memory_space<vmem>>, %arg16: memref<1x16x128xf32, #tpu.memory_space<vmem>>) attributes {dimension_semantics = [#tpu.dimension_semantics<parallel>], iteration_bounds = array<i64: 2>, scalar_prefetch = 0 : i64, scratch_operands = 0 : i64, tpu.core_type = #tpu.core_type<tc>, window_params = [{transform_indices = @transform_0, window_bounds = array<i64: 1, 512, 128>}, {pipeline_mode = #tpu.pipeline_mode<synchronous>, transform_indices = @transform_1, window_bounds = array<i64: 640, 256>}, {pipeline_mode = #tpu.pipeline_mode<synchronous>, transform_indices = @transform_2, window_bounds = array<i64: 1, 256>}, {pipeline_mode = #tpu.pipeline_mode<synchronous>, transform_indices = @transform_3, window_bounds = array<i64: 224, 448>}, {pipeline_mode = #tpu.pipeline_mode<synchronous>, transform_indices = @transform_4, window_bounds = array<i64: 256, 128>}, {pipeline_mode = #tpu.pipeline_mode<synchronous>, transform_indices = @transform_5, window_bounds = array<i64: 640, 256>}, {pipeline_mode = #tpu.pipeline_mode<synchronous>, transform_indices = @transform_6, window_bounds = array<i64: 1, 256>}, {pipeline_mode = #tpu.pipeline_mode<synchronous>, transform_indices = @transform_7, window_bounds = array<i64: 80, 160>}, {pipeline_mode = #tpu.pipeline_mode<synchronous>, transform_indices = @transform_8, window_bounds = array<i64: 256, 128>}, {pipeline_mode = #tpu.pipeline_mode<synchronous>, transform_indices = @transform_9, window_bounds = array<i64: 640, 128>}, {pipeline_mode = #tpu.pipeline_mode<synchronous>, transform_indices = @transform_10, window_bounds = array<i64: 1, 128>}, {pipeline_mode = #tpu.pipeline_mode<synchronous>, transform_indices = @transform_11, window_bounds = array<i64: 128, 128>}, {pipeline_mode = #tpu.pipeline_mode<synchronous>, transform_indices = @transform_12, window_bounds = array<i64: 1, 128>}, {pipeline_mode = #tpu.pipeline_mode<synchronous>, transform_indices = @transform_13, window_bounds = array<i64: 128, 128>}, {pipeline_mode = #tpu.pipeline_mode<synchronous>, transform_indices = @transform_14, window_bounds = array<i64: 1, 128>}, {transform_indices = @transform_15, window_bounds = array<i64: 1, 16, 128>}]} {
    %c0 = arith.constant 0 : index
    %c0_0 = arith.constant 0 : index
    %c0_1 = arith.constant 0 : index
    %0 = vector.load %arg1[%c0, %c0_0, %c0_1] : memref<1x512x128xbf16, #tpu.memory_space<vmem>>, vector<1x512x128xbf16>
    %1 = vector.shape_cast %0 : vector<1x512x128xbf16> to vector<512x128xbf16>
    %2 = vector.extract_strided_slice %1 {offsets = [0, 0], sizes = [448, 128], strides = [1, 1]} : vector<512x128xbf16> to vector<448x128xbf16>
    %3 = vector.extract_strided_slice %1 {offsets = [16, 0], sizes = [448, 128], strides = [1, 1]} : vector<512x128xbf16> to vector<448x128xbf16>
    %4 = vector.extract_strided_slice %1 {offsets = [32, 0], sizes = [448, 128], strides = [1, 1]} : vector<512x128xbf16> to vector<448x128xbf16>
    %5 = vector.extract_strided_slice %1 {offsets = [48, 0], sizes = [448, 128], strides = [1, 1]} : vector<512x128xbf16> to vector<448x128xbf16>
    %6 = vector.extract_strided_slice %1 {offsets = [64, 0], sizes = [448, 128], strides = [1, 1]} : vector<512x128xbf16> to vector<448x128xbf16>
    %7 = tpu.concatenate %2, %3, %4, %5, %6 in 1 : vector<448x128xbf16>, vector<448x128xbf16>, vector<448x128xbf16>, vector<448x128xbf16>, vector<448x128xbf16> -> vector<448x640xbf16>
    %c0_2 = arith.constant 0 : index
    %c0_3 = arith.constant 0 : index
    %8 = vector.load %arg2[%c0_2, %c0_3] : memref<640x256xbf16, #tpu.memory_space<vmem>>, vector<640x256xbf16>
    %cst = arith.constant dense<0.000000e+00> : vector<448x256xf32>
    %9 = tpu.matmul %7, %8, %cst {dimension_numbers = #tpu.dot_dimension_numbers<[1], [0], [0], [1], [0, 0, 1, 1], [], []>} : vector<448x640xbf16>, vector<640x256xbf16>, vector<448x256xf32> -> vector<448x256xf32>
    %c0_4 = arith.constant 0 : index
    %c0_5 = arith.constant 0 : index
    %10 = vector.load %arg3[%c0_4, %c0_5] : memref<1x256xf32, #tpu.memory_space<vmem>>, vector<1x256xf32>
    %11 = vector.broadcast %10 : vector<1x256xf32> to vector<448x256xf32>
    %12 = arith.addf %9, %11 : vector<448x256xf32>
    %cst_6 = arith.constant 0.000000e+00 : f32
    %13 = vector.broadcast %cst_6 : f32 to vector<448x256xf32>
    %14 = arith.maximumf %12, %13 : vector<448x256xf32>
    %15 = arith.truncf %14 : vector<448x256xf32> to vector<448x256xbf16>
    %c0_7 = arith.constant 0 : index
    %c0_8 = arith.constant 0 : index
    %16 = vector.load %arg5[%c0_7, %c0_8] : memref<256x128xbf16, #tpu.memory_space<vmem>>, vector<256x128xbf16>
    %cst_9 = arith.constant dense<0.000000e+00> : vector<448x128xf32>
    %17 = tpu.matmul %15, %16, %cst_9 {dimension_numbers = #tpu.dot_dimension_numbers<[1], [0], [0], [1], [0, 0, 1, 1], [], []>} : vector<448x256xbf16>, vector<256x128xbf16>, vector<448x128xf32> -> vector<448x128xf32>
    %c0_10 = arith.constant 0 : index
    %c0_11 = arith.constant 0 : index
    %18 = vector.load %arg4[%c0_10, %c0_11] : memref<224x448xbf16, #tpu.memory_space<vmem>>, vector<224x448xbf16>
    %19 = arith.truncf %17 : vector<448x128xf32> to vector<448x128xbf16>
    %cst_12 = arith.constant dense<0.000000e+00> : vector<224x128xf32>
    %20 = tpu.matmul %18, %19, %cst_12 {dimension_numbers = #tpu.dot_dimension_numbers<[1], [0], [0], [1], [0, 0, 1, 1], [], []>} : vector<224x448xbf16>, vector<448x128xbf16>, vector<224x128xf32> -> vector<224x128xf32>
    %21 = arith.truncf %20 : vector<224x128xf32> to vector<224x128xbf16>
    %22 = vector.extract_strided_slice %21 {offsets = [0, 0], sizes = [160, 128], strides = [1, 1]} : vector<224x128xbf16> to vector<160x128xbf16>
    %23 = vector.extract_strided_slice %21 {offsets = [16, 0], sizes = [160, 128], strides = [1, 1]} : vector<224x128xbf16> to vector<160x128xbf16>
    %24 = vector.extract_strided_slice %21 {offsets = [32, 0], sizes = [160, 128], strides = [1, 1]} : vector<224x128xbf16> to vector<160x128xbf16>
    %25 = vector.extract_strided_slice %21 {offsets = [48, 0], sizes = [160, 128], strides = [1, 1]} : vector<224x128xbf16> to vector<160x128xbf16>
    %26 = vector.extract_strided_slice %21 {offsets = [64, 0], sizes = [160, 128], strides = [1, 1]} : vector<224x128xbf16> to vector<160x128xbf16>
    %27 = tpu.concatenate %22, %23, %24, %25, %26 in 1 : vector<160x128xbf16>, vector<160x128xbf16>, vector<160x128xbf16>, vector<160x128xbf16>, vector<160x128xbf16> -> vector<160x640xbf16>
    %c0_13 = arith.constant 0 : index
    %c0_14 = arith.constant 0 : index
    %28 = vector.load %arg6[%c0_13, %c0_14] : memref<640x256xbf16, #tpu.memory_space<vmem>>, vector<640x256xbf16>
    %cst_15 = arith.constant dense<0.000000e+00> : vector<160x256xf32>
    %29 = tpu.matmul %27, %28, %cst_15 {dimension_numbers = #tpu.dot_dimension_numbers<[1], [0], [0], [1], [0, 0, 1, 1], [], []>} : vector<160x640xbf16>, vector<640x256xbf16>, vector<160x256xf32> -> vector<160x256xf32>
    %c0_16 = arith.constant 0 : index
    %c0_17 = arith.constant 0 : index
    %30 = vector.load %arg7[%c0_16, %c0_17] : memref<1x256xf32, #tpu.memory_space<vmem>>, vector<1x256xf32>
    %31 = vector.broadcast %30 : vector<1x256xf32> to vector<160x256xf32>
    %32 = arith.addf %29, %31 : vector<160x256xf32>
    %cst_18 = arith.constant 0.000000e+00 : f32
    %33 = vector.broadcast %cst_18 : f32 to vector<160x256xf32>
    %34 = arith.maximumf %32, %33 : vector<160x256xf32>
    %35 = arith.truncf %34 : vector<160x256xf32> to vector<160x256xbf16>
    %c0_19 = arith.constant 0 : index
    %c0_20 = arith.constant 0 : index
    %36 = vector.load %arg9[%c0_19, %c0_20] : memref<256x128xbf16, #tpu.memory_space<vmem>>, vector<256x128xbf16>
    %cst_21 = arith.constant dense<0.000000e+00> : vector<160x128xf32>
    %37 = tpu.matmul %35, %36, %cst_21 {dimension_numbers = #tpu.dot_dimension_numbers<[1], [0], [0], [1], [0, 0, 1, 1], [], []>} : vector<160x256xbf16>, vector<256x128xbf16>, vector<160x128xf32> -> vector<160x128xf32>
    %c0_22 = arith.constant 0 : index
    %c0_23 = arith.constant 0 : index
    %38 = vector.load %arg8[%c0_22, %c0_23] : memref<80x160xbf16, #tpu.memory_space<vmem>>, vector<80x160xbf16>
    %39 = arith.truncf %37 : vector<160x128xf32> to vector<160x128xbf16>
    %cst_24 = arith.constant dense<0.000000e+00> : vector<80x128xf32>
    %40 = tpu.matmul %38, %39, %cst_24 {dimension_numbers = #tpu.dot_dimension_numbers<[1], [0], [0], [1], [0, 0, 1, 1], [], []>} : vector<80x160xbf16>, vector<160x128xbf16>, vector<80x128xf32> -> vector<80x128xf32>
    %41 = arith.truncf %40 : vector<80x128xf32> to vector<80x128xbf16>
    %42 = vector.extract_strided_slice %41 {offsets = [0, 0], sizes = [16, 128], strides = [1, 1]} : vector<80x128xbf16> to vector<16x128xbf16>
    %43 = vector.extract_strided_slice %41 {offsets = [16, 0], sizes = [16, 128], strides = [1, 1]} : vector<80x128xbf16> to vector<16x128xbf16>
    %44 = vector.extract_strided_slice %41 {offsets = [32, 0], sizes = [16, 128], strides = [1, 1]} : vector<80x128xbf16> to vector<16x128xbf16>
    %45 = vector.extract_strided_slice %41 {offsets = [48, 0], sizes = [16, 128], strides = [1, 1]} : vector<80x128xbf16> to vector<16x128xbf16>
    %46 = vector.extract_strided_slice %41 {offsets = [64, 0], sizes = [16, 128], strides = [1, 1]} : vector<80x128xbf16> to vector<16x128xbf16>
    %47 = tpu.concatenate %42, %43, %44, %45, %46 in 1 : vector<16x128xbf16>, vector<16x128xbf16>, vector<16x128xbf16>, vector<16x128xbf16>, vector<16x128xbf16> -> vector<16x640xbf16>
    %c0_25 = arith.constant 0 : index
    %c0_26 = arith.constant 0 : index
    %48 = vector.load %arg10[%c0_25, %c0_26] : memref<640x128xbf16, #tpu.memory_space<vmem>>, vector<640x128xbf16>
    %cst_27 = arith.constant dense<0.000000e+00> : vector<16x128xf32>
    %49 = tpu.matmul %47, %48, %cst_27 {dimension_numbers = #tpu.dot_dimension_numbers<[1], [0], [0], [1], [0, 0, 1, 1], [], []>} : vector<16x640xbf16>, vector<640x128xbf16>, vector<16x128xf32> -> vector<16x128xf32>
    %c0_28 = arith.constant 0 : index
    %c0_29 = arith.constant 0 : index
    %50 = vector.load %arg11[%c0_28, %c0_29] : memref<1x128xf32, #tpu.memory_space<vmem>>, vector<1x128xf32>
    %51 = vector.broadcast %50 : vector<1x128xf32> to vector<16x128xf32>
    %52 = arith.addf %49, %51 : vector<16x128xf32>
    %cst_30 = arith.constant 0.000000e+00 : f32
    %53 = vector.broadcast %cst_30 : f32 to vector<16x128xf32>
    %54 = arith.maximumf %52, %53 : vector<16x128xf32>
    %55 = arith.truncf %54 : vector<16x128xf32> to vector<16x128xbf16>
    %c0_31 = arith.constant 0 : index
    %c0_32 = arith.constant 0 : index
    %56 = vector.load %arg12[%c0_31, %c0_32] : memref<128x128xbf16, #tpu.memory_space<vmem>>, vector<128x128xbf16>
    %cst_33 = arith.constant dense<0.000000e+00> : vector<16x128xf32>
    %57 = tpu.matmul %55, %56, %cst_33 {dimension_numbers = #tpu.dot_dimension_numbers<[1], [0], [0], [1], [0, 0, 1, 1], [], []>} : vector<16x128xbf16>, vector<128x128xbf16>, vector<16x128xf32> -> vector<16x128xf32>
    %c0_34 = arith.constant 0 : index
    %c0_35 = arith.constant 0 : index
    %58 = vector.load %arg13[%c0_34, %c0_35] : memref<1x128xf32, #tpu.memory_space<vmem>>, vector<1x128xf32>
    %59 = vector.broadcast %58 : vector<1x128xf32> to vector<16x128xf32>
    %60 = arith.addf %57, %59 : vector<16x128xf32>
    %cst_36 = arith.constant 0.000000e+00 : f32
    %61 = vector.broadcast %cst_36 : f32 to vector<16x128xf32>
    %62 = arith.maximumf %60, %61 : vector<16x128xf32>
    %63 = arith.truncf %62 : vector<16x128xf32> to vector<16x128xbf16>
    %c0_37 = arith.constant 0 : index
    %c0_38 = arith.constant 0 : index
    %64 = vector.load %arg14[%c0_37, %c0_38] : memref<128x128xbf16, #tpu.memory_space<vmem>>, vector<128x128xbf16>
    %cst_39 = arith.constant dense<0.000000e+00> : vector<16x128xf32>
    %65 = tpu.matmul %63, %64, %cst_39 {dimension_numbers = #tpu.dot_dimension_numbers<[1], [0], [0], [1], [0, 0, 1, 1], [], []>} : vector<16x128xbf16>, vector<128x128xbf16>, vector<16x128xf32> -> vector<16x128xf32>
    %c0_40 = arith.constant 0 : index
    %c0_41 = arith.constant 0 : index
    %66 = vector.load %arg15[%c0_40, %c0_41] : memref<1x128xf32, #tpu.memory_space<vmem>>, vector<1x128xf32>
    %67 = vector.broadcast %66 : vector<1x128xf32> to vector<16x128xf32>
    %68 = arith.addf %65, %67 : vector<16x128xf32>
    %c0_42 = arith.constant 0 : index
    %c0_43 = arith.constant 0 : index
    %c0_44 = arith.constant 0 : index
    %69 = vector.load %arg16[%c0_42, %c0_43, %c0_44] : memref<1x16x128xf32, #tpu.memory_space<vmem>>, vector<1x16x128xf32>
    %70 = vector.shape_cast %69 : vector<1x16x128xf32> to vector<16x128xf32>
    %71 = vector.shape_cast %68 : vector<16x128xf32> to vector<1x16x128xf32>
    tpu.vector_store %arg16[%c0_42, %c0_43, %c0_44], %71 {strides = array<i32>} : memref<1x16x128xf32, #tpu.memory_space<vmem>>, vector<1x16x128xf32>,
    return
  }
  func.func @transform_0(%arg0: i32) -> (i32, i32, i32) {
    %c0_i32 = arith.constant 0 : i32
    %c0_i32_0 = arith.constant 0 : i32
    %c0_i32_1 = arith.constant 0 : i32
    return %arg0, %c0_i32, %c0_i32_0 : i32, i32, i32
  }
  func.func @transform_1(%arg0: i32) -> (i32, i32) {
    %c0_i32 = arith.constant 0 : i32
    %c0_i32_0 = arith.constant 0 : i32
    %c0_i32_1 = arith.constant 0 : i32
    return %c0_i32, %c0_i32_0 : i32, i32
  }
  func.func @transform_2(%arg0: i32) -> (i32, i32) {
    %c0_i32 = arith.constant 0 : i32
    %c0_i32_0 = arith.constant 0 : i32
    %c0_i32_1 = arith.constant 0 : i32
    return %c0_i32, %c0_i32_0 : i32, i32
  }
  func.func @transform_3(%arg0: i32) -> (i32, i32) {
    %c0_i32 = arith.constant 0 : i32
    %c0_i32_0 = arith.constant 0 : i32
    %c0_i32_1 = arith.constant 0 : i32
    return %c0_i32, %c0_i32_0 : i32, i32
  }
  func.func @transform_4(%arg0: i32) -> (i32, i32) {
    %c0_i32 = arith.constant 0 : i32
    %c0_i32_0 = arith.constant 0 : i32
    %c0_i32_1 = arith.constant 0 : i32
    return %c0_i32, %c0_i32_0 : i32, i32
  }
  func.func @transform_5(%arg0: i32) -> (i32, i32) {
    %c0_i32 = arith.constant 0 : i32
    %c0_i32_0 = arith.constant 0 : i32
    %c0_i32_1 = arith.constant 0 : i32
    return %c0_i32, %c0_i32_0 : i32, i32
  }
  func.func @transform_6(%arg0: i32) -> (i32, i32) {
    %c0_i32 = arith.constant 0 : i32
    %c0_i32_0 = arith.constant 0 : i32
    %c0_i32_1 = arith.constant 0 : i32
    return %c0_i32, %c0_i32_0 : i32, i32
  }
  func.func @transform_7(%arg0: i32) -> (i32, i32) {
    %c0_i32 = arith.constant 0 : i32
    %c0_i32_0 = arith.constant 0 : i32
    %c0_i32_1 = arith.constant 0 : i32
    return %c0_i32, %c0_i32_0 : i32, i32
  }
  func.func @transform_8(%arg0: i32) -> (i32, i32) {
    %c0_i32 = arith.constant 0 : i32
    %c0_i32_0 = arith.constant 0 : i32
    %c0_i32_1 = arith.constant 0 : i32
    return %c0_i32, %c0_i32_0 : i32, i32
  }
  func.func @transform_9(%arg0: i32) -> (i32, i32) {
    %c0_i32 = arith.constant 0 : i32
    %c0_i32_0 = arith.constant 0 : i32
    %c0_i32_1 = arith.constant 0 : i32
    return %c0_i32, %c0_i32_0 : i32, i32
  }
  func.func @transform_10(%arg0: i32) -> (i32, i32) {
    %c0_i32 = arith.constant 0 : i32
    %c0_i32_0 = arith.constant 0 : i32
    %c0_i32_1 = arith.constant 0 : i32
    return %c0_i32, %c0_i32_0 : i32, i32
  }
  func.func @transform_11(%arg0: i32) -> (i32, i32) {
    %c0_i32 = arith.constant 0 : i32
    %c0_i32_0 = arith.constant 0 : i32
    %c0_i32_1 = arith.constant 0 : i32
    return %c0_i32, %c0_i32_0 : i32, i32
  }
  func.func @transform_12(%arg0: i32) -> (i32, i32) {
    %c0_i32 = arith.constant 0 : i32
    %c0_i32_0 = arith.constant 0 : i32
    %c0_i32_1 = arith.constant 0 : i32
    return %c0_i32, %c0_i32_0 : i32, i32
  }
  func.func @transform_13(%arg0: i32) -> (i32, i32) {
    %c0_i32 = arith.constant 0 : i32
    %c0_i32_0 = arith.constant 0 : i32
    %c0_i32_1 = arith.constant 0 : i32
    return %c0_i32, %c0_i32_0 : i32, i32
  }
  func.func @transform_14(%arg0: i32) -> (i32, i32) {
    %c0_i32 = arith.constant 0 : i32
    %c0_i32_0 = arith.constant 0 : i32
    %c0_i32_1 = arith.constant 0 : i32
    return %c0_i32, %c0_i32_0 : i32, i32
  }
  func.func @transform_15(%arg0: i32) -> (i32, i32, i32) {
    %c0_i32 = arith.constant 0 : i32
    %c0_i32_0 = arith.constant 0 : i32
    %c0_i32_1 = arith.constant 0 : i32
    return %arg0, %c0_i32, %c0_i32_0 : i32, i32, i32
  }
}

</mosaic_0001>

<bundles_post_ra>
// kernel: tile.13
= control target key start
LH: loop header
LB: loop body
LE: loop exit
PB: predicated region body
PF: predicated region fallthrough
CT: control target
= control target key end

     0   :  { %s40_s0 = inlined_call_operand.vmem [shape: f32[6], index: 0, kind: input, shape index: {}]   ;;  %s41_s1 = inlined_call_operand.vmem [shape: f32[28,6], index: 1, kind: output, shape index: {}]  }
   0x1   :  { %v4_v0 = vld [vmem:[%s40_s0] ss:$0 sm:$0xff] }
   0x2   :  { %5 = vst [vmem:[%s41_s1] sm:$0xff] %v4_v0  ;;  %12 = vst [vmem:[%s41_s1 + $0x8] sm:$0xff] %v4_v0 }
   0x3   :  { %13 = vst [vmem:[%s41_s1 + $0x10] sm:$0xff] %v4_v0  ;;  %14 = vst [vmem:[%s41_s1 + $0x18] sm:$0xff] %v4_v0 }

// kernel: tile.14
= control target key start
LH: loop header
LB: loop body
LE: loop exit
PB: predicated region body
PF: predicated region fallthrough
CT: control target
= control target key end

     0   :  { %vm9_vm0 = vcmask 15360   ;;  %s241_s12 = smov 126   ;;  %s242_s13 = smov 114   ;;  %vm3_vm1 = vcmask 48128   ;;  %vm13_vm2 = vcmask 31744   ;;  %vm16_vm3 = vcmask 1048560   ;;  %s368_s0 = inlined_call_operand.vmem [shape: f32[28,6], index: 0, kind: input, shape index: {}]   ;;  %s369_s1 = inlined_call_operand.vmem [shape: f32[168], index: 1, kind: output, shape index: {}]  }
   0x1   :  { %v186_v0 = vld [vmem:[%s368_s0 + $0x15] sm:$0x1]   ;;  %v189_v3 = vld [vmem:[%s368_s0 + $0x13] sm:$0x1]   ;;  %v188_v4 = vld [vmem:[%s368_s0 + $0x14] sm:$0x1]  }
   0x2   :  { %v187_v1 = vld [vmem:[%s368_s0 + $0x15] sm:$0x1]   ;;  %26 = vrot.lane.b32.xlu1 %v189_v3, %s242_s13  ;;  %v190_v5 = vld [vmem:[%s368_s0 + $0x12] sm:$0x1]   ;;  %s243_s18 = smov 120   ;;  %s244_s19 = smov 108  }
   0x3   :  { %v10_v2 = vsel %vm9_vm0, %v187_v1, %v186_v0  ;;  %v191_v6 = vld [vmem:[%s368_s0 + $0x11] sm:$0x1]   ;;  %v192_v7 = vld [vmem:[%s368_s0 + $0x10] sm:$0x1]   ;;  %s245_s24 = smov 102   ;;  %s246_s25 = smov 96  }
   0x4   :  { %11 = vrot.lane.b32.xlu0 %v10_v2, %s241_s12  ;;  %v193_v8 = vld [vmem:[%s368_s0 + $0xf] sm:$0x1]   ;;  %v194_v9 = vld [vmem:[%s368_s0 + $0xe] sm:$0x1]   ;;  %s247_s30 = smov 90   ;;  %s248_s2 = smov 84  }
   0x5   :  { %v2_v10 = vld [vmem:[%s368_s0] sm:$0x1]   ;;  %v195_v11 = vld [vmem:[%s368_s0 + $0xd] sm:$0x1]   ;;  %v196_v12 = vld [vmem:[%s368_s0 + $0xc] sm:$0x1]  }
   0x6   :  { %32 = vrot.lane.b32.xlu1 %v190_v5, %s244_s19  ;;  %4 = vst.msk [vmem:[#allocation0] sm:$0x1] %vm3_vm1, %v2_v10   ;;  %s249_s9 = smov 78   ;;  %s250_s10 = smov 72   ;;  %v197_v13 = vld [vmem:[%s368_s0 + $0xb] sm:$0x1]  }
   0x7   :  { %v198_v14 = vld [vmem:[%s368_s0 + $0xa] sm:$0x1]   ;;  %s251_s15 = smov 66   ;;  %s252_s16 = smov 60   ;;  %v199_v15 = vld [vmem:[%s368_s0 + $0x9] sm:$0x1]  }
   0x8   :  { %20 = vrot.lane.b32.xlu0 %v188_v4, %s243_s18  ;;  %v200_v16 = vld [vmem:[%s368_s0 + $0x8] sm:$0x1]   ;;  %s253_s21 = smov 54   ;;  %s254_s22 = smov 48   ;;  %v201_v17 = vld [vmem:[%s368_s0 + $0x7] sm:$0x1]  }
   0x9   :  { %v202_v18 = vld [vmem:[%s368_s0 + $0x6] sm:$0x1]   ;;  %s255_s27 = smov 42   ;;  %s256_s28 = smov 36   ;;  %v203_v19 = vld [vmem:[%s368_s0 + $0x1b] sm:$0x1]  }
   0xa   :  { %44 = vrot.lane.b32.xlu1 %v192_v7, %s246_s25  ;;  %v204_v20 = vld [vmem:[%s368_s0 + $0x5] sm:$0x1]   ;;  %s257_s4 = smov 34   ;;  %s258_s5 = smov 30   ;;  %v205_v21 = vld [vmem:[%s368_s0 + $0x1a] sm:$0x1]  }
   0xb   :  { %v206_v22 = vld [vmem:[%s368_s0 + $0x4] sm:$0x1]   ;;  %s260_s11 = smov 24   ;;  %v207_v23 = vld [vmem:[%s368_s0 + $0x19] sm:$0x1]   ;;  %s262_s17 = smov 18  }
   0xc   :  { %38 = vrot.lane.b32.xlu0 %v191_v6, %s245_s24  ;;  %v208_v24 = vld [vmem:[%s368_s0 + $0x3] sm:$0x1]   ;;  %v209_v25 = vld [vmem:[%s368_s0 + $0x18] sm:$0x1]   ;;  %v210_v26 = vld [vmem:[%s368_s0 + $0x2] sm:$0x1]  }
   0xd   :  { %s264_s23 = smov 12   ;;  %v211_v27 = vld [vmem:[%s368_s0 + $0x17] sm:$0x1]   ;;  %v212_v28 = vld [vmem:[%s368_s0 + $0x1] sm:$0x1]   ;;  %s266_s29 = smov 6  }
   0xe   :  { %56 = vrot.lane.b32.xlu1 %v194_v9, %s248_s2  ;;  %v213_v29 = vld [vmem:[%s368_s0 + $0x16] sm:$0x1]   ;;  %s267_s0 = smov 4   ;;  %vm22_vm4 = vcmask 1032128   ;;  %vm28_vm5 = vcmask 982928   ;;  %vm34_vm6 = vcmask 933728  }
   0xf   :  { %vm40_vm7 = vcmask 884528   ;;  %vm46_vm8 = vcmask 835328   ;;  %vm52_vm9 = vcmask 786128   ;;  %vm58_vm10 = vcmask 736928  }
  0x10   :  { %50 = vrot.lane.b32.xlu0 %v193_v8, %s247_s30  ;;  %vm64_vm11 = vcmask 687728   ;;  %vm70_vm12 = vcmask 638528   ;;  %vm76_vm13 = vcmask 589328   ;;  %vm82_vm14 = vcmask 540128  }
  0x11   :  { %vm88_vm15 = vcmask 490928   ;;  %vm94_vm0 = vcmask 441728   ;;  %vm100_vm1 = vcmask 392528  }
  0x12   :  { %68 = vrot.lane.b32.xlu1 %v196_v12, %s250_s10  ;;  %s259_s10 = smov 28  }
  0x14   :  { %62 = vrot.lane.b32.xlu0 %v195_v11, %s249_s9 }
  0x16   :  { %80 = vrot.lane.b32.xlu1 %v198_v14, %s252_s16  ;;  %s261_s16 = smov 22  }
  0x18   :  { %74 = vrot.lane.b32.xlu0 %v197_v13, %s251_s15 }
  0x1a   :  { %92 = vrot.lane.b32.xlu1 %v200_v16, %s254_s22  ;;  %s263_s22 = smov 16  }
  0x1c   :  { %86 = vrot.lane.b32.xlu0 %v199_v15, %s253_s21 }
  0x1e   :  { %104 = vrot.lane.b32.xlu1 %v202_v18, %s256_s28  ;;  %s265_s28 = smov 10  }
  0x20   :  { %98 = vrot.lane.b32.xlu0 %v201_v17, %s255_s27 }
  0x22   :  { %117 = vrot.lane.b32.xlu1 %v204_v20, %s258_s5 }
  0x24   :  { %110 = vrot.lane.b32.xlu0 %v203_v19, %s257_s4 }
  0x26   :  { %130 = vrot.lane.b32.xlu1 %v206_v22, %s260_s11 }
  0x28   :  { %123 = vrot.lane.b32.xlu0 %v205_v21, %s259_s10 }
  0x2a   :  { %143 = vrot.lane.b32.xlu1 %v208_v24, %s262_s17 }
  0x2c   :  { %136 = vrot.lane.b32.xlu0 %v207_v23, %s261_s16 }
  0x2e   :  { %156 = vrot.lane.b32.xlu1 %v210_v26, %s264_s23 }
  0x30   :  { %149 = vrot.lane.b32.xlu0 %v209_v25, %s263_s22 }
  0x32   :  { %169 = vrot.lane.b32.xlu1 %v212_v28, %s266_s29 }
  0x34   :  { %162 = vrot.lane.b32.xlu0 %v211_v27, %s265_s28 }
  0x38   :  { %175 = vrot.lane.b32.xlu0 %v213_v29, %s267_s0 }
  0x74   :  { %v27_v31 = vpop.permute.xlu1 %26  }
  0x76   :  { %v12_v30 = vpop.permute.xlu0 %11  }
  0x77   :  { %15 = vst.msk [vmem:[#allocation0 + $0x1] sm:$0x1] %vm13_vm2, %v12_v30   ;;  %vm106_vm2 = vcmask 343328  }
  0x78   :  { %17 = vst.msk [vmem:[#allocation0] sm:$0x1] %vm16_vm3, %v12_v30   ;;  %v33_v33 = vpop.permute.xlu1 %32   ;;  %vm112_vm3 = vcmask 326928  }
  0x7a   :  { %v21_v32 = vpop.permute.xlu0 %20  }
  0x7b   :  { %23 = vst.msk [vmem:[#allocation0] sm:$0x1] %vm22_vm4, %v21_v32   ;;  %vm119_vm4 = vcmask 294128  }
  0x7c   :  { %29 = vst.msk [vmem:[#allocation0] sm:$0x1] %vm28_vm5, %v27_v31   ;;  %v45_v35 = vpop.permute.xlu1 %44   ;;  %vm125_vm5 = vcmask 277728  }
  0x7d   :  { %35 = vst.msk [vmem:[#allocation0] sm:$0x1] %vm34_vm6, %v33_v33   ;;  %vm132_vm6 = vcmask 244928  }
  0x7e   :  { %v39_v34 = vpop.permute.xlu0 %38  }
  0x7f   :  { %41 = vst.msk [vmem:[#allocation0] sm:$0x1] %vm40_vm7, %v39_v34   ;;  %vm138_vm7 = vcmask 228528  }
  0x80   :  { %47 = vst.msk [vmem:[#allocation0] sm:$0x1] %vm46_vm8, %v45_v35   ;;  %v57_v37 = vpop.permute.xlu1 %56   ;;  %vm145_vm8 = vcmask 195728  }
  0x82   :  { %v51_v36 = vpop.permute.xlu0 %50  }
  0x83   :  { %53 = vst.msk [vmem:[#allocation0] sm:$0x1] %vm52_vm9, %v51_v36   ;;  %vm151_vm9 = vcmask 179328  }
  0x84   :  { %59 = vst.msk [vmem:[#allocation0] sm:$0x1] %vm58_vm10, %v57_v37   ;;  %v69_v39 = vpop.permute.xlu1 %68   ;;  %vm158_vm10 = vcmask 146528  }
  0x86   :  { %v63_v38 = vpop.permute.xlu0 %62  }
  0x87   :  { %65 = vst.msk [vmem:[#allocation0] sm:$0x1] %vm64_vm11, %v63_v38   ;;  %vm164_vm11 = vcmask 130128  }
  0x88   :  { %71 = vst.msk [vmem:[#allocation0] sm:$0x1] %vm70_vm12, %v69_v39   ;;  %v81_v41 = vpop.permute.xlu1 %80   ;;  %vm171_vm12 = vcmask 97328  }
  0x8a   :  { %v75_v40 = vpop.permute.xlu0 %74  }
  0x8b   :  { %77 = vst.msk [vmem:[#allocation0] sm:$0x1] %vm76_vm13, %v75_v40   ;;  %vm177_vm13 = vcmask 80928  }
  0x8c   :  { %83 = vst.msk [vmem:[#allocation0] sm:$0x1] %vm82_vm14, %v81_v41   ;;  %v93_v43 = vpop.permute.xlu1 %92  }
  0x8e   :  { %v87_v42 = vpop.permute.xlu0 %86  }
  0x8f   :  { %89 = vst.msk [vmem:[#allocation0] sm:$0x1] %vm88_vm15, %v87_v42  }
  0x90   :  { %95 = vst.msk [vmem:[#allocation0] sm:$0x1] %vm94_vm0, %v93_v43   ;;  %v105_v45 = vpop.permute.xlu1 %104  }
  0x92   :  { %v99_v44 = vpop.permute.xlu0 %98  }
  0x93   :  { %101 = vst.msk [vmem:[#allocation0] sm:$0x1] %vm100_vm1, %v99_v44  }
  0x94   :  { %107 = vst.msk [vmem:[#allocation0] sm:$0x1] %vm106_vm2, %v105_v45   ;;  %v118_v47 = vpop.permute.xlu1 %117  }
  0x95   :  { %120 = vst.msk [vmem:[#allocation0] sm:$0x1] %vm119_vm4, %v118_v47  }
  0x96   :  { %v111_v46 = vpop.permute.xlu0 %110  }
  0x97   :  { %114 = vst.msk [vmem:[#allocation0 + $0x1] sm:$0x1] %vm112_vm3, %v111_v46  }
  0x98   :  { %v131_v49 = vpop.permute.xlu1 %130  }
  0x99   :  { %133 = vst.msk [vmem:[#allocation0] sm:$0x1] %vm132_vm6, %v131_v49  }
  0x9a   :  { %v124_v48 = vpop.permute.xlu0 %123  }
  0x9b   :  { %127 = vst.msk [vmem:[#allocation0 + $0x1] sm:$0x1] %vm125_vm5, %v124_v48  }
  0x9c   :  { %v144_v51 = vpop.permute.xlu1 %143  }
  0x9d   :  { %146 = vst.msk [vmem:[#allocation0] sm:$0x1] %vm145_vm8, %v144_v51  }
  0x9e   :  { %v137_v50 = vpop.permute.xlu0 %136  }
  0x9f   :  { %140 = vst.msk [vmem:[#allocation0 + $0x1] sm:$0x1] %vm138_vm7, %v137_v50  }
  0xa0   :  { %v157_v53 = vpop.permute.xlu1 %156  }
  0xa1   :  { %159 = vst.msk [vmem:[#allocation0] sm:$0x1] %vm158_vm10, %v157_v53  }
  0xa2   :  { %v150_v52 = vpop.permute.xlu0 %149  }
  0xa3   :  { %153 = vst.msk [vmem:[#allocation0 + $0x1] sm:$0x1] %vm151_vm9, %v150_v52  }
  0xa4   :  { %v170_v55 = vpop.permute.xlu1 %169  }
  0xa5   :  { %172 = vst.msk [vmem:[#allocation0] sm:$0x1] %vm171_vm12, %v170_v55  }
  0xa6   :  { %v163_v54 = vpop.permute.xlu0 %162  }
  0xa7   :  { %166 = vst.msk [vmem:[#allocation0 + $0x1] sm:$0x1] %vm164_vm11, %v163_v54  }
  0xaa   :  { %v176_v56 = vpop.permute.xlu0 %175  }
  0xab   :  { %179 = vst.msk [vmem:[#allocation0 + $0x1] sm:$0x1] %vm177_vm13, %v176_v56  }
  0xb2   :  { %v183_v57 = vld [vmem:[#allocation0] sm:$0x3] }
  0xb3   :  { %185 = vst [vmem:[%s369_s1] sm:$0x3] %v183_v57 }

// kernel: tile.18
= control target key start
LH: loop header
LB: loop body
LE: loop exit
PB: predicated region body
PF: predicated region fallthrough
CT: control target
= control target key end

     0   :  { %s28_s0 = inlined_call_operand.vmem [shape: f32[16], index: 0, kind: input, shape index: {}]   ;;  %s29_s1 = inlined_call_operand.vmem [shape: f32[10,16], index: 1, kind: output, shape index: {}]  }
   0x1   :  { %v4_v0 = vld [vmem:[%s28_s0] ss:$0 sm:$0xff] }
   0x2   :  { %5 = vst [vmem:[%s29_s1] sm:$0xff] %v4_v0  ;;  %8 = vst [vmem:[%s29_s1 + $0x8] sm:$0xff] %v4_v0 }

// kernel: tile.19
= control target key start
LH: loop header
LB: loop body
LE: loop exit
PB: predicated region body
PF: predicated region fallthrough
CT: control target
= control target key end

     0   :  { %s69_s10 = smov 112   ;;  %s70_s11 = smov 80   ;;  %vm4_vm0 = vcmask 130048   ;;  %vm10_vm1 = vcmask 1048448   ;;  %vm16_vm2 = vcmask 917248   ;;  %vm22_vm3 = vcmask 786048   ;;  %s113_s0 = inlined_call_operand.vmem [shape: f32[10,16], index: 0, kind: input, shape index: {}]   ;;  %s114_s1 = inlined_call_operand.vmem [shape: f32[160], index: 1, kind: output, shape index: {}]  }
   0x1   :  { %v55_v0 = vld [vmem:[%s113_s0 + $0x7] sm:$0x1]   ;;  %v57_v1 = vld [vmem:[%s113_s0 + $0x5] sm:$0x1]   ;;  %v56_v2 = vld [vmem:[%s113_s0 + $0x6] sm:$0x1]  }
   0x2   :  { %8 = vrot.lane.b32.xlu0 %v55_v0, %s69_s10  ;;  %20 = vrot.lane.b32.xlu1 %v57_v1, %s70_s11  ;;  %v58_v3 = vld [vmem:[%s113_s0 + $0x4] sm:$0x1]   ;;  %s2_s16 = smov 3  ;;  %s71_s17 = smov 96   ;;  %v59_v5 = vld [vmem:[%s113_s0 + $0x3] sm:$0x1]  }
   0x3   :  { %s72_s18 = smov 64   ;;  %v3_v4 = vld [vmem:[%s113_s0] ss:$8 sm:%s2_s16]   ;;  %v60_v6 = vld [vmem:[%s113_s0 + $0x2] sm:$0x1]   ;;  %s43_s25 = smov 3 }
   0x4   :  { %5 = vst.msk [vmem:[#allocation0] sm:$0x3] %vm4_vm0, %v3_v4   ;;  %s73_s26 = smov 48   ;;  %s74_s27 = smov 32   ;;  %v61_v7 = vld [vmem:[%s113_s0 + $0x1] ss:$8 sm:%s43_s25]  }
   0x5   :  { %s75_s0 = smov 16   ;;  %vm28_vm4 = vcmask 654848   ;;  %vm34_vm5 = vcmask 523648   ;;  %vm40_vm6 = vcmask 392448   ;;  %vm47_vm7 = vcmask 261248  }
   0x6   :  { %14 = vrot.lane.b32.xlu0 %v56_v2, %s71_s17  ;;  %26 = vrot.lane.b32.xlu1 %v58_v3, %s72_s18 }
   0xa   :  { %32 = vrot.lane.b32.xlu0 %v59_v5, %s73_s26  ;;  %38 = vrot.lane.b32.xlu1 %v60_v6, %s74_s27 }
   0xe   :  { %45 = vrot.lane.b32.xlu0 %v61_v7, %s75_s0 }
  0x74   :  { %v9_v8 = vpop.permute.xlu0 %8   ;;  %v21_v9 = vpop.permute.xlu1 %20  }
  0x75   :  { %11 = vst.msk [vmem:[#allocation0] sm:$0x1] %vm10_vm1, %v9_v8  }
  0x78   :  { %v15_v10 = vpop.permute.xlu0 %14   ;;  %v27_v11 = vpop.permute.xlu1 %26  }
  0x79   :  { %17 = vst.msk [vmem:[#allocation0] sm:$0x1] %vm16_vm2, %v15_v10  }
  0x7a   :  { %23 = vst.msk [vmem:[#allocation0] sm:$0x1] %vm22_vm3, %v21_v9  }
  0x7b   :  { %29 = vst.msk [vmem:[#allocation0] sm:$0x1] %vm28_vm4, %v27_v11  }
  0x7c   :  { %v33_v12 = vpop.permute.xlu0 %32   ;;  %v39_v13 = vpop.permute.xlu1 %38  }
  0x7d   :  { %35 = vst.msk [vmem:[#allocation0] sm:$0x1] %vm34_vm5, %v33_v12  }
  0x7e   :  { %41 = vst.msk [vmem:[#allocation0] sm:$0x1] %vm40_vm6, %v39_v13  }
  0x80   :  { %v46_v14 = vpop.permute.xlu0 %45  }
  0x81   :  { %48 = vst.msk [vmem:[#allocation0] sm:$0x3] %vm47_vm7, %v46_v14  }
  0x88   :  { %v52_v15 = vld [vmem:[#allocation0] sm:$0x3] }
  0x89   :  { %54 = vst [vmem:[%s114_s1] sm:$0x3] %v52_v15 }

// kernel: lenet_forward.1
= control target key start
LH: loop header
LB: loop body
LE: loop exit
PB: predicated region body
PF: predicated region fallthrough
CT: control target
= control target key end

     0   :  { %s7227_s18 = smov 0   ;;  %s8891_s0 = inlined_call_operand.vmem [shape: bf16[2,512,128], index: 0, kind: input, shape index: {}]   ;;  %s8892_s1 = inlined_call_operand.vmem [shape: bf16[640,256], index: 1, kind: input, shape index: {}]   ;;  %s8893_s2 = inlined_call_operand.vmem [shape: f32[1,256], index: 2, kind: input, shape index: {}]   ;;  %s8894_s3 = inlined_call_operand.vmem [shape: bf16[224,448], index: 3, kind: input, shape index: {}]   ;;  %s8895_s4 = inlined_call_operand.vmem [shape: bf16[256,128], index: 4, kind: input, shape index: {}]   ;;  %s8896_s5 = inlined_call_operand.vmem [shape: bf16[640,256], index: 5, kind: input, shape index: {}]   ;;  %s8897_s6 = inlined_call_operand.vmem [shape: f32[1,256], index: 6, kind: input, shape index: {}]   ;;  %s8898_s7 = inlined_call_operand.vmem [shape: bf16[80,160], index: 7, kind: input, shape index: {}]   ;;  %s8899_s8 = inlined_call_operand.vmem [shape: bf16[256,128], index: 8, kind: input, shape index: {}]   ;;  %s8900_s9 = inlined_call_operand.vmem [shape: bf16[640,128], index: 9, kind: input, shape index: {}]   ;;  %s8901_s10 = inlined_call_operand.vmem [shape: f32[1,128], index: 10, kind: input, shape index: {}]   ;;  %s8902_s11 = inlined_call_operand.vmem [shape: bf16[128,128], index: 11, kind: input, shape index: {}]   ;;  %s8903_s12 = inlined_call_operand.vmem [shape: f32[1,128], index: 12, kind: input, shape index: {}]   ;;  %s8904_s13 = inlined_call_operand.vmem [shape: bf16[128,128], index: 13, kind: input, shape index: {}]   ;;  %s8905_s14 = inlined_call_operand.vmem [shape: f32[1,128], index: 14, kind: input, shape index: {}]   ;;  %s8906_s15 = inlined_call_operand.vmem [shape: f32[2,16,128], index: 15, kind: output, shape index: {}]  }
   0x1 LB: > { %s5521_s19 = sadd.s32 4294967295, %s7142_s18   ;;  %p5525_p0 = scmp.ge.s32.totalorder %s7142_s18, 1  ;;  %s7142_s18 = sphi %s7227_s18, %s25_s18  }
   0x2   : > { %p437_p1 = scmp.lt.s32.totalorder %s7142_s18, 3 }
   0x4   : > { %p438_p2 = pnand %p5525_p0, %p437_p1 }
   0x5   : > { %v6676_v0 = vld [vmem:[%s8892_s1 + $0x4] ss:$8 sps:$4 sm:$0xff] (!%p438_p2)   ;;  %v6678_v1 = vld [vmem:[%s8892_s1] ss:$8 sps:$4 sm:$0xff] (!%p438_p2)   ;;  %v6679_v2 = vld [vmem:[%s8892_s1 + $0x14] ss:$8 sps:$4 sm:$0xff] (!%p438_p2)  }
   0x6   : > { %441 = sbr.rel (%p438_p2) target bundleno = 3009 (0xbc1), region = 80  ;;  %1244 = vmatprep.subr.bf16.mxu0 (!%p438_p2), %v6676_v0  ;;  %v6681_v3 = vld [vmem:[%s8892_s1 + $0x10] ss:$8 sps:$4 sm:$0xff] (!%p438_p2)   ;;  %v6682_v4 = vld [vmem:[%s8892_s1 + $0x24] ss:$8 sps:$4 sm:$0xff] (!%p438_p2)   ;;  %p485_p3 = scmp.lt.s32.totalorder (!%p438_p2), %s5521_s19, 1 }
   0x7   : > { %1245 = vmatpush1.bf16.msra.mxu0 (!%p438_p2), %v6678_v1  ;;  %v6684_v5 = vld [vmem:[%s8892_s1 + $0x20] ss:$8 sps:$4 sm:$0xff] (!%p438_p2)   ;;  %v6685_v6 = vld [vmem:[%s8892_s1 + $0x34] ss:$8 sps:$4 sm:$0xff] (!%p438_p2)   ;;  %v6687_v7 = vld [vmem:[%s8892_s1 + $0x30] ss:$8 sps:$4 sm:$0xff] (!%p438_p2)  }
   0x8   : > { %1246 = vmatprep.subr.bf16.mxu0 (!%p438_p2), %v6679_v2  ;;  %v6688_v8 = vld [vmem:[%s8892_s1 + $0x44] ss:$8 sps:$4 sm:$0xff] (!%p438_p2)   ;;  %v6690_v9 = vld [vmem:[%s8892_s1 + $0x40] ss:$8 sps:$4 sm:$0xff] (!%p438_p2)   ;;  %v6691_v10 = vld [vmem:[%s8892_s1 + $0x54] ss:$8 sps:$4 sm:$0xff] (!%p438_p2)  }
   0x9   : > { %v6693_v11 = vld [vmem:[%s8892_s1 + $0x50] ss:$8 sps:$4 sm:$0xff] (!%p438_p2)   ;;  %v6694_v12 = vld [vmem:[%s8892_s1 + $0x64] ss:$8 sps:$4 sm:$0xff] (!%p438_p2)   ;;  %v6696_v14 = vld [vmem:[%s8892_s1 + $0x60] ss:$8 sps:$4 sm:$0xff] (!%p438_p2)  }
   0xa   : > { %v6697_v15 = vld [vmem:[%s8892_s1 + $0x74] ss:$8 sps:$4 sm:$0xff] (!%p438_p2)   ;;  %v6699_v16 = vld [vmem:[%s8892_s1 + $0x70] ss:$8 sps:$4 sm:$0xff] (!%p438_p2)   ;;  %v6700_v17 = vld [vmem:[%s8892_s1 + $0x84] ss:$8 sps:$4 sm:$0xff] (!%p438_p2)  }
   0xb   : > { %1247 = vmatpush1.bf16.msra.mxu0 (!%p438_p2), %v6681_v3  ;;  %v6702_v18 = vld [vmem:[%s8892_s1 + $0x80] ss:$8 sps:$4 sm:$0xff] (!%p438_p2)   ;;  %v6703_v19 = vld [vmem:[%s8892_s1 + $0x94] ss:$8 sps:$4 sm:$0xff] (!%p438_p2)   ;;  %v6705_v20 = vld [vmem:[%s8892_s1 + $0x90] ss:$8 sps:$4 sm:$0xff] (!%p438_p2)  }
   0xc   : > { %1248 = vmatprep.subr.bf16.mxu0 (!%p438_p2), %v6682_v4  ;;  %v6706_v21 = vld [vmem:[%s8892_s1 + $0xa4] ss:$8 sps:$4 sm:$0xff] (!%p438_p2)   ;;  %v6708_v22 = vld [vmem:[%s8892_s1 + $0xa0] ss:$8 sps:$4 sm:$0xff] (!%p438_p2)   ;;  %v6709_v23 = vld [vmem:[%s8892_s1 + $0xb4] ss:$8 sps:$4 sm:$0xff] (!%p438_p2)  }
   0xd   : > { %s8908_s19 = smov (!%p485_p3, %s5521_s19), 1  ;;  %v6711_v24 = vld [vmem:[%s8892_s1 + $0xb0] ss:$8 sps:$4 sm:$0xff]   ;;  %v6712_v25 = vld [vmem:[%s8892_s1 + $0xc4] ss:$8 sps:$4 sm:$0xff]   ;;  %vm3086_vm0 = vcmask 523264  }
   0xe   : > { %s5900_s29 = sshll.u32 %s8908_s19, 8  ;;  %v6714_v26 = vld [vmem:[%s8892_s1 + $0xc0] ss:$8 sps:$4 sm:$0xff]   ;;  %v6715_v27 = vld [vmem:[%s8892_s1 + $0xd4] ss:$8 sps:$4 sm:$0xff]   ;;  %vm4690_vm1 = vcmask 261120  }
   0xf   : > { %1249 = vmatpush1.bf16.msra.mxu0 %v6684_v5  ;;  %s7277_s21 = scalar_lea.vmem %s8891_s0, %s5900_s29  ;;  %v6717_v28 = vld [vmem:[%s8892_s1 + $0xd0] ss:$8 sps:$4 sm:$0xff]   ;;  %v6718_v29 = vld [vmem:[%s8892_s1 + $0xe4] ss:$8 sps:$4 sm:$0xff]   ;;  %v6720_v30 = vld [vmem:[%s8892_s1 + $0xe0] ss:$8 sps:$4 sm:$0xff]  }
  0x10   : > { %1250 = vmatprep.subr.bf16.mxu0 %v6685_v6  ;;  %v6724_v13 = vld [vmem:[%s7277_s21 + $0x8] sm:$0xff]   ;;  %v6721_v31 = vld [vmem:[%s8892_s1 + $0xf4] ss:$8 sps:$4 sm:$0xff]   ;;  %v6723_v32 = vld [vmem:[%s8892_s1 + $0xf0] ss:$8 sps:$4 sm:$0xff]   ;;  %vm7146_vm2 = vmmov 0  }
  0x11   : > { %1276 = vmatprep.mubr.bf16.mxu0 %v6724_v13  ;;  %v6725_v33 = vld [vmem:[%s7277_s21] sm:$0xff]   ;;  %v7342_v34 = vld [vmem:[%s7277_s21 + $0x10] sm:$0xff]   ;;  %v7346_v35 = vld [vmem:[%s7277_s21 + $0x18] sm:$0xff]  }
  0x12   : > { %v7350_v36 = vld [vmem:[%s7277_s21 + $0x20] sm:$0xff]   ;;  %v7355_v37 = vld [vmem:[%s7277_s21 + $0x28] sm:$0xff]   ;;  %v7360_v38 = vld [vmem:[%s7277_s21 + $0x30] sm:$0xff]  }
  0x13   : > { %1251 = vmatpush1.bf16.msra.mxu0 %v6687_v7  ;;  %v6748_v39 = vld [vmem:[%s8892_s1 + $0x104] ss:$8 sps:$4 sm:$0xff]   ;;  %v6746_v40 = vld [vmem:[%s8892_s1 + $0x100] ss:$8 sps:$4 sm:$0xff]   ;;  %v6749_v41 = vld [vmem:[%s8892_s1 + $0x110] ss:$8 sps:$4 sm:$0xff]  }
  0x14   : > { %1252 = vmatprep.subr.bf16.mxu0 %v6688_v8  ;;  %v6751_v42 = vld [vmem:[%s8892_s1 + $0x114] ss:$8 sps:$4 sm:$0xff]   ;;  %v6755_v44 = vld [vmem:[%s8892_s1 + $0x124] ss:$8 sps:$4 sm:$0xff]   ;;  %v6753_v45 = vld [vmem:[%s8892_s1 + $0x120] ss:$8 sps:$4 sm:$0xff]  }
  0x15   : > { %v7377_v43 = vld [vmem:[%s7277_s21 + $0x38] sm:$0xff]   ;;  %v7394_v48 = vld [vmem:[%s7277_s21 + $0x40] sm:$0xff]   ;;  %v7411_v53 = vld [vmem:[%s7277_s21 + $0x48] sm:$0xff]  }
  0x16   : > { %v6756_v46 = vld [vmem:[%s8892_s1 + $0x130] ss:$8 sps:$4 sm:$0xff]   ;;  %v6758_v47 = vld [vmem:[%s8892_s1 + $0x134] ss:$8 sps:$4 sm:$0xff]   ;;  %v6762_v49 = vld [vmem:[%s8892_s1 + $0x144] ss:$8 sps:$4 sm:$0xff]  }
  0x17   : > { %1253 = vmatpush1.bf16.msra.mxu0 %v6690_v9  ;;  %v6760_v50 = vld [vmem:[%s8892_s1 + $0x140] ss:$8 sps:$4 sm:$0xff]   ;;  %v6763_v51 = vld [vmem:[%s8892_s1 + $0x150] ss:$8 sps:$4 sm:$0xff]   ;;  %v6765_v52 = vld [vmem:[%s8892_s1 + $0x154] ss:$8 sps:$4 sm:$0xff]  }
  0x18   : > { %1254 = vmatprep.subr.bf16.mxu0 %v6691_v10  ;;  %v6769_v54 = vld [vmem:[%s8892_s1 + $0x164] ss:$8 sps:$4 sm:$0xff]   ;;  %v6767_v55 = vld [vmem:[%s8892_s1 + $0x160] ss:$8 sps:$4 sm:$0xff]   ;;  %v6770_v56 = vld [vmem:[%s8892_s1 + $0x170] ss:$8 sps:$4 sm:$0xff]  }
  0x19   : > { %v6772_v57 = vld [vmem:[%s8892_s1 + $0x174] ss:$8 sps:$4 sm:$0xff]   ;;  %v6776_v59 = vld [vmem:[%s8892_s1 + $0x184] ss:$8 sps:$4 sm:$0xff]   ;;  %v6774_v60 = vld [vmem:[%s8892_s1 + $0x180] ss:$8 sps:$4 sm:$0xff]  }
  0x1a   : > { %v7428_v58 = vld [vmem:[%s7277_s21 + $0x50] sm:$0xff]   ;;  %v7445_v63 = vld [vmem:[%s7277_s21 + $0x58] sm:$0xff]   ;;  %v6783_v0 = vld [vmem:[%s8892_s1 + $0x1a4] ss:$8 sps:$4 sm:$0xff]  }
  0x1b   : > { %1255 = vmatpush1.bf16.msra.mxu0 %v6693_v11  ;;  %v6777_v61 = vld [vmem:[%s8892_s1 + $0x190] ss:$8 sps:$4 sm:$0xff]   ;;  %v6779_v62 = vld [vmem:[%s8892_s1 + $0x194] ss:$8 sps:$4 sm:$0xff]   ;;  %v6781_v1 = vld [vmem:[%s8892_s1 + $0x1a0] ss:$8 sps:$4 sm:$0xff]  }
  0x1c   : > { %1256 = vmatprep.subr.bf16.mxu0 %v6694_v12  ;;  %v6784_v2 = vld [vmem:[%s8892_s1 + $0x1b0] ss:$8 sps:$4 sm:$0xff]   ;;  %v6786_v3 = vld [vmem:[%s8892_s1 + $0x1b4] ss:$8 sps:$4 sm:$0xff]   ;;  %v7462_v4 = vld [vmem:[%s7277_s21 + $0x60] sm:$0xff]  }
  0x1d   : > { %v6790_v5 = vld [vmem:[%s8892_s1 + $0x1c4] ss:$8 sps:$4 sm:$0xff]   ;;  %v6788_v6 = vld [vmem:[%s8892_s1 + $0x1c0] ss:$8 sps:$4 sm:$0xff]   ;;  %v6791_v7 = vld [vmem:[%s8892_s1 + $0x1d0] ss:$8 sps:$4 sm:$0xff]  }
  0x1e   : > { %v6793_v8 = vld [vmem:[%s8892_s1 + $0x1d4] ss:$8 sps:$4 sm:$0xff]   ;;  %v7479_v9 = vld [vmem:[%s7277_s21 + $0x68] sm:$0xff]   ;;  %v6798_v12 = vld [vmem:[%s8892_s1 + $0x1f0] ss:$8 sps:$4 sm:$0xff]  }
  0x1f   : > { %1257 = vmatpush1.bf16.msra.mxu0 %v6696_v14  ;;  %v6797_v10 = vld [vmem:[%s8892_s1 + $0x1e4] ss:$8 sps:$4 sm:$0xff]   ;;  %v6795_v11 = vld [vmem:[%s8892_s1 + $0x1e0] ss:$8 sps:$4 sm:$0xff]   ;;  %v7496_v14 = vld [vmem:[%s7277_s21 + $0x70] sm:$0xff]  }
  0x20   : > { %1258 = vmatprep.subr.bf16.mxu0 %v6697_v15  ;;  %v7501_v15 = vld [vmem:[%s7277_s21 + $0x78] sm:$0xff]  }
  0x23   : > { %1259 = vmatpush1.bf16.msra.mxu0 %v6699_v16  ;;  %v7506_v16 = vld [vmem:[%s7277_s21 + $0x80] sm:$0xff]  }
  0x24   : > { %1260 = vmatprep.subr.bf16.mxu0 %v6700_v17  ;;  %v7511_v17 = vld [vmem:[%s7277_s21 + $0x88] sm:$0xff]  }
  0x27   : > { %1261 = vmatpush1.bf16.msra.mxu0 %v6702_v18  ;;  %v7516_v18 = vld [vmem:[%s7277_s21 + $0x90] sm:$0xff]  }
  0x28   : > { %1262 = vmatprep.subr.bf16.mxu0 %v6703_v19  ;;  %v7521_v19 = vld [vmem:[%s7277_s21 + $0x98] sm:$0xff]  }
  0x2b   : > { %1263 = vmatpush1.bf16.msra.mxu0 %v6705_v20  ;;  %v7526_v20 = vld [vmem:[%s7277_s21 + $0xa0] sm:$0xff]  }
  0x2c   : > { %1264 = vmatprep.subr.bf16.mxu0 %v6706_v21  ;;  %v7531_v21 = vld [vmem:[%s7277_s21 + $0xa8] sm:$0xff]  }
  0x2f   : > { %1265 = vmatpush1.bf16.msra.mxu0 %v6708_v22  ;;  %v7536_v22 = vld [vmem:[%s7277_s21 + $0xb0] sm:$0xff]  }
  0x30   : > { %1266 = vmatprep.subr.bf16.mxu0 %v6709_v23  ;;  %v7541_v23 = vld [vmem:[%s7277_s21 + $0xb8] sm:$0xff]  }
  0x33   : > { %1267 = vmatpush1.bf16.msra.mxu0 %v6711_v24  ;;  %v7546_v24 = vld [vmem:[%s7277_s21 + $0xc0] sm:$0xff]  }
  0x34   : > { %1268 = vmatprep.subr.bf16.mxu0 %v6712_v25  ;;  %v7551_v25 = vld [vmem:[%s7277_s21 + $0xc8] sm:$0xff]  }
  0x37   : > { %1269 = vmatpush1.bf16.msra.mxu0 %v6714_v26  ;;  %v7556_v26 = vld [vmem:[%s7277_s21 + $0xd0] sm:$0xff]  }
  0x38   : > { %1270 = vmatprep.subr.bf16.mxu0 %v6715_v27  ;;  %v7561_v27 = vld [vmem:[%s7277_s21 + $0xd8] sm:$0xff]  }
  0x3b   : > { %1271 = vmatpush1.bf16.msra.mxu0 %v6717_v28  ;;  %v7566_v28 = vld [vmem:[%s7277_s21 + $0xe0] sm:$0xff]  }
  0x3c   : > { %1272 = vmatprep.subr.bf16.mxu0 %v6718_v29  ;;  %v6801_v29 = vld [vmem:[%s8892_s1 + $0x200] ss:$8 sps:$4 sm:$0xff]  }
  0x3f   : > { %1273 = vmatpush1.bf16.msra.mxu0 %v6720_v30  ;;  %v6803_v30 = vld [vmem:[%s8892_s1 + $0x204] ss:$8 sps:$4 sm:$0xff]  }
  0x40   : > { %1274 = vmatprep.subr.bf16.mxu0 %v6721_v31  ;;  %v6804_v31 = vld [vmem:[%s8892_s1 + $0x210] ss:$8 sps:$4 sm:$0xff]  }
  0x43   : > { %1275 = vmatpush1.bf16.msra.mxu0 %v6723_v32  ;;  %v6806_v32 = vld [vmem:[%s8892_s1 + $0x214] ss:$8 sps:$4 sm:$0xff]  }
  0x44   : > { %1557 = vmatprep.subr.bf16.mxu0 %v6748_v39  ;;  %v6816_v39 = vld [vmem:[%s8892_s1 + $0x244] ss:$8 sps:$4 sm:$0xff]  }
  0x46   : > { %1277 = vmatmul.mubr.bf16.vlgmr.msra.gmra.mrb[0].mxu0 %v6725_v33  ;;  %v6809_v33 = vld [vmem:[%s8892_s1 + $0x224] ss:$8 sps:$4 sm:$0xff]  }
  0x47   : > { %1286 = vmatprep.mubr.bf16.mxu0 %v7342_v34  ;;  %1558 = vmatpush1.bf16.msra.mxu0 %v6746_v40  ;;  %v6814_v40 = vld [vmem:[%s8892_s1 + $0x240] ss:$8 sps:$4 sm:$0xff]  }
  0x48   : > { %1559 = vmatprep.subr.bf16.mxu0 %v6751_v42  ;;  %v6817_v42 = vld [vmem:[%s8892_s1 + $0x250] ss:$8 sps:$4 sm:$0xff]  }
  0x4b   : > { %1560 = vmatpush1.bf16.msra.mxu0 %v6749_v41  ;;  %v6819_v41 = vld [vmem:[%s8892_s1 + $0x254] ss:$8 sps:$4 sm:$0xff]  }
  0x4c   : > { %1561 = vmatprep.subr.bf16.mxu0 %v6755_v44  ;;  %v6823_v44 = vld [vmem:[%s8892_s1 + $0x264] ss:$8 sps:$4 sm:$0xff]  }
  0x4e   : > { %1287 = vmatmul.mubr.bf16.gmra.mrb[4].mxu0 %v6724_v13  ;;  %v6800_v13 = vld [vmem:[%s8892_s1 + $0x1f4] ss:$8 sps:$4 sm:$0xff]  }
  0x4f   : > { %1296 = vmatprep.mubr.bf16.mxu0 %v7346_v35  ;;  %1562 = vmatpush1.bf16.msra.mxu0 %v6753_v45  ;;  %v6821_v45 = vld [vmem:[%s8892_s1 + $0x260] ss:$8 sps:$4 sm:$0xff]  }
  0x50   : > { %1563 = vmatprep.subr.bf16.mxu0 %v6758_v47  ;;  %v6824_v47 = vld [vmem:[%s8892_s1 + $0x270] ss:$8 sps:$4 sm:$0xff]  }
  0x53   : > { %1564 = vmatpush1.bf16.msra.mxu0 %v6756_v46  ;;  %v6826_v46 = vld [vmem:[%s8892_s1 + $0x274] ss:$8 sps:$4 sm:$0xff]  }
  0x54   : > { %1565 = vmatprep.subr.bf16.mxu0 %v6762_v49  ;;  %v7144_v49 = vmov 0  }
  0x55   : > { %2479 = vmatprep.subr.bf16.mxu1 %v7144_v49 }
  0x56   : > { %1297 = vmatmul.mubr.bf16.gmra.mrb[8].mxu0 %v7342_v34 }
  0x57   : > { %1306 = vmatprep.mubr.bf16.mxu0 %v7350_v36  ;;  %1566 = vmatpush1.bf16.msra.mxu0 %v6760_v50  ;;  %v7672_v50 = vld [vmem:[%s7277_s21 + $0xe8] sm:$0xff]  }
  0x58   : > { %1567 = vmatprep.subr.bf16.mxu0 %v6765_v52  ;;  %v7135_v52 = vld [vmem:[%s7277_s21 + $0x20] sm:$0xff]  }
  0x5b   : > { %1568 = vmatpush1.bf16.msra.mxu0 %v6763_v51  ;;  %v7677_v51 = vld [vmem:[%s7277_s21 + $0xf0] sm:$0xff]  }
  0x5c   : > { %1569 = vmatprep.subr.bf16.mxu0 %v6769_v54  ;;  %v6827_v54 = vld [vmem:[%s8895_s4] sm:$0xff]  }
  0x5d   : > { %2480 = vmatpush1.bf16.msra.mxu1 %v6827_v54 }
  0x5e   : > { %1307 = vmatmul.mubr.bf16.gmra.mrb[12].mxu0 %v7346_v35  ;;  %2481 = vmatprep.subr.bf16.mxu1 %v7144_v49 }
  0x5f   : > { %1316 = vmatprep.mubr.bf16.mxu0 %v7355_v37  ;;  %1570 = vmatpush1.bf16.msra.mxu0 %v6767_v55  ;;  %v6833_v55 = vld [vmem:[%s8895_s4 + $0x30] sm:$0xff]  }
  0x60   : > { %1571 = vmatprep.subr.bf16.mxu0 %v6772_v57  ;;  %v6835_v57 = vld [vmem:[%s8895_s4 + $0x40] sm:$0xff]  }
  0x63   : > { %1572 = vmatpush1.bf16.msra.mxu0 %v6770_v56  ;;  %v6834_v56 = vld [vmem:[%s8895_s4 + $0x38] sm:$0xff]  }
  0x64   : > { %1573 = vmatprep.subr.bf16.mxu0 %v6776_v59  ;;  %v6837_v59 = vld [vmem:[%s8895_s4 + $0x50] sm:$0xff]  }
  0x66   : > { %1317 = vmatmul.mubr.bf16.gmra.mrb[16].mxu0 %v7350_v36 }
  0x67   : > { %1326 = vmatprep.mubr.bf16.mxu0 %v7360_v38  ;;  %1574 = vmatpush1.bf16.msra.mxu0 %v6774_v60  ;;  %v6838_v60 = vld [vmem:[%s8895_s4 + $0x58] sm:$0xff]  }
  0x68   : > { %1575 = vmatprep.subr.bf16.mxu0 %v6779_v62  ;;  %v6840_v62 = vld [vmem:[%s8895_s4 + $0x68] sm:$0xff]  }
  0x6b   : > { %1576 = vmatpush1.bf16.msra.mxu0 %v6777_v61  ;;  %v6839_v61 = vld [vmem:[%s8895_s4 + $0x60] sm:$0xff]  }
  0x6c   : > { %1577 = vmatprep.subr.bf16.mxu0 %v6783_v0  ;;  %v6843_v0 = vld [vmem:[%s8895_s4 + $0x78] sm:$0xff]  }
  0x6e   : > { %1327 = vmatmul.mubr.bf16.gmra.mrb[20].mxu0 %v7355_v37 }
  0x6f   : > { %1336 = vmatprep.mubr.bf16.mxu0 %v7377_v43  ;;  %1578 = vmatpush1.bf16.msra.mxu0 %v6781_v1  ;;  %v834_v1 = vlaneseq }
  0x70   : > { %1579 = vmatprep.subr.bf16.mxu0 %v6786_v3 }
  0x73   : > { %1580 = vmatpush1.bf16.msra.mxu0 %v6784_v2  ;;  %v7797_v2 = vshrl.u32 %v834_v1, 7 }
  0x74   : > { %1581 = vmatprep.subr.bf16.mxu0 %v6790_v5 }
  0x75   : > { %v836_v3 = vsub.s32 0, %v7797_v2  ;;  %v840_v5 = vsub.s32 1, %v7797_v2 }
  0x76   : > { %1337 = vmatmul.mubr.bf16.gmra.mrb[24].mxu0 %v7360_v38 }
  0x77   : > { %1346 = vmatprep.mubr.bf16.mxu0 %v7394_v48  ;;  %1582 = vmatpush1.bf16.msra.mxu0 %v6788_v6 }
  0x78   : > { %1583 = vmatprep.subr.bf16.mxu0 %v6793_v8 }
  0x7b   : > { %1584 = vmatpush1.bf16.msra.mxu0 %v6791_v7 }
  0x7c   : > { %1585 = vmatprep.subr.bf16.mxu0 %v6797_v10 }
  0x7e   : > { %1347 = vmatmul.mubr.bf16.gmra.mrb[28].mxu0 %v7377_v43 }
  0x7f   : > { %1356 = vmatprep.mubr.bf16.mxu0 %v7411_v53  ;;  %1586 = vmatpush1.bf16.msra.mxu0 %v6795_v11  ;;  %v6842_v11 = vld [vmem:[%s7277_s21 + $0xf8] sm:$0xff]   ;;  %s5901_s21 = sshll.u32 %s8908_s19, 4 }
  0x80   : > { %1587 = vmatprep.subr.bf16.mxu0 %v6800_v13  ;;  %s494_s28 = scalar_lea.vmem %s8906_s15, %s5901_s21 }
  0x83   : > { %1588 = vmatpush1.bf16.msra.mxu0 %v6798_v12 }
  0x84   : > { %1870 = vmatprep.subr.bf16.mxu0 %v6803_v30 }
  0x86   : > { %1357 = vmatmul.mubr.bf16.gmra.mrb[32].mxu0 %v7394_v48 }
  0x87   : > { %1366 = vmatprep.mubr.bf16.mxu0 %v7428_v58 }
  0x8e   : > { %1367 = vmatmul.mubr.bf16.gmra.mrb[36].mxu0 %v7411_v53 }
  0x8f   : > { %1376 = vmatprep.mubr.bf16.mxu0 %v7445_v63 }
  0x96   : > { %1377 = vmatmul.mubr.bf16.gmra.mrb[40].mxu0 %v7428_v58 }
  0x97   : > { %1386 = vmatprep.mubr.bf16.mxu0 %v7462_v4 }
  0x9e   : > { %1387 = vmatmul.mubr.bf16.gmra.mrb[44].mxu0 %v7445_v63 }
  0x9f   : > { %1396 = vmatprep.mubr.bf16.mxu0 %v7479_v9 }
  0xa6   : > { %1397 = vmatmul.mubr.bf16.gmra.mrb[48].mxu0 %v7462_v4 }
  0xa7   : > { %1406 = vmatprep.mubr.bf16.mxu0 %v7496_v14 }
  0xae   : > { %1407 = vmatmul.mubr.bf16.gmra.mrb[52].mxu0 %v7479_v9 }
  0xaf   : > { %1416 = vmatprep.mubr.bf16.mxu0 %v7501_v15 }
  0xb6   : > { %1417 = vmatmul.mubr.bf16.gmra.mrb[56].mxu0 %v7496_v14 }
  0xb7   : > { %1426 = vmatprep.mubr.bf16.mxu0 %v7506_v16 }
  0xbe   : > { %1427 = vmatmul.mubr.bf16.gmra.mrb[60].mxu0 %v7501_v15 }
  0xbf   : > { %1436 = vmatprep.mubr.bf16.mxu0 %v7511_v17 }
  0xc6   : > { %1437 = vmatmul.mubr.bf16.gmra.mrb[64].mxu0 %v7506_v16 }
  0xc7   : > { %1446 = vmatprep.mubr.bf16.mxu0 %v7516_v18 }
  0xce   : > { %1447 = vmatmul.mubr.bf16.gmra.mrb[68].mxu0 %v7511_v17 }
  0xcf   : > { %1456 = vmatprep.mubr.bf16.mxu0 %v7521_v19 }
  0xd6   : > { %1457 = vmatmul.mubr.bf16.gmra.mrb[72].mxu0 %v7516_v18 }
  0xd7   : > { %1466 = vmatprep.mubr.bf16.mxu0 %v7526_v20 }
  0xde   : > { %1467 = vmatmul.mubr.bf16.gmra.mrb[76].mxu0 %v7521_v19 }
  0xdf   : > { %1476 = vmatprep.mubr.bf16.mxu0 %v7531_v21 }
  0xe6   : > { %1477 = vmatmul.mubr.bf16.gmra.mrb[80].mxu0 %v7526_v20 }
  0xe7   : > { %1486 = vmatprep.mubr.bf16.mxu0 %v7536_v22 }
  0xee   : > { %1487 = vmatmul.mubr.bf16.gmra.mrb[84].mxu0 %v7531_v21 }
  0xef   : > { %1496 = vmatprep.mubr.bf16.mxu0 %v7541_v23 }
  0xf6   : > { %1497 = vmatmul.mubr.bf16.gmra.mrb[88].mxu0 %v7536_v22 }
  0xf7   : > { %1506 = vmatprep.mubr.bf16.mxu0 %v7546_v24 }
  0xfe   : > { %1507 = vmatmul.mubr.bf16.gmra.mrb[92].mxu0 %v7541_v23 }
  0xff   : > { %1516 = vmatprep.mubr.bf16.mxu0 %v7551_v25 }
 0x106   : > { %1517 = vmatmul.mubr.bf16.gmra.mrb[96].mxu0 %v7546_v24 }
 0x107   : > { %1526 = vmatprep.mubr.bf16.mxu0 %v7556_v26 }
 0x10e   : > { %1527 = vmatmul.mubr.bf16.gmra.mrb[100].mxu0 %v7551_v25 }
 0x10f   : > { %1536 = vmatprep.mubr.bf16.mxu0 %v7561_v27 }
 0x116   : > { %1537 = vmatmul.mubr.bf16.gmra.mrb[104].mxu0 %v7556_v26 }
 0x117   : > { %1546 = vmatprep.mubr.bf16.mxu0 %v7566_v28 }
 0x11e   : > { %1547 = vmatmul.mubr.bf16.gmra.mrb[108].mxu0 %v7561_v27 }
 0x11f   : > { %1589 = vmatprep.mubr.bf16.mxu0 %v7346_v35 }
 0x126   : > { %1590 = vmatmul.mubr.bf16.vlgmr.msra.gmra.mrb[0].mxu0 %v7342_v34  ;;  %v6807_v34 = vld [vmem:[%s8892_s1 + $0x220] ss:$8 sps:$4 sm:$0xff]  }
 0x127   : > { %1599 = vmatprep.mubr.bf16.mxu0 %v7350_v36  ;;  %1871 = vmatpush1.bf16.msra.mxu0 %v6801_v29 }
 0x128   : > { %1872 = vmatprep.subr.bf16.mxu0 %v6806_v32 }
 0x12b   : > { %1873 = vmatpush1.bf16.msra.mxu0 %v6804_v31 }
 0x12c   : > { %1874 = vmatprep.subr.bf16.mxu0 %v6809_v33 }
 0x12e   : > { %1600 = vmatmul.mubr.bf16.gmra.mrb[4].mxu0 %v7346_v35  ;;  %v6812_v35 = vld [vmem:[%s8892_s1 + $0x234] ss:$8 sps:$4 sm:$0xff]  }
 0x12f   : > { %1609 = vmatprep.mubr.bf16.mxu0 %v7355_v37  ;;  %1875 = vmatpush1.bf16.msra.mxu0 %v6807_v34 }
 0x130   : > { %1876 = vmatprep.subr.bf16.mxu0 %v6812_v35 }
 0x136   : > { %1610 = vmatmul.mubr.bf16.gmra.mrb[8].mxu0 %v7350_v36  ;;  %v6810_v36 = vld [vmem:[%s8892_s1 + $0x230] ss:$8 sps:$4 sm:$0xff]  }
 0x137   : > { %1619 = vmatprep.mubr.bf16.mxu0 %v7360_v38  ;;  %1877 = vmatpush1.bf16.msra.mxu0 %v6810_v36 }
 0x138   : > { %1878 = vmatprep.subr.bf16.mxu0 %v6816_v39 }
 0x13b   : > { %1879 = vmatpush1.bf16.msra.mxu0 %v6814_v40 }
 0x13c   : > { %1880 = vmatprep.subr.bf16.mxu0 %v6819_v41 }
 0x13e   : > { %1620 = vmatmul.mubr.bf16.gmra.mrb[12].mxu0 %v7355_v37 }
 0x13f   : > { %1629 = vmatprep.mubr.bf16.mxu0 %v7377_v43  ;;  %1881 = vmatpush1.bf16.msra.mxu0 %v6817_v42 }
 0x140   : > { %1882 = vmatprep.subr.bf16.mxu0 %v6823_v44 }
 0x143   : > { %1883 = vmatpush1.bf16.msra.mxu0 %v6821_v45 }
 0x144   : > { %1884 = vmatprep.subr.bf16.mxu0 %v6826_v46 }
 0x146   : > { %1630 = vmatmul.mubr.bf16.gmra.mrb[16].mxu0 %v7360_v38 }
 0x147   : > { %1639 = vmatprep.mubr.bf16.mxu0 %v7394_v48  ;;  %1885 = vmatpush1.bf16.msra.mxu0 %v6824_v47 }
 0x14e   : > { %1640 = vmatmul.mubr.bf16.gmra.mrb[20].mxu0 %v7377_v43 }
 0x14f   : > { %1649 = vmatprep.mubr.bf16.mxu0 %v7411_v53 }
 0x156   : > { %1650 = vmatmul.mubr.bf16.gmra.mrb[24].mxu0 %v7394_v48 }
 0x157   : > { %1659 = vmatprep.mubr.bf16.mxu0 %v7428_v58 }
 0x15e   : > { %1660 = vmatmul.mubr.bf16.gmra.mrb[28].mxu0 %v7411_v53 }
 0x15f   : > { %1669 = vmatprep.mubr.bf16.mxu0 %v7445_v63 }
 0x166   : > { %1670 = vmatmul.mubr.bf16.gmra.mrb[32].mxu0 %v7428_v58 }
 0x167   : > { %1679 = vmatprep.mubr.bf16.mxu0 %v7462_v4 }
 0x16e   : > { %1680 = vmatmul.mubr.bf16.gmra.mrb[36].mxu0 %v7445_v63 }
 0x16f   : > { %1689 = vmatprep.mubr.bf16.mxu0 %v7479_v9 }
 0x176   : > { %1690 = vmatmul.mubr.bf16.gmra.mrb[40].mxu0 %v7462_v4 }
 0x177   : > { %1699 = vmatprep.mubr.bf16.mxu0 %v7496_v14 }
 0x17e   : > { %1700 = vmatmul.mubr.bf16.gmra.mrb[44].mxu0 %v7479_v9 }
 0x17f   : > { %1709 = vmatprep.mubr.bf16.mxu0 %v7501_v15 }
 0x186   : > { %1710 = vmatmul.mubr.bf16.gmra.mrb[48].mxu0 %v7496_v14 }
 0x187   : > { %1719 = vmatprep.mubr.bf16.mxu0 %v7506_v16 }
 0x18e   : > { %1720 = vmatmul.mubr.bf16.gmra.mrb[52].mxu0 %v7501_v15 }
 0x18f   : > { %1729 = vmatprep.mubr.bf16.mxu0 %v7511_v17 }
 0x196   : > { %1730 = vmatmul.mubr.bf16.gmra.mrb[56].mxu0 %v7506_v16 }
 0x197   : > { %1739 = vmatprep.mubr.bf16.mxu0 %v7516_v18 }
 0x19e   : > { %1740 = vmatmul.mubr.bf16.gmra.mrb[60].mxu0 %v7511_v17 }
 0x19f   : > { %1749 = vmatprep.mubr.bf16.mxu0 %v7521_v19 }
 0x1a6   : > { %1750 = vmatmul.mubr.bf16.gmra.mrb[64].mxu0 %v7516_v18 }
 0x1a7   : > { %1759 = vmatprep.mubr.bf16.mxu0 %v7526_v20 }
 0x1ae   : > { %1760 = vmatmul.mubr.bf16.gmra.mrb[68].mxu0 %v7521_v19 }
 0x1af   : > { %1769 = vmatprep.mubr.bf16.mxu0 %v7531_v21 }
 0x1b6   : > { %1770 = vmatmul.mubr.bf16.gmra.mrb[72].mxu0 %v7526_v20 }
 0x1b7   : > { %1779 = vmatprep.mubr.bf16.mxu0 %v7536_v22 }
 0x1be   : > { %1780 = vmatmul.mubr.bf16.gmra.mrb[76].mxu0 %v7531_v21 }
 0x1bf   : > { %1789 = vmatprep.mubr.bf16.mxu0 %v7541_v23 }
 0x1c6   : > { %1790 = vmatmul.mubr.bf16.gmra.mrb[80].mxu0 %v7536_v22 }
 0x1c7   : > { %1799 = vmatprep.mubr.bf16.mxu0 %v7546_v24 }
 0x1ce   : > { %1800 = vmatmul.mubr.bf16.gmra.mrb[84].mxu0 %v7541_v23 }
 0x1cf   : > { %1809 = vmatprep.mubr.bf16.mxu0 %v7551_v25 }
 0x1d6   : > { %1810 = vmatmul.mubr.bf16.gmra.mrb[88].mxu0 %v7546_v24 }
 0x1d7   : > { %1819 = vmatprep.mubr.bf16.mxu0 %v7556_v26 }
 0x1de   : > { %1820 = vmatmul.mubr.bf16.gmra.mrb[92].mxu0 %v7551_v25 }
 0x1df   : > { %1829 = vmatprep.mubr.bf16.mxu0 %v7561_v27 }
 0x1e6   : > { %1830 = vmatmul.mubr.bf16.gmra.mrb[96].mxu0 %v7556_v26 }
 0x1e7   : > { %1839 = vmatprep.mubr.bf16.mxu0 %v7566_v28 }
 0x1ee   : > { %1840 = vmatmul.mubr.bf16.gmra.mrb[100].mxu0 %v7561_v27 }
 0x1ef   : > { %1849 = vmatprep.mubr.bf16.mxu0 %v7672_v50 }
 0x1f6   : > { %1850 = vmatmul.mubr.bf16.gmra.mrb[104].mxu0 %v7566_v28 }
 0x1f7   : > { %1859 = vmatprep.mubr.bf16.mxu0 %v7677_v51 }
 0x1fe   : > { %1860 = vmatmul.mubr.bf16.gmra.mrb[108].mxu0 %v7672_v50 }
 0x1ff   : > { %1902 = vmatprep.mubr.bf16.mxu0 %v7144_v49 }
 0x206   : > { %1903 = vmatmul.mubr.bf16.vlgmr.msra.gmra.mrb[0].mxu0 %v7135_v52 }
 0x207   : > { %1912 = vmatprep.mubr.bf16.mxu0 %v7144_v49 }
 0x20e   : > { %1913 = vmatmul.mubr.bf16.gmra.mrb[4].mxu0 %v7355_v37  ;;  %v6828_v37 = vld [vmem:[%s8895_s4 + $0x8] sm:$0xff]  }
 0x20f   : > { %1922 = vmatprep.mubr.bf16.mxu0 %v7144_v49  ;;  %2482 = vmatpush1.bf16.msra.mxu1 %v6828_v37 }
 0x210   : > { %2483 = vmatprep.subr.bf16.mxu1 %v7144_v49 }
 0x216   : > { %1923 = vmatmul.mubr.bf16.gmra.mrb[8].mxu0 %v7360_v38  ;;  %v6829_v38 = vld [vmem:[%s8895_s4 + $0x10] sm:$0xff]  }
 0x217   : > { %1932 = vmatprep.mubr.bf16.mxu0 %v7144_v49  ;;  %2484 = vmatpush1.bf16.msra.mxu1 %v6829_v38 }
 0x218   : > { %2485 = vmatprep.subr.bf16.mxu1 %v7144_v49 }
 0x21e   : > { %1933 = vmatmul.mubr.bf16.gmra.mrb[12].mxu0 %v7377_v43  ;;  %v6830_v43 = vld [vmem:[%s8895_s4 + $0x18] sm:$0xff]  }
 0x21f   : > { %1942 = vmatprep.mubr.bf16.mxu0 %v7144_v49  ;;  %2486 = vmatpush1.bf16.msra.mxu1 %v6830_v43 }
 0x220   : > { %2487 = vmatprep.subr.bf16.mxu1 %v7144_v49 }
 0x226   : > { %1943 = vmatmul.mubr.bf16.gmra.mrb[16].mxu0 %v7394_v48  ;;  %v6831_v48 = vld [vmem:[%s8895_s4 + $0x20] sm:$0xff]  }
 0x227   : > { %1952 = vmatprep.mubr.bf16.mxu0 %v7144_v49  ;;  %2488 = vmatpush1.bf16.msra.mxu1 %v6831_v48 }
 0x228   : > { %2489 = vmatprep.subr.bf16.mxu1 %v7144_v49 }
 0x22e   : > { %1953 = vmatmul.mubr.bf16.gmra.mrb[20].mxu0 %v7411_v53  ;;  %v6832_v53 = vld [vmem:[%s8895_s4 + $0x28] sm:$0xff]  }
 0x22f   : > { %1962 = vmatprep.mubr.bf16.mxu0 %v7144_v49  ;;  %2490 = vmatpush1.bf16.msra.mxu1 %v6832_v53 }
 0x230   : > { %2491 = vmatprep.subr.bf16.mxu1 %v7144_v49 }
 0x233   : > { %2492 = vmatpush1.bf16.msra.mxu1 %v6833_v55 }
 0x234   : > { %2493 = vmatprep.subr.bf16.mxu1 %v7144_v49 }
 0x236   : > { %1963 = vmatmul.mubr.bf16.gmra.mrb[24].mxu0 %v7428_v58  ;;  %v6836_v58 = vld [vmem:[%s8895_s4 + $0x48] sm:$0xff]  }
 0x237   : > { %1972 = vmatprep.mubr.bf16.mxu0 %v7144_v49  ;;  %2494 = vmatpush1.bf16.msra.mxu1 %v6834_v56 }
 0x238   : > { %2495 = vmatprep.subr.bf16.mxu1 %v7144_v49 }
 0x23b   : > { %2496 = vmatpush1.bf16.msra.mxu1 %v6835_v57 }
 0x23c   : > { %2497 = vmatprep.subr.bf16.mxu1 %v7144_v49 }
 0x23e   : > { %1973 = vmatmul.mubr.bf16.gmra.mrb[28].mxu0 %v7445_v63  ;;  %v6841_v63 = vld [vmem:[%s8895_s4 + $0x70] sm:$0xff]  }
 0x23f   : > { %1982 = vmatprep.mubr.bf16.mxu0 %v7144_v49  ;;  %2498 = vmatpush1.bf16.msra.mxu1 %v6836_v58 }
 0x240   : > { %2499 = vmatprep.subr.bf16.mxu1 %v7144_v49 }
 0x243   : > { %2500 = vmatpush1.bf16.msra.mxu1 %v6837_v59 }
 0x244   : > { %2501 = vmatprep.subr.bf16.mxu1 %v7144_v49 }
 0x246   : > { %1983 = vmatmul.mubr.bf16.gmra.mrb[32].mxu0 %v7462_v4  ;;  %v832_v4 = vld [vmem:[%s8893_s2] sm:$0x3] }
 0x247   : > { %1992 = vmatprep.mubr.bf16.mxu0 %v7144_v49  ;;  %2502 = vmatpush1.bf16.msra.mxu1 %v6838_v60  ;;  %v7808_v6 = vrot.slane %v832_v4, %v836_v3  ;;  %v7812_v7 = vrot.slane %v832_v4, %v840_v5 }
 0x248   : > { %2503 = vmatprep.subr.bf16.mxu1 %v7144_v49 }
 0x24b   : > { %2504 = vmatpush1.bf16.msra.mxu1 %v6839_v61 }
 0x24c   : > { %2505 = vmatprep.subr.bf16.mxu1 %v7144_v49 }
 0x24e   : > { %1993 = vmatmul.mubr.bf16.gmra.mrb[36].mxu0 %v7479_v9 }
 0x24f   : > { %2002 = vmatprep.mubr.bf16.mxu0 %v7144_v49  ;;  %2506 = vmatpush1.bf16.msra.mxu1 %v6840_v62 }
 0x250   : > { %2507 = vmatprep.subr.bf16.mxu1 %v7144_v49 }
 0x253   : > { %2508 = vmatpush1.bf16.msra.mxu1 %v6841_v63 }
 0x254   : > { %2509 = vmatprep.subr.bf16.mxu1 %v7144_v49 }
 0x256   : > { %2003 = vmatmul.mubr.bf16.gmra.mrb[40].mxu0 %v7496_v14 }
 0x257   : > { %2012 = vmatprep.mubr.bf16.mxu0 %v7144_v49  ;;  %2510 = vmatpush1.bf16.msra.mxu1 %v6843_v0 }
 0x25e   : > { %2013 = vmatmul.mubr.bf16.gmra.mrb[44].mxu0 %v7501_v15 }
 0x25f   : > { %2022 = vmatprep.mubr.bf16.mxu0 %v7144_v49 }
 0x266   : > { %2023 = vmatmul.mubr.bf16.gmra.mrb[48].mxu0 %v7506_v16 }
 0x267   : > { %2032 = vmatprep.mubr.bf16.mxu0 %v7144_v49 }
 0x26e   : > { %2033 = vmatmul.mubr.bf16.gmra.mrb[52].mxu0 %v7511_v17 }
 0x26f   : > { %2042 = vmatprep.mubr.bf16.mxu0 %v7144_v49 }
 0x276   : > { %2043 = vmatmul.mubr.bf16.gmra.mrb[56].mxu0 %v7516_v18 }
 0x277   : > { %2052 = vmatprep.mubr.bf16.mxu0 %v7144_v49 }
 0x27e   : > { %2053 = vmatmul.mubr.bf16.gmra.mrb[60].mxu0 %v7521_v19 }
 0x27f   : > { %2062 = vmatprep.mubr.bf16.mxu0 %v7144_v49 }
 0x286   : > { %2063 = vmatmul.mubr.bf16.gmra.mrb[64].mxu0 %v7526_v20 }
 0x287   : > { %2072 = vmatprep.mubr.bf16.mxu0 %v7144_v49 }
 0x28e   : > { %2073 = vmatmul.mubr.bf16.gmra.mrb[68].mxu0 %v7531_v21 }
 0x28f   : > { %2082 = vmatprep.mubr.bf16.mxu0 %v7144_v49 }
 0x296   : > { %2083 = vmatmul.mubr.bf16.gmra.mrb[72].mxu0 %v7536_v22 }
 0x297   : > { %2092 = vmatprep.mubr.bf16.mxu0 %v7144_v49 }
 0x29e   : > { %2093 = vmatmul.mubr.bf16.gmra.mrb[76].mxu0 %v7541_v23 }
 0x29f   : > { %2102 = vmatprep.mubr.bf16.mxu0 %v7144_v49 }
 0x2a6   : > { %2103 = vmatmul.mubr.bf16.gmra.mrb[80].mxu0 %v7546_v24 }
 0x2a7   : > { %2112 = vmatprep.mubr.bf16.mxu0 %v7144_v49 }
 0x2ae   : > { %2113 = vmatmul.mubr.bf16.gmra.mrb[84].mxu0 %v7551_v25 }
 0x2af   : > { %2122 = vmatprep.mubr.bf16.mxu0 %v7144_v49 }
 0x2b6   : > { %2123 = vmatmul.mubr.bf16.gmra.mrb[88].mxu0 %v7556_v26 }
 0x2b7   : > { %2132 = vmatprep.mubr.bf16.mxu0 %v7144_v49 }
 0x2be   : > { %2133 = vmatmul.mubr.bf16.gmra.mrb[92].mxu0 %v7561_v27 }
 0x2bf   : > { %2142 = vmatprep.mubr.bf16.mxu0 %v7144_v49 }
 0x2c6   : > { %2143 = vmatmul.mubr.bf16.gmra.mrb[96].mxu0 %v7566_v28 }
 0x2c7   : > { %2152 = vmatprep.mubr.bf16.mxu0 %v7144_v49 }
 0x2ce   : > { %2153 = vmatmul.mubr.bf16.gmra.mrb[100].mxu0 %v7672_v50 }
 0x2cf   : > { %2162 = vmatprep.mubr.bf16.mxu0 %v7144_v49 }
 0x2d6   : > { %2163 = vmatmul.mubr.bf16.gmra.mrb[104].mxu0 %v7677_v51 }
 0x2d7   : > { %2172 = vmatprep.mubr.bf16.mxu0 %v7144_v49 }
 0x2d9   : > { %v1904_v8 = vpop.f32.mrb[0].mxu0 }
 0x2da   : > { %v6209_v9 = vadd.f32 %v1904_v8, %v7808_v6  ;;  %v1906_v10 = vpop.f32.mrb[1].mxu0 }
 0x2db   : > { %v6210_v12 = vadd.f32 %v1906_v10, %v7812_v7  ;;  %v1908_v13 = vpop.f32.mrb[2].mxu0 }
 0x2dc   : > { %v6211_v14 = vadd.f32 %v1908_v13, %v7808_v6  ;;  %v1910_v15 = vpop.f32.mrb[3].mxu0  ;;  %v2183_v17 = vmax.f32 %v6209_v9, 0.0 }
 0x2dd   : > { %v6212_v16 = vadd.f32 %v1910_v15, %v7812_v7  ;;  %v2184_v19 = vmax.f32 %v6210_v12, 0.0 }
 0x2de   : > { %v2185_v18 = vmax.f32 %v6211_v14, 0.0  ;;  %2173 = vmatmul.mubr.bf16.gmra.mrb[108].mxu0 %v6842_v11 }
 0x2df   : > { %v2186_v20 = vmax.f32 %v6212_v16, 0.0 }
 0x2e0   : > { %v2295_v21 = vpack.c.bf16 %v2185_v18, %v2183_v17 }
 0x2e1   : > { %v1914_v22 = vpop.f32.mrb[4].mxu0  ;;  %v2296_v23 = vpack.c.bf16 %v2186_v20, %v2184_v19 }
 0x2e2   : > { %v6213_v24 = vadd.f32 %v1914_v22, %v7808_v6  ;;  %v1916_v25 = vpop.f32.mrb[5].mxu0 }
 0x2e3   : > { %v6214_v26 = vadd.f32 %v1916_v25, %v7812_v7  ;;  %v1918_v27 = vpop.f32.mrb[6].mxu0  ;;  %2511 = vmatprep.mubr.bf16.mxu1 %v2296_v23 }
 0x2e4   : > { %v6215_v28 = vadd.f32 %v1918_v27, %v7808_v6  ;;  %v1920_v29 = vpop.f32.mrb[7].mxu0  ;;  %2512 = vmatmul.mubr.bf16.vlgmr.msra.gmra.mrb[0].mxu1 %v2295_v21  ;;  %v2187_v31 = vmax.f32 %v6213_v24, 0.0 }
 0x2e5   : > { %v6216_v30 = vadd.f32 %v1920_v29, %v7812_v7  ;;  %v2188_v33 = vmax.f32 %v6214_v26, 0.0 }
 0x2e6   : > { %v2189_v32 = vmax.f32 %v6215_v28, 0.0 }
 0x2e7   : > { %v2190_v34 = vmax.f32 %v6216_v30, 0.0 }
 0x2e8   : > { %v2297_v35 = vpack.c.bf16 %v2189_v32, %v2187_v31 }
 0x2e9   : > { %v2298_v36 = vpack.c.bf16 %v2190_v34, %v2188_v33  ;;  %v1924_v39 = vpop.f32.mrb[8].mxu0 }
 0x2ea   : > { %v6217_v40 = vadd.f32 %v1924_v39, %v7808_v6  ;;  %v1926_v41 = vpop.f32.mrb[9].mxu0 }
 0x2eb   : > { %v6218_v42 = vadd.f32 %v1926_v41, %v7812_v7  ;;  %v1928_v44 = vpop.f32.mrb[10].mxu0  ;;  %2519 = vmatprep.mubr.bf16.mxu1 %v2298_v36 }
 0x2ec   : > { %v6219_v45 = vadd.f32 %v1928_v44, %v7808_v6  ;;  %v1930_v46 = vpop.f32.mrb[11].mxu0  ;;  %2520 = vmatmul.mubr.bf16.gmra.mrb[4].mxu1 %v2297_v35  ;;  %v2191_v50 = vmax.f32 %v6217_v40, 0.0 }
 0x2ed   : > { %v6220_v47 = vadd.f32 %v1930_v46, %v7812_v7  ;;  %v2192_v52 = vmax.f32 %v6218_v42, 0.0 }
 0x2ee   : > { %v2193_v51 = vmax.f32 %v6219_v45, 0.0 }
 0x2ef   : > { %v2194_v54 = vmax.f32 %v6220_v47, 0.0 }
 0x2f0   : > { %v2299_v37 = vpack.c.bf16 %v2193_v51, %v2191_v50 }
 0x2f1   : > { %v2300_v38 = vpack.c.bf16 %v2194_v54, %v2192_v52  ;;  %v1934_v43 = vpop.f32.mrb[12].mxu0 }
 0x2f2   : > { %v6221_v48 = vadd.f32 %v1934_v43, %v7808_v6  ;;  %v1936_v53 = vpop.f32.mrb[13].mxu0 }
 0x2f3   : > { %v6222_v55 = vadd.f32 %v1936_v53, %v7812_v7  ;;  %v1938_v56 = vpop.f32.mrb[14].mxu0  ;;  %2527 = vmatprep.mubr.bf16.mxu1 %v2300_v38 }
 0x2f4   : > { %v6223_v57 = vadd.f32 %v1938_v56, %v7808_v6  ;;  %v1940_v58 = vpop.f32.mrb[15].mxu0  ;;  %2528 = vmatmul.mubr.bf16.gmra.mrb[8].mxu1 %v2299_v37  ;;  %v2195_v60 = vmax.f32 %v6221_v48, 0.0 }
 0x2f5   : > { %v6224_v59 = vadd.f32 %v1940_v58, %v7812_v7  ;;  %v2196_v62 = vmax.f32 %v6222_v55, 0.0 }
 0x2f6   : > { %v2197_v61 = vmax.f32 %v6223_v57, 0.0 }
 0x2f7   : > { %v2198_v63 = vmax.f32 %v6224_v59, 0.0 }
 0x2f8   : > { %v2301_v0 = vpack.c.bf16 %v2197_v61, %v2195_v60 }
 0x2f9   : > { %v2302_v1 = vpack.c.bf16 %v2198_v63, %v2196_v62  ;;  %v1944_v4 = vpop.f32.mrb[16].mxu0 }
 0x2fa   : > { %v6225_v8 = vadd.f32 %v1944_v4, %v7808_v6  ;;  %v1946_v9 = vpop.f32.mrb[17].mxu0 }
 0x2fb   : > { %v6226_v10 = vadd.f32 %v1946_v9, %v7812_v7  ;;  %v1948_v11 = vpop.f32.mrb[18].mxu0  ;;  %2535 = vmatprep.mubr.bf16.mxu1 %v2302_v1 }
 0x2fc   : > { %v6227_v12 = vadd.f32 %v1948_v11, %v7808_v6  ;;  %v1950_v13 = vpop.f32.mrb[19].mxu0  ;;  %2536 = vmatmul.mubr.bf16.gmra.mrb[12].mxu1 %v2301_v0  ;;  %v2199_v15 = vmax.f32 %v6225_v8, 0.0 }
 0x2fd   : > { %v6228_v14 = vadd.f32 %v1950_v13, %v7812_v7  ;;  %v2200_v17 = vmax.f32 %v6226_v10, 0.0 }
 0x2fe   : > { %v2201_v16 = vmax.f32 %v6227_v12, 0.0 }
 0x2ff   : > { %v2202_v18 = vmax.f32 %v6228_v14, 0.0 }
 0x300   : > { %v2303_v19 = vpack.c.bf16 %v2201_v16, %v2199_v15 }
 0x301   : > { %v2304_v20 = vpack.c.bf16 %v2202_v18, %v2200_v17  ;;  %v1954_v21 = vpop.f32.mrb[20].mxu0 }
 0x302   : > { %v6229_v22 = vadd.f32 %v1954_v21, %v7808_v6  ;;  %v1956_v23 = vpop.f32.mrb[21].mxu0 }
 0x303   : > { %v6230_v24 = vadd.f32 %v1956_v23, %v7812_v7  ;;  %v1958_v25 = vpop.f32.mrb[22].mxu0  ;;  %2543 = vmatprep.mubr.bf16.mxu1 %v2304_v20 }
 0x304   : > { %v6231_v26 = vadd.f32 %v1958_v25, %v7808_v6  ;;  %v1960_v27 = vpop.f32.mrb[23].mxu0  ;;  %2544 = vmatmul.mubr.bf16.gmra.mrb[16].mxu1 %v2303_v19  ;;  %v2203_v29 = vmax.f32 %v6229_v22, 0.0 }
 0x305   : > { %v6232_v28 = vadd.f32 %v1960_v27, %v7812_v7  ;;  %v2204_v31 = vmax.f32 %v6230_v24, 0.0 }
 0x306   : > { %v2205_v30 = vmax.f32 %v6231_v26, 0.0 }
 0x307   : > { %v2206_v32 = vmax.f32 %v6232_v28, 0.0 }
 0x308   : > { %v2305_v33 = vpack.c.bf16 %v2205_v30, %v2203_v29 }
 0x309   : > { %v2306_v34 = vpack.c.bf16 %v2206_v32, %v2204_v31  ;;  %v1964_v35 = vpop.f32.mrb[24].mxu0 }
 0x30a   : > { %v6233_v36 = vadd.f32 %v1964_v35, %v7808_v6  ;;  %v1966_v39 = vpop.f32.mrb[25].mxu0 }
 0x30b   : > { %v6234_v40 = vadd.f32 %v1966_v39, %v7812_v7  ;;  %v1968_v41 = vpop.f32.mrb[26].mxu0  ;;  %2551 = vmatprep.mubr.bf16.mxu1 %v2306_v34 }
 0x30c   : > { %v6235_v42 = vadd.f32 %v1968_v41, %v7808_v6  ;;  %v1970_v44 = vpop.f32.mrb[27].mxu0  ;;  %2552 = vmatmul.mubr.bf16.gmra.mrb[20].mxu1 %v2305_v33  ;;  %v2207_v46 = vmax.f32 %v6233_v36, 0.0 }
 0x30d   : > { %v6236_v45 = vadd.f32 %v1970_v44, %v7812_v7  ;;  %v2208_v50 = vmax.f32 %v6234_v40, 0.0 }
 0x30e   : > { %v2209_v47 = vmax.f32 %v6235_v42, 0.0 }
 0x30f   : > { %v2210_v51 = vmax.f32 %v6236_v45, 0.0 }
 0x310   : > { %v2307_v52 = vpack.c.bf16 %v2209_v47, %v2207_v46 }
 0x311   : > { %v2308_v54 = vpack.c.bf16 %v2210_v51, %v2208_v50  ;;  %v1974_v37 = vpop.f32.mrb[28].mxu0 }
 0x312   : > { %v6237_v38 = vadd.f32 %v1974_v37, %v7808_v6  ;;  %v1976_v43 = vpop.f32.mrb[29].mxu0 }
 0x313   : > { %v6238_v48 = vadd.f32 %v1976_v43, %v7812_v7  ;;  %v1978_v53 = vpop.f32.mrb[30].mxu0  ;;  %2559 = vmatprep.mubr.bf16.mxu1 %v2308_v54 }
 0x314   : > { %v6239_v55 = vadd.f32 %v1978_v53, %v7808_v6  ;;  %v1980_v56 = vpop.f32.mrb[31].mxu0  ;;  %2560 = vmatmul.mubr.bf16.gmra.mrb[24].mxu1 %v2307_v52  ;;  %v2211_v58 = vmax.f32 %v6237_v38, 0.0 }
 0x315   : > { %v6240_v57 = vadd.f32 %v1980_v56, %v7812_v7  ;;  %v2212_v60 = vmax.f32 %v6238_v48, 0.0 }
 0x316   : > { %v2213_v59 = vmax.f32 %v6239_v55, 0.0 }
 0x317   : > { %v2214_v61 = vmax.f32 %v6240_v57, 0.0 }
 0x318   : > { %v2309_v62 = vpack.c.bf16 %v2213_v59, %v2211_v58 }
 0x319   : > { %v2310_v63 = vpack.c.bf16 %v2214_v61, %v2212_v60  ;;  %v1984_v0 = vpop.f32.mrb[32].mxu0 }
 0x31a   : > { %v6241_v1 = vadd.f32 %v1984_v0, %v7808_v6  ;;  %v1986_v4 = vpop.f32.mrb[33].mxu0 }
 0x31b   : > { %v6242_v8 = vadd.f32 %v1986_v4, %v7812_v7  ;;  %v1988_v9 = vpop.f32.mrb[34].mxu0  ;;  %2567 = vmatprep.mubr.bf16.mxu1 %v2310_v63 }
 0x31c   : > { %v6243_v10 = vadd.f32 %v1988_v9, %v7808_v6  ;;  %v1990_v11 = vpop.f32.mrb[35].mxu0  ;;  %2568 = vmatmul.mubr.bf16.gmra.mrb[28].mxu1 %v2309_v62  ;;  %v2215_v13 = vmax.f32 %v6241_v1, 0.0 }
 0x31d   : > { %v6244_v12 = vadd.f32 %v1990_v11, %v7812_v7  ;;  %v2216_v15 = vmax.f32 %v6242_v8, 0.0 }
 0x31e   : > { %v2217_v14 = vmax.f32 %v6243_v10, 0.0 }
 0x31f   : > { %v2218_v16 = vmax.f32 %v6244_v12, 0.0 }
 0x320   : > { %v2311_v17 = vpack.c.bf16 %v2217_v14, %v2215_v13 }
 0x321   : > { %v2312_v18 = vpack.c.bf16 %v2218_v16, %v2216_v15  ;;  %v1994_v19 = vpop.f32.mrb[36].mxu0 }
 0x322   : > { %v6245_v20 = vadd.f32 %v1994_v19, %v7808_v6  ;;  %v1996_v21 = vpop.f32.mrb[37].mxu0 }
 0x323   : > { %v6246_v22 = vadd.f32 %v1996_v21, %v7812_v7  ;;  %v1998_v23 = vpop.f32.mrb[38].mxu0  ;;  %2575 = vmatprep.mubr.bf16.mxu1 %v2312_v18 }
 0x324   : > { %v6247_v24 = vadd.f32 %v1998_v23, %v7808_v6  ;;  %v2000_v25 = vpop.f32.mrb[39].mxu0  ;;  %2576 = vmatmul.mubr.bf16.gmra.mrb[32].mxu1 %v2311_v17  ;;  %v2219_v27 = vmax.f32 %v6245_v20, 0.0 }
 0x325   : > { %v6248_v26 = vadd.f32 %v2000_v25, %v7812_v7  ;;  %v2220_v29 = vmax.f32 %v6246_v22, 0.0 }
 0x326   : > { %v2221_v28 = vmax.f32 %v6247_v24, 0.0 }
 0x327   : > { %v2222_v30 = vmax.f32 %v6248_v26, 0.0 }
 0x328   : > { %v2313_v31 = vpack.c.bf16 %v2221_v28, %v2219_v27 }
 0x329   : > { %v2314_v32 = vpack.c.bf16 %v2222_v30, %v2220_v29  ;;  %v2004_v33 = vpop.f32.mrb[40].mxu0 }
 0x32a   : > { %v6249_v34 = vadd.f32 %v2004_v33, %v7808_v6  ;;  %v2006_v35 = vpop.f32.mrb[41].mxu0 }
 0x32b   : > { %v6250_v36 = vadd.f32 %v2006_v35, %v7812_v7  ;;  %v2008_v39 = vpop.f32.mrb[42].mxu0  ;;  %2583 = vmatprep.mubr.bf16.mxu1 %v2314_v32 }
 0x32c   : > { %v6251_v40 = vadd.f32 %v2008_v39, %v7808_v6  ;;  %v2010_v41 = vpop.f32.mrb[43].mxu0  ;;  %2584 = vmatmul.mubr.bf16.gmra.mrb[36].mxu1 %v2313_v31  ;;  %v2223_v44 = vmax.f32 %v6249_v34, 0.0 }
 0x32d   : > { %v6252_v42 = vadd.f32 %v2010_v41, %v7812_v7  ;;  %v2224_v46 = vmax.f32 %v6250_v36, 0.0 }
 0x32e   : > { %v2225_v45 = vmax.f32 %v6251_v40, 0.0 }
 0x32f   : > { %v2226_v47 = vmax.f32 %v6252_v42, 0.0 }
 0x330   : > { %v2315_v50 = vpack.c.bf16 %v2225_v45, %v2223_v44 }
 0x331   : > { %v2316_v51 = vpack.c.bf16 %v2226_v47, %v2224_v46  ;;  %v2014_v52 = vpop.f32.mrb[44].mxu0 }
 0x332   : > { %v6253_v54 = vadd.f32 %v2014_v52, %v7808_v6  ;;  %v2016_v37 = vpop.f32.mrb[45].mxu0 }
 0x333   : > { %v6254_v38 = vadd.f32 %v2016_v37, %v7812_v7  ;;  %v2018_v43 = vpop.f32.mrb[46].mxu0  ;;  %2591 = vmatprep.mubr.bf16.mxu1 %v2316_v51 }
 0x334   : > { %v6255_v48 = vadd.f32 %v2018_v43, %v7808_v6  ;;  %v2020_v53 = vpop.f32.mrb[47].mxu0  ;;  %2592 = vmatmul.mubr.bf16.gmra.mrb[40].mxu1 %v2315_v50  ;;  %v2227_v56 = vmax.f32 %v6253_v54, 0.0 }
 0x335   : > { %v6256_v55 = vadd.f32 %v2020_v53, %v7812_v7  ;;  %v2228_v58 = vmax.f32 %v6254_v38, 0.0 }
 0x336   : > { %v2229_v57 = vmax.f32 %v6255_v48, 0.0 }
 0x337   : > { %v2230_v59 = vmax.f32 %v6256_v55, 0.0 }
 0x338   : > { %v2317_v60 = vpack.c.bf16 %v2229_v57, %v2227_v56 }
 0x339   : > { %v2318_v61 = vpack.c.bf16 %v2230_v59, %v2228_v58  ;;  %v2024_v62 = vpop.f32.mrb[48].mxu0 }
 0x33a   : > { %v6257_v63 = vadd.f32 %v2024_v62, %v7808_v6  ;;  %v2026_v0 = vpop.f32.mrb[49].mxu0 }
 0x33b   : > { %v6258_v1 = vadd.f32 %v2026_v0, %v7812_v7  ;;  %v2028_v4 = vpop.f32.mrb[50].mxu0  ;;  %2599 = vmatprep.mubr.bf16.mxu1 %v2318_v61 }
 0x33c   : > { %v6259_v8 = vadd.f32 %v2028_v4, %v7808_v6  ;;  %v2030_v9 = vpop.f32.mrb[51].mxu0  ;;  %2600 = vmatmul.mubr.bf16.gmra.mrb[44].mxu1 %v2317_v60  ;;  %v2231_v11 = vmax.f32 %v6257_v63, 0.0 }
 0x33d   : > { %v6260_v10 = vadd.f32 %v2030_v9, %v7812_v7  ;;  %v2232_v13 = vmax.f32 %v6258_v1, 0.0 }
 0x33e   : > { %v2233_v12 = vmax.f32 %v6259_v8, 0.0 }
 0x33f   : > { %v2234_v14 = vmax.f32 %v6260_v10, 0.0 }
 0x340   : > { %v2319_v15 = vpack.c.bf16 %v2233_v12, %v2231_v11 }
 0x341   : > { %v2320_v16 = vpack.c.bf16 %v2234_v14, %v2232_v13  ;;  %v2034_v17 = vpop.f32.mrb[52].mxu0 }
 0x342   : > { %v6261_v18 = vadd.f32 %v2034_v17, %v7808_v6  ;;  %v2036_v19 = vpop.f32.mrb[53].mxu0 }
 0x343   : > { %v6262_v20 = vadd.f32 %v2036_v19, %v7812_v7  ;;  %v2038_v21 = vpop.f32.mrb[54].mxu0  ;;  %2607 = vmatprep.mubr.bf16.mxu1 %v2320_v16 }
 0x344   : > { %v6263_v22 = vadd.f32 %v2038_v21, %v7808_v6  ;;  %v2040_v23 = vpop.f32.mrb[55].mxu0  ;;  %2608 = vmatmul.mubr.bf16.gmra.mrb[48].mxu1 %v2319_v15  ;;  %v2235_v25 = vmax.f32 %v6261_v18, 0.0 }
 0x345   : > { %v6264_v24 = vadd.f32 %v2040_v23, %v7812_v7  ;;  %v2236_v27 = vmax.f32 %v6262_v20, 0.0 }
 0x346   : > { %v2237_v26 = vmax.f32 %v6263_v22, 0.0 }
 0x347   : > { %v2238_v28 = vmax.f32 %v6264_v24, 0.0 }
 0x348   : > { %v2321_v29 = vpack.c.bf16 %v2237_v26, %v2235_v25 }
 0x349   : > { %v2322_v30 = vpack.c.bf16 %v2238_v28, %v2236_v27  ;;  %v2044_v31 = vpop.f32.mrb[56].mxu0 }
 0x34a   : > { %v6265_v32 = vadd.f32 %v2044_v31, %v7808_v6  ;;  %v2046_v33 = vpop.f32.mrb[57].mxu0 }
 0x34b   : > { %v6266_v34 = vadd.f32 %v2046_v33, %v7812_v7  ;;  %v2048_v35 = vpop.f32.mrb[58].mxu0  ;;  %2615 = vmatprep.mubr.bf16.mxu1 %v2322_v30 }
 0x34c   : > { %v6267_v36 = vadd.f32 %v2048_v35, %v7808_v6  ;;  %v2050_v39 = vpop.f32.mrb[59].mxu0  ;;  %2616 = vmatmul.mubr.bf16.gmra.mrb[52].mxu1 %v2321_v29  ;;  %v2239_v41 = vmax.f32 %v6265_v32, 0.0 }
 0x34d   : > { %v6268_v40 = vadd.f32 %v2050_v39, %v7812_v7  ;;  %v2240_v44 = vmax.f32 %v6266_v34, 0.0 }
 0x34e   : > { %v2241_v42 = vmax.f32 %v6267_v36, 0.0 }
 0x34f   : > { %v2242_v45 = vmax.f32 %v6268_v40, 0.0 }
 0x350   : > { %v2323_v46 = vpack.c.bf16 %v2241_v42, %v2239_v41 }
 0x351   : > { %v2324_v47 = vpack.c.bf16 %v2242_v45, %v2240_v44  ;;  %v2054_v50 = vpop.f32.mrb[60].mxu0 }
 0x352   : > { %v6269_v51 = vadd.f32 %v2054_v50, %v7808_v6  ;;  %v2056_v52 = vpop.f32.mrb[61].mxu0 }
 0x353   : > { %v6270_v54 = vadd.f32 %v2056_v52, %v7812_v7  ;;  %v2058_v37 = vpop.f32.mrb[62].mxu0  ;;  %2623 = vmatprep.mubr.bf16.mxu1 %v2324_v47 }
 0x354   : > { %v6271_v38 = vadd.f32 %v2058_v37, %v7808_v6  ;;  %v2060_v43 = vpop.f32.mrb[63].mxu0  ;;  %2624 = vmatmul.mubr.bf16.gmra.mrb[56].mxu1 %v2323_v46  ;;  %v2243_v53 = vmax.f32 %v6269_v51, 0.0 }
 0x355   : > { %v6272_v48 = vadd.f32 %v2060_v43, %v7812_v7  ;;  %v2244_v56 = vmax.f32 %v6270_v54, 0.0 }
 0x356   : > { %v2245_v55 = vmax.f32 %v6271_v38, 0.0 }
 0x357   : > { %v2246_v57 = vmax.f32 %v6272_v48, 0.0 }
 0x358   : > { %v2325_v58 = vpack.c.bf16 %v2245_v55, %v2243_v53 }
 0x359   : > { %v2326_v59 = vpack.c.bf16 %v2246_v57, %v2244_v56  ;;  %v2064_v60 = vpop.f32.mrb[64].mxu0 }
 0x35a   : > { %v6273_v61 = vadd.f32 %v2064_v60, %v7808_v6  ;;  %v2066_v62 = vpop.f32.mrb[65].mxu0 }
 0x35b   : > { %v6274_v63 = vadd.f32 %v2066_v62, %v7812_v7  ;;  %v2068_v0 = vpop.f32.mrb[66].mxu0  ;;  %2631 = vmatprep.mubr.bf16.mxu1 %v2326_v59 }
 0x35c   : > { %v6275_v1 = vadd.f32 %v2068_v0, %v7808_v6  ;;  %v2070_v4 = vpop.f32.mrb[67].mxu0  ;;  %2632 = vmatmul.mubr.bf16.gmra.mrb[60].mxu1 %v2325_v58  ;;  %v2247_v9 = vmax.f32 %v6273_v61, 0.0 }
 0x35d   : > { %v6276_v8 = vadd.f32 %v2070_v4, %v7812_v7  ;;  %v2248_v11 = vmax.f32 %v6274_v63, 0.0 }
 0x35e   : > { %v2249_v10 = vmax.f32 %v6275_v1, 0.0 }
 0x35f   : > { %v2250_v12 = vmax.f32 %v6276_v8, 0.0 }
 0x360   : > { %v2327_v13 = vpack.c.bf16 %v2249_v10, %v2247_v9 }
 0x361   : > { %v2328_v14 = vpack.c.bf16 %v2250_v12, %v2248_v11  ;;  %v2074_v15 = vpop.f32.mrb[68].mxu0 }
 0x362   : > { %v6277_v16 = vadd.f32 %v2074_v15, %v7808_v6  ;;  %v2076_v17 = vpop.f32.mrb[69].mxu0 }
 0x363   : > { %v6278_v18 = vadd.f32 %v2076_v17, %v7812_v7  ;;  %v2078_v19 = vpop.f32.mrb[70].mxu0  ;;  %2639 = vmatprep.mubr.bf16.mxu1 %v2328_v14 }
 0x364   : > { %v6279_v20 = vadd.f32 %v2078_v19, %v7808_v6  ;;  %v2080_v21 = vpop.f32.mrb[71].mxu0  ;;  %2640 = vmatmul.mubr.bf16.gmra.mrb[64].mxu1 %v2327_v13  ;;  %v2251_v23 = vmax.f32 %v6277_v16, 0.0 }
 0x365   : > { %v6280_v22 = vadd.f32 %v2080_v21, %v7812_v7  ;;  %v2252_v25 = vmax.f32 %v6278_v18, 0.0 }
 0x366   : > { %v2253_v24 = vmax.f32 %v6279_v20, 0.0 }
 0x367   : > { %v2254_v26 = vmax.f32 %v6280_v22, 0.0 }
 0x368   : > { %v2329_v27 = vpack.c.bf16 %v2253_v24, %v2251_v23 }
 0x369   : > { %v2330_v28 = vpack.c.bf16 %v2254_v26, %v2252_v25  ;;  %v2084_v29 = vpop.f32.mrb[72].mxu0 }
 0x36a   : > { %v6281_v30 = vadd.f32 %v2084_v29, %v7808_v6  ;;  %v2086_v31 = vpop.f32.mrb[73].mxu0 }
 0x36b   : > { %v6282_v32 = vadd.f32 %v2086_v31, %v7812_v7  ;;  %v2088_v33 = vpop.f32.mrb[74].mxu0  ;;  %2647 = vmatprep.mubr.bf16.mxu1 %v2330_v28 }
 0x36c   : > { %v6283_v34 = vadd.f32 %v2088_v33, %v7808_v6  ;;  %v2090_v35 = vpop.f32.mrb[75].mxu0  ;;  %2648 = vmatmul.mubr.bf16.gmra.mrb[68].mxu1 %v2329_v27  ;;  %v2255_v39 = vmax.f32 %v6281_v30, 0.0 }
 0x36d   : > { %v6284_v36 = vadd.f32 %v2090_v35, %v7812_v7  ;;  %v2256_v41 = vmax.f32 %v6282_v32, 0.0 }
 0x36e   : > { %v2257_v40 = vmax.f32 %v6283_v34, 0.0 }
 0x36f   : > { %v2258_v42 = vmax.f32 %v6284_v36, 0.0 }
 0x370   : > { %v2331_v44 = vpack.c.bf16 %v2257_v40, %v2255_v39 }
 0x371   : > { %v2332_v45 = vpack.c.bf16 %v2258_v42, %v2256_v41  ;;  %v2094_v46 = vpop.f32.mrb[76].mxu0 }
 0x372   : > { %v6285_v47 = vadd.f32 %v2094_v46, %v7808_v6  ;;  %v2096_v50 = vpop.f32.mrb[77].mxu0 }
 0x373   : > { %v6286_v51 = vadd.f32 %v2096_v50, %v7812_v7  ;;  %v2098_v52 = vpop.f32.mrb[78].mxu0  ;;  %2655 = vmatprep.mubr.bf16.mxu1 %v2332_v45 }
 0x374   : > { %v6287_v54 = vadd.f32 %v2098_v52, %v7808_v6  ;;  %v2100_v37 = vpop.f32.mrb[79].mxu0  ;;  %2656 = vmatmul.mubr.bf16.gmra.mrb[72].mxu1 %v2331_v44  ;;  %v2259_v43 = vmax.f32 %v6285_v47, 0.0 }
 0x375   : > { %v6288_v38 = vadd.f32 %v2100_v37, %v7812_v7  ;;  %v2260_v53 = vmax.f32 %v6286_v51, 0.0 }
 0x376   : > { %v2261_v48 = vmax.f32 %v6287_v54, 0.0 }
 0x377   : > { %v2262_v55 = vmax.f32 %v6288_v38, 0.0 }
 0x378   : > { %v2333_v56 = vpack.c.bf16 %v2261_v48, %v2259_v43 }
 0x379   : > { %v2334_v57 = vpack.c.bf16 %v2262_v55, %v2260_v53  ;;  %v2104_v58 = vpop.f32.mrb[80].mxu0 }
 0x37a   : > { %v6289_v59 = vadd.f32 %v2104_v58, %v7808_v6  ;;  %v2106_v60 = vpop.f32.mrb[81].mxu0 }
 0x37b   : > { %v6290_v61 = vadd.f32 %v2106_v60, %v7812_v7  ;;  %v2108_v62 = vpop.f32.mrb[82].mxu0  ;;  %2663 = vmatprep.mubr.bf16.mxu1 %v2334_v57 }
 0x37c   : > { %v6291_v63 = vadd.f32 %v2108_v62, %v7808_v6  ;;  %v2110_v0 = vpop.f32.mrb[83].mxu0  ;;  %2664 = vmatmul.mubr.bf16.gmra.mrb[76].mxu1 %v2333_v56  ;;  %v2263_v4 = vmax.f32 %v6289_v59, 0.0 }
 0x37d   : > { %v6292_v1 = vadd.f32 %v2110_v0, %v7812_v7  ;;  %v2264_v9 = vmax.f32 %v6290_v61, 0.0 }
 0x37e   : > { %v2265_v8 = vmax.f32 %v6291_v63, 0.0 }
 0x37f   : > { %v2266_v10 = vmax.f32 %v6292_v1, 0.0 }
 0x380   : > { %v2335_v11 = vpack.c.bf16 %v2265_v8, %v2263_v4 }
 0x381   : > { %v2336_v12 = vpack.c.bf16 %v2266_v10, %v2264_v9  ;;  %v2114_v13 = vpop.f32.mrb[84].mxu0 }
 0x382   : > { %v6293_v14 = vadd.f32 %v2114_v13, %v7808_v6  ;;  %v2116_v15 = vpop.f32.mrb[85].mxu0 }
 0x383   : > { %v6294_v16 = vadd.f32 %v2116_v15, %v7812_v7  ;;  %v2118_v17 = vpop.f32.mrb[86].mxu0  ;;  %2671 = vmatprep.mubr.bf16.mxu1 %v2336_v12 }
 0x384   : > { %v6295_v18 = vadd.f32 %v2118_v17, %v7808_v6  ;;  %v2120_v19 = vpop.f32.mrb[87].mxu0  ;;  %2672 = vmatmul.mubr.bf16.gmra.mrb[80].mxu1 %v2335_v11  ;;  %v2267_v21 = vmax.f32 %v6293_v14, 0.0 }
 0x385   : > { %v6296_v20 = vadd.f32 %v2120_v19, %v7812_v7  ;;  %v2268_v23 = vmax.f32 %v6294_v16, 0.0 }
 0x386   : > { %v2269_v22 = vmax.f32 %v6295_v18, 0.0 }
 0x387   : > { %v2270_v24 = vmax.f32 %v6296_v20, 0.0 }
 0x388   : > { %v2337_v25 = vpack.c.bf16 %v2269_v22, %v2267_v21 }
 0x389   : > { %v2338_v26 = vpack.c.bf16 %v2270_v24, %v2268_v23  ;;  %v2124_v27 = vpop.f32.mrb[88].mxu0 }
 0x38a   : > { %v6297_v28 = vadd.f32 %v2124_v27, %v7808_v6  ;;  %v2126_v29 = vpop.f32.mrb[89].mxu0 }
 0x38b   : > { %v6298_v30 = vadd.f32 %v2126_v29, %v7812_v7  ;;  %v2128_v31 = vpop.f32.mrb[90].mxu0  ;;  %2679 = vmatprep.mubr.bf16.mxu1 %v2338_v26 }
 0x38c   : > { %v6299_v32 = vadd.f32 %v2128_v31, %v7808_v6  ;;  %v2130_v33 = vpop.f32.mrb[91].mxu0  ;;  %2680 = vmatmul.mubr.bf16.gmra.mrb[84].mxu1 %v2337_v25  ;;  %v2271_v35 = vmax.f32 %v6297_v28, 0.0 }
 0x38d   : > { %v6300_v34 = vadd.f32 %v2130_v33, %v7812_v7  ;;  %v2272_v39 = vmax.f32 %v6298_v30, 0.0 }
 0x38e   : > { %v2273_v36 = vmax.f32 %v6299_v32, 0.0 }
 0x38f   : > { %v2274_v40 = vmax.f32 %v6300_v34, 0.0 }
 0x390   : > { %v2339_v41 = vpack.c.bf16 %v2273_v36, %v2271_v35 }
 0x391   : > { %v2340_v42 = vpack.c.bf16 %v2274_v40, %v2272_v39  ;;  %v2134_v44 = vpop.f32.mrb[92].mxu0 }
 0x392   : > { %v6301_v45 = vadd.f32 %v2134_v44, %v7808_v6  ;;  %v2136_v46 = vpop.f32.mrb[93].mxu0 }
 0x393   : > { %v6302_v47 = vadd.f32 %v2136_v46, %v7812_v7  ;;  %v2138_v50 = vpop.f32.mrb[94].mxu0  ;;  %2687 = vmatprep.mubr.bf16.mxu1 %v2340_v42 }
 0x394   : > { %v6303_v51 = vadd.f32 %v2138_v50, %v7808_v6  ;;  %v2140_v52 = vpop.f32.mrb[95].mxu0  ;;  %2688 = vmatmul.mubr.bf16.gmra.mrb[88].mxu1 %v2339_v41  ;;  %v2275_v37 = vmax.f32 %v6301_v45, 0.0 }
 0x395   : > { %v6304_v54 = vadd.f32 %v2140_v52, %v7812_v7  ;;  %v2276_v43 = vmax.f32 %v6302_v47, 0.0 }
 0x396   : > { %v2277_v38 = vmax.f32 %v6303_v51, 0.0 }
 0x397   : > { %v2278_v48 = vmax.f32 %v6304_v54, 0.0 }
 0x398   : > { %v2341_v53 = vpack.c.bf16 %v2277_v38, %v2275_v37 }
 0x399   : > { %v2342_v55 = vpack.c.bf16 %v2278_v48, %v2276_v43  ;;  %v2144_v56 = vpop.f32.mrb[96].mxu0 }
 0x39a   : > { %v6305_v57 = vadd.f32 %v2144_v56, %v7808_v6  ;;  %v2146_v58 = vpop.f32.mrb[97].mxu0 }
 0x39b   : > { %v6306_v59 = vadd.f32 %v2146_v58, %v7812_v7  ;;  %v2148_v60 = vpop.f32.mrb[98].mxu0  ;;  %2695 = vmatprep.mubr.bf16.mxu1 %v2342_v55 }
 0x39c   : > { %v6307_v61 = vadd.f32 %v2148_v60, %v7808_v6  ;;  %v2150_v62 = vpop.f32.mrb[99].mxu0  ;;  %2696 = vmatmul.mubr.bf16.gmra.mrb[92].mxu1 %v2341_v53  ;;  %v2279_v0 = vmax.f32 %v6305_v57, 0.0  ;;  %v6846_v57 = vld [vmem:[%s8894_s3 + $0x4] ss:$16 sps:$4 sm:$0xff]  }
 0x39d   : > { %v6308_v63 = vadd.f32 %v2150_v62, %v7812_v7  ;;  %v2280_v4 = vmax.f32 %v6306_v59, 0.0 }
 0x39e   : > { %v2281_v1 = vmax.f32 %v6307_v61, 0.0 }
 0x39f   : > { %v2282_v8 = vmax.f32 %v6308_v63, 0.0 }
 0x3a0   : > { %v2343_v9 = vpack.c.bf16 %v2281_v1, %v2279_v0 }
 0x3a1   : > { %v2344_v10 = vpack.c.bf16 %v2282_v8, %v2280_v4  ;;  %v2154_v11 = vpop.f32.mrb[100].mxu0 }
 0x3a2   : > { %v6309_v12 = vadd.f32 %v2154_v11, %v7808_v6  ;;  %v2156_v13 = vpop.f32.mrb[101].mxu0 }
 0x3a3   : > { %v6310_v14 = vadd.f32 %v2156_v13, %v7812_v7  ;;  %v2158_v15 = vpop.f32.mrb[102].mxu0  ;;  %2703 = vmatprep.mubr.bf16.mxu1 %v2344_v10 }
 0x3a4   : > { %v6311_v16 = vadd.f32 %v2158_v15, %v7808_v6  ;;  %v2160_v17 = vpop.f32.mrb[103].mxu0  ;;  %2704 = vmatmul.mubr.bf16.gmra.mrb[96].mxu1 %v2343_v9  ;;  %v2283_v19 = vmax.f32 %v6309_v12, 0.0 }
 0x3a5   : > { %v6312_v18 = vadd.f32 %v2160_v17, %v7812_v7  ;;  %v2284_v21 = vmax.f32 %v6310_v14, 0.0 }
 0x3a6   : > { %v2285_v20 = vmax.f32 %v6311_v16, 0.0 }
 0x3a7   : > { %v2286_v22 = vmax.f32 %v6312_v18, 0.0 }
 0x3a8   : > { %v2345_v23 = vpack.c.bf16 %v2285_v20, %v2283_v19 }
 0x3a9   : > { %v2346_v24 = vpack.c.bf16 %v2286_v22, %v2284_v21  ;;  %v2164_v25 = vpop.f32.mrb[104].mxu0 }
 0x3aa   : > { %v6313_v26 = vadd.f32 %v2164_v25, %v7808_v6  ;;  %v2166_v27 = vpop.f32.mrb[105].mxu0 }
 0x3ab   : > { %v6314_v28 = vadd.f32 %v2166_v27, %v7812_v7  ;;  %v2168_v29 = vpop.f32.mrb[106].mxu0  ;;  %2711 = vmatprep.mubr.bf16.mxu1 %v2346_v24 }
 0x3ac   : > { %v6315_v30 = vadd.f32 %v2168_v29, %v7808_v6  ;;  %v2170_v31 = vpop.f32.mrb[107].mxu0  ;;  %2712 = vmatmul.mubr.bf16.gmra.mrb[100].mxu1 %v2345_v23  ;;  %v2287_v33 = vmax.f32 %v6313_v26, 0.0 }
 0x3ad   : > { %v6316_v32 = vadd.f32 %v2170_v31, %v7812_v7  ;;  %v2288_v35 = vmax.f32 %v6314_v28, 0.0 }
 0x3ae   : > { %v2289_v34 = vmax.f32 %v6315_v30, 0.0 }
 0x3af   : > { %v2290_v36 = vmax.f32 %v6316_v32, 0.0 }
 0x3b0   : > { %v2347_v39 = vpack.c.bf16 %v2289_v34, %v2287_v33 }
 0x3b1   : > { %v2348_v40 = vpack.c.bf16 %v2290_v36, %v2288_v35  ;;  %v2174_v41 = vpop.f32.mrb[108].mxu0 }
 0x3b2   : > { %v6317_v42 = vadd.f32 %v2174_v41, %v7808_v6  ;;  %v2176_v44 = vpop.f32.mrb[109].mxu0 }
 0x3b3   : > { %v6318_v45 = vadd.f32 %v2176_v44, %v7812_v7  ;;  %v2178_v46 = vpop.f32.mrb[110].mxu0  ;;  %2719 = vmatprep.mubr.bf16.mxu1 %v2348_v40 }
 0x3b4   : > { %v6319_v47 = vadd.f32 %v2178_v46, %v7808_v6  ;;  %v2180_v50 = vpop.f32.mrb[111].mxu0  ;;  %2720 = vmatmul.mubr.bf16.gmra.mrb[104].mxu1 %v2347_v39  ;;  %v2291_v52 = vmax.f32 %v6317_v42, 0.0 }
 0x3b5   : > { %v6320_v51 = vadd.f32 %v2180_v50, %v7812_v7  ;;  %v2292_v37 = vmax.f32 %v6318_v45, 0.0 }
 0x3b6   : > { %v2293_v54 = vmax.f32 %v6319_v47, 0.0 }
 0x3b7   : > { %v2294_v38 = vmax.f32 %v6320_v51, 0.0  ;;  %v2513_v43 = vpop.f32.mrb[0].mxu1 }
 0x3b8   : > { %v2349_v48 = vpack.c.bf16 %v2293_v54, %v2291_v52  ;;  %v2515_v53 = vpop.f32.mrb[1].mxu1 }
 0x3b9   : > { %v2350_v55 = vpack.c.bf16 %v2294_v38, %v2292_v37  ;;  %v2516_v56 = vpop.f32.mrb[2].mxu1 }
 0x3ba   : > { %v2518_v58 = vpop.f32.mrb[3].mxu1  ;;  %v2792_v59 = vpack.c.bf16 %v2516_v56, %v2513_v43 }
 0x3bb   : > { %2727 = vmatprep.mubr.bf16.mxu1 %v2350_v55 }
 0x3bc   : > { %2728 = vmatmul.mubr.bf16.gmra.mrb[108].mxu1 %v2349_v48 }
 0x3bd   : > { %3161 = vmatprep.mubr.bf16.mxu1 %v6846_v57 }
 0x3bf   : > { %v2521_v6 = vpop.f32.mrb[4].mxu1 }
 0x3c0   : > { %v2523_v7 = vpop.f32.mrb[5].mxu1 }
 0x3c1   : > { %v2524_v60 = vpop.f32.mrb[6].mxu1 }
 0x3c2   : > { %v2526_v61 = vpop.f32.mrb[7].mxu1  ;;  %v2793_v62 = vpack.c.bf16 %v2524_v60, %v2521_v6 }
 0x3c7   : > { %v2529_v63 = vpop.f32.mrb[8].mxu1 }
 0x3c8   : > { %v2531_v0 = vpop.f32.mrb[9].mxu1 }
 0x3c9   : > { %v2532_v1 = vpop.f32.mrb[10].mxu1 }
 0x3ca   : > { %v2794_v4 = vpack.c.bf16 %v2532_v1, %v2529_v63  ;;  %v2534_v8 = vpop.f32.mrb[11].mxu1 }
 0x3cf   : > { %v2537_v9 = vpop.f32.mrb[12].mxu1 }
 0x3d0   : > { %v2539_v10 = vpop.f32.mrb[13].mxu1 }
 0x3d1   : > { %v2540_v11 = vpop.f32.mrb[14].mxu1 }
 0x3d2   : > { %v2795_v12 = vpack.c.bf16 %v2540_v11, %v2537_v9  ;;  %v2542_v13 = vpop.f32.mrb[15].mxu1 }
 0x3d7   : > { %v2545_v14 = vpop.f32.mrb[16].mxu1 }
 0x3d8   : > { %v2547_v15 = vpop.f32.mrb[17].mxu1 }
 0x3d9   : > { %v2548_v16 = vpop.f32.mrb[18].mxu1  ;;  %v6847_v15 = vld [vmem:[%s8894_s3 + $0x24] ss:$16 sps:$4 sm:$0xff]  }
 0x3da   : > { %v2796_v17 = vpack.c.bf16 %v2548_v16, %v2545_v14  ;;  %v2550_v18 = vpop.f32.mrb[19].mxu1  ;;  %v6844_v14 = vld [vmem:[%s8894_s3] ss:$16 sps:$4 sm:$0xff]  }
 0x3df   : > { %v2553_v19 = vpop.f32.mrb[20].mxu1 }
 0x3e0   : > { %v2555_v20 = vpop.f32.mrb[21].mxu1 }
 0x3e1   : > { %v2556_v21 = vpop.f32.mrb[22].mxu1 }
 0x3e2   : > { %v2797_v22 = vpack.c.bf16 %v2556_v21, %v2553_v19  ;;  %v2558_v23 = vpop.f32.mrb[23].mxu1  ;;  %v6849_v21 = vld [vmem:[%s8894_s3 + $0x20] ss:$16 sps:$4 sm:$0xff]  }
 0x3e7   : > { %v2561_v24 = vpop.f32.mrb[24].mxu1 }
 0x3e8   : > { %v2563_v25 = vpop.f32.mrb[25].mxu1 }
 0x3e9   : > { %v2564_v26 = vpop.f32.mrb[26].mxu1 }
 0x3ea   : > { %v2798_v27 = vpack.c.bf16 %v2564_v26, %v2561_v24  ;;  %v2566_v28 = vpop.f32.mrb[27].mxu1 }
 0x3eb   : > { %v6852_v28 = vld [vmem:[%s8894_s3 + $0x40] ss:$16 sps:$4 sm:$0xff]  }
 0x3ef   : > { %v2569_v29 = vpop.f32.mrb[28].mxu1 }
 0x3f0   : > { %v2571_v30 = vpop.f32.mrb[29].mxu1 }
 0x3f1   : > { %v2572_v31 = vpop.f32.mrb[30].mxu1 }
 0x3f2   : > { %v2799_v32 = vpack.c.bf16 %v2572_v31, %v2569_v29  ;;  %v2574_v33 = vpop.f32.mrb[31].mxu1  ;;  %v6853_v29 = vld [vmem:[%s8894_s3 + $0x64] ss:$16 sps:$4 sm:$0xff]  }
 0x3f7   : > { %v2577_v34 = vpop.f32.mrb[32].mxu1 }
 0x3f8   : > { %v2579_v35 = vpop.f32.mrb[33].mxu1 }
 0x3f9   : > { %v2580_v36 = vpop.f32.mrb[34].mxu1  ;;  %v6855_v35 = vld [vmem:[%s8894_s3 + $0x60] ss:$16 sps:$4 sm:$0xff]  }
 0x3fa   : > { %v2800_v39 = vpack.c.bf16 %v2580_v36, %v2577_v34  ;;  %v2582_v40 = vpop.f32.mrb[35].mxu1  ;;  %v6856_v36 = vld [vmem:[%s8894_s3 + $0x84] ss:$16 sps:$4 sm:$0xff]  }
 0x3fc   : > { %5902 = vmatprep.subr.bf16.mxu1 %v2800_v39 }
 0x3fd   : > { %5903 = vmatpush3.bf16.msra.mxu1 %v2792_v59 }
 0x3ff   : > { %v2585_v41 = vpop.f32.mrb[36].mxu1 }
 0x400   : > { %v2587_v42 = vpop.f32.mrb[37].mxu1 }
 0x401   : > { %v2588_v44 = vpop.f32.mrb[38].mxu1 }
 0x402   : > { %v2801_v45 = vpack.c.bf16 %v2588_v44, %v2585_v41  ;;  %v2590_v46 = vpop.f32.mrb[39].mxu1 }
 0x403   : > { %v6859_v46 = vld [vmem:[%s8894_s3 + $0xa4] ss:$16 sps:$4 sm:$0xff]  }
 0x404   : > { %5904 = vmatprep.subr.bf16.mxu1 %v2801_v45  ;;  %v6858_v45 = vld [vmem:[%s8894_s3 + $0x80] ss:$16 sps:$4 sm:$0xff]  }
 0x405   : > { %5905 = vmatpush3.bf16.msra.mxu1 %v2793_v62 }
 0x407   : > { %v2593_v47 = vpop.f32.mrb[40].mxu1 }
 0x408   : > { %v2595_v50 = vpop.f32.mrb[41].mxu1 }
 0x409   : > { %v2596_v51 = vpop.f32.mrb[42].mxu1 }
 0x40a   : > { %v2802_v52 = vpack.c.bf16 %v2596_v51, %v2593_v47  ;;  %v2598_v54 = vpop.f32.mrb[43].mxu1 }
 0x40c   : > { %5906 = vmatprep.subr.bf16.mxu1 %v2802_v52 }
 0x40d   : > { %5907 = vmatpush3.bf16.msra.mxu1 %v2794_v4 }
 0x40f   : > { %v2601_v37 = vpop.f32.mrb[44].mxu1 }
 0x410   : > { %v2603_v38 = vpop.f32.mrb[45].mxu1 }
 0x411   : > { %v2604_v43 = vpop.f32.mrb[46].mxu1  ;;  %v6862_v38 = vld [vmem:[%s8894_s3 + $0xc4] ss:$16 sps:$4 sm:$0xff]  }
 0x412   : > { %v2803_v48 = vpack.c.bf16 %v2604_v43, %v2601_v37  ;;  %v2606_v53 = vpop.f32.mrb[47].mxu1  ;;  %v6861_v37 = vld [vmem:[%s8894_s3 + $0xa0] ss:$16 sps:$4 sm:$0xff]  }
 0x414   : > { %5908 = vmatprep.subr.bf16.mxu1 %v2803_v48 }
 0x415   : > { %5909 = vmatpush3.bf16.msra.mxu1 %v2795_v12 }
 0x417   : > { %v2609_v55 = vpop.f32.mrb[48].mxu1 }
 0x418   : > { %v2611_v56 = vpop.f32.mrb[49].mxu1 }
 0x419   : > { %v2612_v57 = vpop.f32.mrb[50].mxu1 }
 0x41a   : > { %v2804_v58 = vpack.c.bf16 %v2612_v57, %v2609_v55  ;;  %v2614_v59 = vpop.f32.mrb[51].mxu1  ;;  %v6864_v57 = vld [vmem:[%s8894_s3 + $0xc0] ss:$16 sps:$4 sm:$0xff]  }
 0x41c   : > { %5910 = vmatprep.subr.bf16.mxu1 %v2804_v58  ;;  %v6865_v58 = vld [vmem:[%s8894_s3 + $0xe4] ss:$16 sps:$4 sm:$0xff]  }
 0x41d   : > { %5911 = vmatpush3.bf16.msra.mxu1 %v2796_v17 }
 0x41f   : > { %v2617_v6 = vpop.f32.mrb[52].mxu1 }
 0x420   : > { %v2619_v7 = vpop.f32.mrb[53].mxu1 }
 0x421   : > { %v2620_v60 = vpop.f32.mrb[54].mxu1 }
 0x422   : > { %v2805_v61 = vpack.c.bf16 %v2620_v60, %v2617_v6  ;;  %v2622_v62 = vpop.f32.mrb[55].mxu1 }
 0x423   : > { %v6867_v62 = vld [vmem:[%s8894_s3 + $0xe0] ss:$16 sps:$4 sm:$0xff]  }
 0x424   : > { %5912 = vmatprep.subr.bf16.mxu1 %v2805_v61 }
 0x425   : > { %5913 = vmatpush3.bf16.msra.mxu1 %v2797_v22  ;;  %v6850_v22 = vld [vmem:[%s8894_s3 + $0x44] ss:$16 sps:$4 sm:$0xff]  }
 0x427   : > { %v2625_v63 = vpop.f32.mrb[56].mxu1 }
 0x428   : > { %v2627_v0 = vpop.f32.mrb[57].mxu1 }
 0x429   : > { %v2628_v1 = vpop.f32.mrb[58].mxu1 }
 0x42a   : > { %v2806_v4 = vpack.c.bf16 %v2628_v1, %v2625_v63  ;;  %v2630_v8 = vpop.f32.mrb[59].mxu1  ;;  %v6868_v63 = vld [vmem:[%s8894_s3 + $0x104] ss:$16 sps:$4 sm:$0xff]  }
 0x42c   : > { %5914 = vmatprep.subr.bf16.mxu1 %v2806_v4 }
 0x42d   : > { %5915 = vmatpush3.bf16.msra.mxu1 %v2798_v27 }
 0x42f   : > { %v2633_v9 = vpop.f32.mrb[60].mxu1 }
 0x430   : > { %v2635_v10 = vpop.f32.mrb[61].mxu1 }
 0x431   : > { %v2636_v11 = vpop.f32.mrb[62].mxu1  ;;  %v6870_v10 = vld [vmem:[%s8894_s3 + $0x100] ss:$16 sps:$4 sm:$0xff]  }
 0x432   : > { %v2807_v12 = vpack.c.bf16 %v2636_v11, %v2633_v9  ;;  %v2638_v13 = vpop.f32.mrb[63].mxu1  ;;  %v6871_v11 = vld [vmem:[%s8894_s3 + $0x124] ss:$16 sps:$4 sm:$0xff]  }
 0x434   : > { %5916 = vmatprep.subr.bf16.mxu1 %v2807_v12 }
 0x435   : > { %5917 = vmatpush3.bf16.msra.mxu1 %v2799_v32 }
 0x436   : > { %3274 = vmatprep.subr.bf16.mxu1 %v7144_v49 }
 0x437   : > { %v2641_v16 = vpop.f32.mrb[64].mxu1 }
 0x438   : > { %v2643_v17 = vpop.f32.mrb[65].mxu1  ;;  %3162 = vmatmul.mubr.bf16.vlgmr.msra.gmra.mrb[112].mxu1 %v6844_v14 }
 0x439   : > { %v2644_v18 = vpop.f32.mrb[66].mxu1  ;;  %3169 = vmatprep.mubr.bf16.mxu1 %v6847_v15  ;;  %v6873_v17 = vld [vmem:[%s8894_s3 + $0x120] ss:$16 sps:$4 sm:$0xff]  }
 0x43a   : > { %v2808_v19 = vpack.c.bf16 %v2644_v18, %v2641_v16  ;;  %v2646_v20 = vpop.f32.mrb[67].mxu1  ;;  %v6874_v18 = vld [vmem:[%s8894_s3 + $0x144] ss:$16 sps:$4 sm:$0xff]  }
 0x43c   : > { %3275 = vmatpush1.bf16.msra.mxu1 %v2808_v19 }
 0x43d   : > { %3276 = vmatprep.subr.bf16.mxu1 %v7144_v49 }
 0x43f   : > { %v2649_v23 = vpop.f32.mrb[68].mxu1 }
 0x440   : > { %v2651_v24 = vpop.f32.mrb[69].mxu1  ;;  %3170 = vmatmul.mubr.bf16.gmra.mrb[116].mxu1 %v6849_v21 }
 0x441   : > { %v2652_v25 = vpop.f32.mrb[70].mxu1  ;;  %3177 = vmatprep.mubr.bf16.mxu1 %v6850_v22  ;;  %v6876_v24 = vld [vmem:[%s8894_s3 + $0x140] ss:$16 sps:$4 sm:$0xff]  }
 0x442   : > { %v2809_v26 = vpack.c.bf16 %v2652_v25, %v2649_v23  ;;  %v2654_v27 = vpop.f32.mrb[71].mxu1  ;;  %v6877_v25 = vld [vmem:[%s8894_s3 + $0x164] ss:$16 sps:$4 sm:$0xff]  }
 0x444   : > { %3277 = vmatpush1.bf16.msra.mxu1 %v2809_v26 }
 0x445   : > { %3278 = vmatprep.subr.bf16.mxu1 %v7144_v49 }
 0x447   : > { %v2657_v30 = vpop.f32.mrb[72].mxu1 }
 0x448   : > { %v2659_v31 = vpop.f32.mrb[73].mxu1  ;;  %3178 = vmatmul.mubr.bf16.gmra.mrb[120].mxu1 %v6852_v28 }
 0x449   : > { %v2660_v32 = vpop.f32.mrb[74].mxu1  ;;  %3185 = vmatprep.mubr.bf16.mxu1 %v6853_v29  ;;  %v6879_v31 = vld [vmem:[%s8894_s3 + $0x160] ss:$16 sps:$4 sm:$0xff]  }
 0x44a   : > { %v2810_v33 = vpack.c.bf16 %v2660_v32, %v2657_v30  ;;  %v2662_v34 = vpop.f32.mrb[75].mxu1  ;;  %v6880_v32 = vld [vmem:[%s8894_s3 + $0x184] ss:$16 sps:$4 sm:$0xff]  }
 0x44c   : > { %3279 = vmatpush1.bf16.msra.mxu1 %v2810_v33 }
 0x44d   : > { %3280 = vmatprep.subr.bf16.mxu1 %v7144_v49 }
 0x44f   : > { %v2665_v39 = vpop.f32.mrb[76].mxu1 }
 0x450   : > { %v2667_v40 = vpop.f32.mrb[77].mxu1  ;;  %3186 = vmatmul.mubr.bf16.gmra.mrb[124].mxu1 %v6855_v35 }
 0x451   : > { %v2668_v41 = vpop.f32.mrb[78].mxu1  ;;  %3193 = vmatprep.mubr.bf16.mxu1 %v6856_v36  ;;  %v6930_v40 = vld [vmem:[%s8896_s5 + $0x4] ss:$8 sps:$4 sm:$0xff]  }
 0x452   : > { %v2811_v42 = vpack.c.bf16 %v2668_v41, %v2665_v39  ;;  %v2670_v44 = vpop.f32.mrb[79].mxu1  ;;  %v6882_v41 = vld [vmem:[%s8894_s3 + $0x180] ss:$16 sps:$4 sm:$0xff]  }
 0x453   : > { %v6885_v44 = vld [vmem:[%s8894_s3 + $0x1a0] ss:$16 sps:$4 sm:$0xff]  }
 0x454   : > { %3281 = vmatpush1.bf16.msra.mxu1 %v2811_v42  ;;  %v6883_v42 = vld [vmem:[%s8894_s3 + $0x1a4] ss:$16 sps:$4 sm:$0xff]  }
 0x455   : > { %3282 = vmatprep.subr.bf16.mxu1 %v7144_v49 }
 0x457   : > { %v2673_v47 = vpop.f32.mrb[80].mxu1 }
 0x458   : > { %v2675_v50 = vpop.f32.mrb[81].mxu1  ;;  %3194 = vmatmul.mubr.bf16.gmra.mrb[128].mxu1 %v6858_v45  ;;  %v6888_v45 = vld [vmem:[%s8894_s3 + $0xc] ss:$16 sps:$4 sm:$0xff]  }
 0x459   : > { %v2676_v51 = vpop.f32.mrb[82].mxu1  ;;  %3201 = vmatprep.mubr.bf16.mxu1 %v6859_v46  ;;  %v6886_v46 = vld [vmem:[%s8894_s3 + $0x8] ss:$16 sps:$4 sm:$0xff]  }
 0x45a   : > { %v2812_v52 = vpack.c.bf16 %v2676_v51, %v2673_v47  ;;  %v2678_v54 = vpop.f32.mrb[83].mxu1  ;;  %v6889_v47 = vld [vmem:[%s8894_s3 + $0x2c] ss:$16 sps:$4 sm:$0xff]   ;;  %v6928_v50 = vld [vmem:[%s8896_s5] ss:$8 sps:$4 sm:$0xff]  }
 0x45b   : > { %v6933_v51 = vld [vmem:[%s8896_s5 + $0x14] ss:$8 sps:$4 sm:$0xff]   ;;  %v6936_v54 = vld [vmem:[%s8896_s5 + $0x24] ss:$8 sps:$4 sm:$0xff]  }
 0x45c   : > { %3283 = vmatpush1.bf16.msra.mxu1 %v2812_v52  ;;  %v6931_v52 = vld [vmem:[%s8896_s5 + $0x10] ss:$8 sps:$4 sm:$0xff]  }
 0x45d   : > { %3284 = vmatprep.subr.bf16.mxu1 %v7144_v49 }
 0x45f   : > { %v2681_v43 = vpop.f32.mrb[84].mxu1 }
 0x460   : > { %v2683_v48 = vpop.f32.mrb[85].mxu1  ;;  %3202 = vmatmul.mubr.bf16.gmra.mrb[132].mxu1 %v6861_v37  ;;  %v6891_v37 = vld [vmem:[%s8894_s3 + $0x28] ss:$16 sps:$4 sm:$0xff]  }
 0x461   : > { %v2684_v53 = vpop.f32.mrb[86].mxu1  ;;  %3209 = vmatprep.mubr.bf16.mxu1 %v6862_v38  ;;  %v6892_v38 = vld [vmem:[%s8894_s3 + $0x4c] ss:$16 sps:$4 sm:$0xff]  }
 0x462   : > { %v2813_v55 = vpack.c.bf16 %v2684_v53, %v2681_v43  ;;  %v2686_v56 = vpop.f32.mrb[87].mxu1  ;;  %v6934_v43 = vld [vmem:[%s8896_s5 + $0x20] ss:$8 sps:$4 sm:$0xff]   ;;  %v6939_v48 = vld [vmem:[%s8896_s5 + $0x34] ss:$8 sps:$4 sm:$0xff]  }
 0x463   : > { %v6937_v53 = vld [vmem:[%s8896_s5 + $0x30] ss:$8 sps:$4 sm:$0xff]  }
 0x464   : > { %3285 = vmatpush1.bf16.msra.mxu1 %v2813_v55  ;;  %v6942_v55 = vld [vmem:[%s8896_s5 + $0x44] ss:$8 sps:$4 sm:$0xff]   ;;  %v6894_v56 = vld [vmem:[%s8894_s3 + $0x48] ss:$16 sps:$4 sm:$0xff]  }
 0x465   : > { %3286 = vmatprep.subr.bf16.mxu1 %v7144_v49 }
 0x467   : > { %v2689_v59 = vpop.f32.mrb[88].mxu1 }
 0x468   : > { %v2691_v6 = vpop.f32.mrb[89].mxu1  ;;  %3210 = vmatmul.mubr.bf16.gmra.mrb[136].mxu1 %v6864_v57  ;;  %v6895_v57 = vld [vmem:[%s8894_s3 + $0x6c] ss:$16 sps:$4 sm:$0xff]  }
 0x469   : > { %v2692_v7 = vpop.f32.mrb[90].mxu1  ;;  %3217 = vmatprep.mubr.bf16.mxu1 %v6865_v58  ;;  %v6940_v58 = vld [vmem:[%s8896_s5 + $0x40] ss:$8 sps:$4 sm:$0xff]   ;;  %v6945_v6 = vld [vmem:[%s8896_s5 + $0x54] ss:$8 sps:$4 sm:$0xff]  }
 0x46a   : > { %v2814_v60 = vpack.c.bf16 %v2692_v7, %v2689_v59  ;;  %v2694_v61 = vpop.f32.mrb[91].mxu1  ;;  %v6943_v59 = vld [vmem:[%s8896_s5 + $0x50] ss:$8 sps:$4 sm:$0xff]  }
 0x46b   : > { %v6897_v7 = vld [vmem:[%s8894_s3 + $0x68] ss:$16 sps:$4 sm:$0xff]  }
 0x46c   : > { %3287 = vmatpush1.bf16.msra.mxu1 %v2814_v60  ;;  %v6898_v60 = vld [vmem:[%s8894_s3 + $0x8c] ss:$16 sps:$4 sm:$0xff]   ;;  %v6946_v61 = vld [vmem:[%s8896_s5 + $0x60] ss:$8 sps:$4 sm:$0xff]  }
 0x46d   : > { %3288 = vmatprep.subr.bf16.mxu1 %v7144_v49 }
 0x46f   : > { %v2697_v0 = vpop.f32.mrb[92].mxu1 }
 0x470   : > { %v2699_v1 = vpop.f32.mrb[93].mxu1  ;;  %3218 = vmatmul.mubr.bf16.gmra.mrb[140].mxu1 %v6867_v62  ;;  %v6948_v62 = vld [vmem:[%s8896_s5 + $0x64] ss:$8 sps:$4 sm:$0xff]  }
 0x471   : > { %v2700_v4 = vpop.f32.mrb[94].mxu1  ;;  %3225 = vmatprep.mubr.bf16.mxu1 %v6868_v63  ;;  %v6900_v63 = vld [vmem:[%s8894_s3 + $0x88] ss:$16 sps:$4 sm:$0xff]  }
 0x472   : > { %v2815_v8 = vpack.c.bf16 %v2700_v4, %v2697_v0  ;;  %v2702_v9 = vpop.f32.mrb[95].mxu1  ;;  %v6901_v0 = vld [vmem:[%s8894_s3 + $0xac] ss:$16 sps:$4 sm:$0xff]   ;;  %v6949_v1 = vld [vmem:[%s8896_s5 + $0x70] ss:$8 sps:$4 sm:$0xff]  }
 0x473   : > { %v6951_v4 = vld [vmem:[%s8896_s5 + $0x74] ss:$8 sps:$4 sm:$0xff]  }
 0x474   : > { %3289 = vmatpush1.bf16.msra.mxu1 %v2815_v8  ;;  %v6903_v8 = vld [vmem:[%s8894_s3 + $0xa8] ss:$16 sps:$4 sm:$0xff]   ;;  %v6904_v9 = vld [vmem:[%s8894_s3 + $0xcc] ss:$16 sps:$4 sm:$0xff]  }
 0x475   : > { %3290 = vmatprep.subr.bf16.mxu1 %v7144_v49 }
 0x477   : > { %v2705_v12 = vpop.f32.mrb[96].mxu1 }
 0x478   : > { %v2707_v13 = vpop.f32.mrb[97].mxu1  ;;  %3226 = vmatmul.mubr.bf16.gmra.mrb[144].mxu1 %v6870_v10  ;;  %v6952_v10 = vld [vmem:[%s8896_s5 + $0x80] ss:$8 sps:$4 sm:$0xff]  }
 0x479   : > { %v2708_v14 = vpop.f32.mrb[98].mxu1  ;;  %3233 = vmatprep.mubr.bf16.mxu1 %v6871_v11  ;;  %v6954_v11 = vld [vmem:[%s8896_s5 + $0x84] ss:$8 sps:$4 sm:$0xff]  }
 0x47a   : > { %v2816_v15 = vpack.c.bf16 %v2708_v14, %v2705_v12  ;;  %v2710_v16 = vpop.f32.mrb[99].mxu1  ;;  %v6906_v12 = vld [vmem:[%s8894_s3 + $0xc8] ss:$16 sps:$4 sm:$0xff]   ;;  %v6907_v13 = vld [vmem:[%s8894_s3 + $0xec] ss:$16 sps:$4 sm:$0xff]  }
 0x47b   : > { %v6955_v14 = vld [vmem:[%s8896_s5 + $0x90] ss:$8 sps:$4 sm:$0xff]  }
 0x47c   : > { %3291 = vmatpush1.bf16.msra.mxu1 %v2816_v15  ;;  %v6957_v15 = vld [vmem:[%s8896_s5 + $0x94] ss:$8 sps:$4 sm:$0xff]   ;;  %v6909_v16 = vld [vmem:[%s8894_s3 + $0xe8] ss:$16 sps:$4 sm:$0xff]  }
 0x47d   : > { %3292 = vmatprep.subr.bf16.mxu1 %v7144_v49 }
 0x47f   : > { %v2713_v19 = vpop.f32.mrb[100].mxu1 }
 0x480   : > { %v2715_v20 = vpop.f32.mrb[101].mxu1  ;;  %3234 = vmatmul.mubr.bf16.gmra.mrb[148].mxu1 %v6873_v17  ;;  %v6910_v17 = vld [vmem:[%s8894_s3 + $0x10c] ss:$16 sps:$4 sm:$0xff]  }
 0x481   : > { %v2716_v21 = vpop.f32.mrb[102].mxu1  ;;  %3241 = vmatprep.mubr.bf16.mxu1 %v6874_v18  ;;  %v6958_v18 = vld [vmem:[%s8896_s5 + $0xa0] ss:$8 sps:$4 sm:$0xff]  }
 0x482   : > { %v2817_v22 = vpack.c.bf16 %v2716_v21, %v2713_v19  ;;  %v2718_v23 = vpop.f32.mrb[103].mxu1  ;;  %v6960_v19 = vld [vmem:[%s8896_s5 + $0xa4] ss:$8 sps:$4 sm:$0xff]   ;;  %v6912_v20 = vld [vmem:[%s8894_s3 + $0x108] ss:$16 sps:$4 sm:$0xff]  }
 0x483   : > { %v6913_v21 = vld [vmem:[%s8894_s3 + $0x12c] ss:$16 sps:$4 sm:$0xff]  }
 0x484   : > { %3293 = vmatpush1.bf16.msra.mxu1 %v2817_v22  ;;  %v6961_v22 = vld [vmem:[%s8896_s5 + $0xb0] ss:$8 sps:$4 sm:$0xff]   ;;  %v6963_v23 = vld [vmem:[%s8896_s5 + $0xb4] ss:$8 sps:$4 sm:$0xff]  }
 0x485   : > { %3294 = vmatprep.subr.bf16.mxu1 %v7144_v49 }
 0x487   : > { %v2721_v26 = vpop.f32.mrb[104].mxu1 }
 0x488   : > { %v2723_v27 = vpop.f32.mrb[105].mxu1  ;;  %3242 = vmatmul.mubr.bf16.gmra.mrb[152].mxu1 %v6876_v24  ;;  %v6915_v24 = vld [vmem:[%s8894_s3 + $0x128] ss:$16 sps:$4 sm:$0xff]  }
 0x489   : > { %v2724_v28 = vpop.f32.mrb[106].mxu1  ;;  %3249 = vmatprep.mubr.bf16.mxu1 %v6877_v25  ;;  %v6916_v25 = vld [vmem:[%s8894_s3 + $0x14c] ss:$16 sps:$4 sm:$0xff]  }
 0x48a   : > { %v2818_v29 = vpack.c.bf16 %v2724_v28, %v2721_v26  ;;  %v2726_v30 = vpop.f32.mrb[107].mxu1  ;;  %v6964_v26 = vld [vmem:[%s8896_s5 + $0xc0] ss:$8 sps:$4 sm:$0xff]   ;;  %v6966_v27 = vld [vmem:[%s8896_s5 + $0xc4] ss:$8 sps:$4 sm:$0xff]  }
 0x48b   : > { %v6918_v28 = vld [vmem:[%s8894_s3 + $0x148] ss:$16 sps:$4 sm:$0xff]  }
 0x48c   : > { %3295 = vmatpush1.bf16.msra.mxu1 %v2818_v29  ;;  %v6919_v29 = vld [vmem:[%s8894_s3 + $0x16c] ss:$16 sps:$4 sm:$0xff]   ;;  %v6921_v30 = vld [vmem:[%s8894_s3 + $0x168] ss:$16 sps:$4 sm:$0xff]  }
 0x48d   : > { %3296 = vmatprep.subr.bf16.mxu1 %v7144_v49 }
 0x48f   : > { %v2729_v33 = vpop.f32.mrb[108].mxu1 }
 0x490   : > { %v2731_v34 = vpop.f32.mrb[109].mxu1  ;;  %3250 = vmatmul.mubr.bf16.gmra.mrb[156].mxu1 %v6879_v31  ;;  %v6967_v31 = vld [vmem:[%s8896_s5 + $0xd0] ss:$8 sps:$4 sm:$0xff]  }
 0x491   : > { %v2732_v35 = vpop.f32.mrb[110].mxu1  ;;  %3257 = vmatprep.mubr.bf16.mxu1 %v6880_v32  ;;  %v6969_v32 = vld [vmem:[%s8896_s5 + $0xd4] ss:$8 sps:$4 sm:$0xff]   ;;  %v6972_v34 = vld [vmem:[%s8896_s5 + $0xe4] ss:$8 sps:$4 sm:$0xff]  }
 0x492   : > { %v2819_v36 = vpack.c.bf16 %v2732_v35, %v2729_v33  ;;  %v2734_v39 = vpop.f32.mrb[111].mxu1  ;;  %v6922_v33 = vld [vmem:[%s8894_s3 + $0x18c] ss:$16 sps:$4 sm:$0xff]   ;;  %v6970_v35 = vld [vmem:[%s8896_s5 + $0xe0] ss:$8 sps:$4 sm:$0xff]  }
 0x493   : > { %v6925_v39 = vld [vmem:[%s8894_s3 + $0x1ac] ss:$16 sps:$4 sm:$0xff]  }
 0x494   : > { %3297 = vmatpush1.bf16.msra.mxu1 %v2819_v36  ;;  %v6924_v36 = vld [vmem:[%s8894_s3 + $0x188] ss:$16 sps:$4 sm:$0xff]  }
 0x495   : > { %3925 = vmatprep.subr.bf16.mxu1 %v6930_v40  ;;  %v6975_v40 = vld [vmem:[%s8896_s5 + $0xf4] ss:$8 sps:$4 sm:$0xff]  }
 0x498   : > { %3258 = vmatmul.mubr.bf16.gmra.mrb[160].mxu1 %v6882_v41  ;;  %v6973_v41 = vld [vmem:[%s8896_s5 + $0xf0] ss:$8 sps:$4 sm:$0xff]  }
 0x499   : > { %3265 = vmatprep.mubr.bf16.mxu1 %v6883_v42 }
 0x4a0   : > { %3266 = vmatmul.mubr.bf16.gmra.mrb[164].mxu1 %v6885_v44  ;;  %v6927_v44 = vld [vmem:[%s8894_s3 + $0x1a8] ss:$16 sps:$4 sm:$0xff]  }
 0x4a1   : > { %5714 = vmatprep.mubr.msk.bf16.mxu1 %vm3086_vm0, %v6888_v45 }
 0x4a8   : > { %3307 = vmatmul.mubr.bf16.vlgmr.msra.gmra.mrb[168].mxu1 %v6886_v46 }
 0x4a9   : > { %5715 = vmatprep.mubr.msk.bf16.mxu1 %vm3086_vm0, %v6889_v47  ;;  %3926 = vmatpush1.bf16.msra.mxu1 %v6928_v50 }
 0x4aa   : > { %3927 = vmatprep.subr.bf16.mxu1 %v6933_v51 }
 0x4ad   : > { %3928 = vmatpush1.bf16.msra.mxu1 %v6931_v52 }
 0x4ae   : > { %3929 = vmatprep.subr.bf16.mxu1 %v6936_v54 }
 0x4b0   : > { %3315 = vmatmul.mubr.bf16.gmra.mrb[172].mxu1 %v6891_v37 }
 0x4b1   : > { %5716 = vmatprep.mubr.msk.bf16.mxu1 %vm3086_vm0, %v6892_v38  ;;  %3930 = vmatpush1.bf16.msra.mxu1 %v6934_v43 }
 0x4b2   : > { %3931 = vmatprep.subr.bf16.mxu1 %v6939_v48 }
 0x4b5   : > { %3932 = vmatpush1.bf16.msra.mxu1 %v6937_v53  ;;  %v6978_v53 = vld [vmem:[%s8896_s5 + $0x104] ss:$8 sps:$4 sm:$0xff]  }
 0x4b6   : > { %3933 = vmatprep.subr.bf16.mxu1 %v6942_v55 }
 0x4b8   : > { %3323 = vmatmul.mubr.bf16.gmra.mrb[176].mxu1 %v6894_v56 }
 0x4b9   : > { %5717 = vmatprep.mubr.msk.bf16.mxu1 %vm3086_vm0, %v6895_v57  ;;  %3934 = vmatpush1.bf16.msra.mxu1 %v6940_v58 }
 0x4ba   : > { %3935 = vmatprep.subr.bf16.mxu1 %v6945_v6 }
 0x4bd   : > { %3936 = vmatpush1.bf16.msra.mxu1 %v6943_v59 }
 0x4be   : > { %3937 = vmatprep.subr.bf16.mxu1 %v6948_v62 }
 0x4c0   : > { %3331 = vmatmul.mubr.bf16.gmra.mrb[180].mxu1 %v6897_v7 }
 0x4c1   : > { %5718 = vmatprep.mubr.msk.bf16.mxu1 %vm3086_vm0, %v6898_v60  ;;  %3938 = vmatpush1.bf16.msra.mxu1 %v6946_v61 }
 0x4c2   : > { %3939 = vmatprep.subr.bf16.mxu1 %v6951_v4 }
 0x4c5   : > { %3940 = vmatpush1.bf16.msra.mxu1 %v6949_v1 }
 0x4c6   : > { %3941 = vmatprep.subr.bf16.mxu1 %v6954_v11 }
 0x4c8   : > { %3339 = vmatmul.mubr.bf16.gmra.mrb[184].mxu1 %v6900_v63 }
 0x4c9   : > { %5719 = vmatprep.mubr.msk.bf16.mxu1 %vm3086_vm0, %v6901_v0  ;;  %3942 = vmatpush1.bf16.msra.mxu1 %v6952_v10 }
 0x4ca   : > { %3943 = vmatprep.subr.bf16.mxu1 %v6957_v15 }
 0x4cd   : > { %3944 = vmatpush1.bf16.msra.mxu1 %v6955_v14 }
 0x4ce   : > { %3945 = vmatprep.subr.bf16.mxu1 %v6960_v19 }
 0x4d0   : > { %3347 = vmatmul.mubr.bf16.gmra.mrb[188].mxu1 %v6903_v8 }
 0x4d1   : > { %5720 = vmatprep.mubr.msk.bf16.mxu1 %vm3086_vm0, %v6904_v9  ;;  %3946 = vmatpush1.bf16.msra.mxu1 %v6958_v18 }
 0x4d2   : > { %3947 = vmatprep.subr.bf16.mxu1 %v6963_v23 }
 0x4d5   : > { %3948 = vmatpush1.bf16.msra.mxu1 %v6961_v22 }
 0x4d6   : > { %3949 = vmatprep.subr.bf16.mxu1 %v6966_v27 }
 0x4d8   : > { %3355 = vmatmul.mubr.bf16.gmra.mrb[192].mxu1 %v6906_v12 }
 0x4d9   : > { %5721 = vmatprep.mubr.msk.bf16.mxu1 %vm3086_vm0, %v6907_v13  ;;  %3950 = vmatpush1.bf16.msra.mxu1 %v6964_v26 }
 0x4da   : > { %3951 = vmatprep.subr.bf16.mxu1 %v6969_v32 }
 0x4dd   : > { %3952 = vmatpush1.bf16.msra.mxu1 %v6967_v31 }
 0x4de   : > { %3953 = vmatprep.subr.bf16.mxu1 %v6972_v34 }
 0x4e0   : > { %3363 = vmatmul.mubr.bf16.gmra.mrb[196].mxu1 %v6909_v16 }
 0x4e1   : > { %5722 = vmatprep.mubr.msk.bf16.mxu1 %vm3086_vm0, %v6910_v17  ;;  %3954 = vmatpush1.bf16.msra.mxu1 %v6970_v35 }
 0x4e2   : > { %3955 = vmatprep.subr.bf16.mxu1 %v6975_v40 }
 0x4e5   : > { %3956 = vmatpush1.bf16.msra.mxu1 %v6973_v41 }
 0x4e6   : > { %4058 = vmatprep.subr.bf16.mxu1 %v6978_v53 }
 0x4e8   : > { %3371 = vmatmul.mubr.bf16.gmra.mrb[200].mxu1 %v6912_v20 }
 0x4e9   : > { %5723 = vmatprep.mubr.msk.bf16.mxu1 %vm3086_vm0, %v6913_v21 }
 0x4f0   : > { %3379 = vmatmul.mubr.bf16.gmra.mrb[204].mxu1 %v6915_v24 }
 0x4f1   : > { %5724 = vmatprep.mubr.msk.bf16.mxu1 %vm3086_vm0, %v6916_v25 }
 0x4f8   : > { %3387 = vmatmul.mubr.bf16.gmra.mrb[208].mxu1 %v6918_v28 }
 0x4f9   : > { %5725 = vmatprep.mubr.msk.bf16.mxu1 %vm3086_vm0, %v6919_v29 }
 0x500   : > { %3395 = vmatmul.mubr.bf16.gmra.mrb[212].mxu1 %v6921_v30 }
 0x501   : > { %5726 = vmatprep.mubr.msk.bf16.mxu1 %vm3086_vm0, %v6922_v33 }
 0x508   : > { %3403 = vmatmul.mubr.bf16.gmra.mrb[216].mxu1 %v6924_v36 }
 0x509   : > { %5727 = vmatprep.mubr.msk.bf16.mxu1 %vm3086_vm0, %v6925_v39 }
 0x50b   : > { %v5918_v42 = vpop.f32.mrb[112].mxu1 }
 0x50c   : > { %v5919_v45 = vpop.f32.mrb[113].mxu1 }
 0x50d   : > { %v8218_v46 = vadd.f32 %v5919_v45, %v5918_v42  ;;  %v5921_v47 = vpop.f32.mrb[114].mxu1 }
 0x50e   : > { %v5922_v50 = vpop.f32.mrb[115].mxu1 }
 0x50f   : > { %v8220_v51 = vadd.f32 %v5922_v50, %v5921_v47 }
 0x510   : > { %3411 = vmatmul.mubr.bf16.gmra.mrb[220].mxu1 %v6927_v44 }
 0x513   : > { %v5924_v52 = vpop.f32.mrb[116].mxu1 }
 0x514   : > { %v5925_v54 = vpop.f32.mrb[117].mxu1 }
 0x515   : > { %v8222_v37 = vadd.f32 %v5925_v54, %v5924_v52  ;;  %v5927_v38 = vpop.f32.mrb[118].mxu1 }
 0x516   : > { %v5928_v43 = vpop.f32.mrb[119].mxu1 }
 0x517   : > { %v8224_v48 = vadd.f32 %v5928_v43, %v5927_v38 }
 0x51b   : > { %v5930_v55 = vpop.f32.mrb[120].mxu1 }
 0x51c   : > { %v5931_v56 = vpop.f32.mrb[121].mxu1 }
 0x51d   : > { %v8229_v57 = vadd.f32 %v5931_v56, %v5930_v55  ;;  %v5933_v58 = vpop.f32.mrb[122].mxu1 }
 0x51e   : > { %v5934_v59 = vpop.f32.mrb[123].mxu1 }
 0x51f   : > { %v8231_v6 = vadd.f32 %v5934_v59, %v5933_v58 }
 0x523   : > { %v5936_v7 = vpop.f32.mrb[124].mxu1 }
 0x524   : > { %v5937_v60 = vpop.f32.mrb[125].mxu1 }
 0x525   : > { %v8233_v61 = vadd.f32 %v5937_v60, %v5936_v7  ;;  %v5939_v62 = vpop.f32.mrb[126].mxu1 }
 0x526   : > { %v5940_v63 = vpop.f32.mrb[127].mxu1 }
 0x527   : > { %v8235_v0 = vadd.f32 %v5940_v63, %v5939_v62 }
 0x52b   : > { %v5942_v1 = vpop.f32.mrb[128].mxu1 }
 0x52c   : > { %v5943_v4 = vpop.f32.mrb[129].mxu1 }
 0x52d   : > { %v8237_v8 = vadd.f32 %v5943_v4, %v5942_v1  ;;  %v5945_v9 = vpop.f32.mrb[130].mxu1 }
 0x52e   : > { %v5946_v10 = vpop.f32.mrb[131].mxu1 }
 0x52f   : > { %v8239_v11 = vadd.f32 %v5946_v10, %v5945_v9 }
 0x533   : > { %v5948_v12 = vpop.f32.mrb[132].mxu1 }
 0x534   : > { %v5949_v13 = vpop.f32.mrb[133].mxu1 }
 0x535   : > { %v8241_v14 = vadd.f32 %v5949_v13, %v5948_v12  ;;  %v5951_v15 = vpop.f32.mrb[134].mxu1 }
 0x536   : > { %v5952_v16 = vpop.f32.mrb[135].mxu1 }
 0x537   : > { %v8243_v17 = vadd.f32 %v5952_v16, %v5951_v15 }
 0x53b   : > { %v5954_v18 = vpop.f32.mrb[136].mxu1 }
 0x53c   : > { %v5955_v19 = vpop.f32.mrb[137].mxu1 }
 0x53d   : > { %v8245_v20 = vadd.f32 %v5955_v19, %v5954_v18  ;;  %v5957_v21 = vpop.f32.mrb[138].mxu1 }
 0x53e   : > { %v5958_v22 = vpop.f32.mrb[139].mxu1 }
 0x53f   : > { %v8247_v23 = vadd.f32 %v5958_v22, %v5957_v21 }
 0x543   : > { %v5960_v24 = vpop.f32.mrb[140].mxu1 }
 0x544   : > { %v5961_v25 = vpop.f32.mrb[141].mxu1 }
 0x545   : > { %v8249_v26 = vadd.f32 %v5961_v25, %v5960_v24  ;;  %v5963_v27 = vpop.f32.mrb[142].mxu1 }
 0x546   : > { %v5964_v28 = vpop.f32.mrb[143].mxu1 }
 0x547   : > { %v8251_v29 = vadd.f32 %v5964_v28, %v5963_v27 }
 0x54b   : > { %v5966_v30 = vpop.f32.mrb[144].mxu1 }
 0x54c   : > { %v5967_v31 = vpop.f32.mrb[145].mxu1 }
 0x54d   : > { %v8253_v32 = vadd.f32 %v5967_v31, %v5966_v30  ;;  %v5969_v33 = vpop.f32.mrb[146].mxu1 }
 0x54e   : > { %v5970_v34 = vpop.f32.mrb[147].mxu1 }
 0x54f   : > { %v8255_v35 = vadd.f32 %v5970_v34, %v5969_v33 }
 0x553   : > { %v5972_v36 = vpop.f32.mrb[148].mxu1 }
 0x554   : > { %v5973_v39 = vpop.f32.mrb[149].mxu1 }
 0x555   : > { %v8257_v40 = vadd.f32 %v5973_v39, %v5972_v36  ;;  %v5975_v41 = vpop.f32.mrb[150].mxu1 }
 0x556   : > { %v5976_v42 = vpop.f32.mrb[151].mxu1 }
 0x557   : > { %v8259_v44 = vadd.f32 %v5976_v42, %v5975_v41  ;;  %v6976_v41 = vld [vmem:[%s8896_s5 + $0x100] ss:$8 sps:$4 sm:$0xff]  }
 0x55b   : > { %v5978_v45 = vpop.f32.mrb[152].mxu1 }
 0x55c   : > { %v5979_v47 = vpop.f32.mrb[153].mxu1 }
 0x55d   : > { %v8261_v50 = vadd.f32 %v5979_v47, %v5978_v45  ;;  %v5981_v52 = vpop.f32.mrb[154].mxu1  ;;  %v6984_v47 = vld [vmem:[%s8896_s5 + $0x124] ss:$8 sps:$4 sm:$0xff]  }
 0x55e   : > { %v5982_v54 = vpop.f32.mrb[155].mxu1 }
 0x55f   : > { %v8263_v38 = vadd.f32 %v5982_v54, %v5981_v52 }
 0x563   : > { %v5984_v43 = vpop.f32.mrb[156].mxu1 }
 0x564   : > { %v5985_v53 = vpop.f32.mrb[157].mxu1 }
 0x565   : > { %v8265_v55 = vadd.f32 %v5985_v53, %v5984_v43  ;;  %v5987_v56 = vpop.f32.mrb[158].mxu1  ;;  %v6987_v53 = vld [vmem:[%s8896_s5 + $0x134] ss:$8 sps:$4 sm:$0xff]  }
 0x566   : > { %v5988_v58 = vpop.f32.mrb[159].mxu1 }
 0x567   : > { %v8267_v59 = vadd.f32 %v5988_v58, %v5987_v56 }
 0x56b   : > { %v5990_v7 = vpop.f32.mrb[160].mxu1 }
 0x56c   : > { %v5991_v60 = vpop.f32.mrb[161].mxu1 }
 0x56d   : > { %v8269_v62 = vadd.f32 %v5991_v60, %v5990_v7  ;;  %v5993_v63 = vpop.f32.mrb[162].mxu1  ;;  %v6985_v7 = vld [vmem:[%s8896_s5 + $0x130] ss:$8 sps:$4 sm:$0xff]  }
 0x56e   : > { %v5994_v1 = vpop.f32.mrb[163].mxu1 }
 0x56f   : > { %v8271_v4 = vadd.f32 %v5994_v1, %v5993_v63  ;;  %v6990_v63 = vld [vmem:[%s8896_s5 + $0x144] ss:$8 sps:$4 sm:$0xff]  }
 0x573   : > { %v5996_v9 = vpop.f32.mrb[164].mxu1 }
 0x574   : > { %v5997_v10 = vpop.f32.mrb[165].mxu1 }
 0x575   : > { %v8273_v12 = vadd.f32 %v5997_v10, %v5996_v9  ;;  %v5999_v13 = vpop.f32.mrb[166].mxu1 }
 0x576   : > { %v6000_v15 = vpop.f32.mrb[167].mxu1 }
 0x577   : > { %v8275_v16 = vadd.f32 %v6000_v15, %v5999_v13  ;;  %v6993_v13 = vld [vmem:[%s8896_s5 + $0x154] ss:$8 sps:$4 sm:$0xff]  }
 0x57b   : > { %v3308_v18 = vpop.f32.mrb[168].mxu1 }
 0x57c   : > { %v3309_v19 = vadd.f32 %v8218_v46, %v3308_v18  ;;  %v3310_v21 = vpop.f32.mrb[169].mxu1  ;;  %v6981_v46 = vld [vmem:[%s8896_s5 + $0x114] ss:$8 sps:$4 sm:$0xff]  }
 0x57d   : > { %v3311_v22 = vpop.f32.mrb[170].mxu1 }
 0x57e   : > { %v3312_v24 = vadd.f32 %v8220_v51, %v3311_v22  ;;  %v3313_v25 = vpop.f32.mrb[171].mxu1  ;;  %v6996_v22 = vld [vmem:[%s8896_s5 + $0x164] ss:$8 sps:$4 sm:$0xff]  }
 0x580   : > { %v3419_v27 = vpack.c.bf16 %v3312_v24, %v3309_v19  ;;  %v6991_v19 = vld [vmem:[%s8896_s5 + $0x150] ss:$8 sps:$4 sm:$0xff]  }
 0x583   : > { %v3316_v28 = vpop.f32.mrb[172].mxu1 }
 0x584   : > { %v3317_v30 = vadd.f32 %v8222_v37, %v3316_v28  ;;  %v3318_v31 = vpop.f32.mrb[173].mxu1  ;;  %v6999_v28 = vld [vmem:[%s8896_s5 + $0x174] ss:$8 sps:$4 sm:$0xff]  }
 0x585   : > { %v3319_v33 = vpop.f32.mrb[174].mxu1 }
 0x586   : > { %v3320_v34 = vadd.f32 %v8224_v48, %v3319_v33  ;;  %v3321_v36 = vpop.f32.mrb[175].mxu1  ;;  %v6979_v48 = vld [vmem:[%s8896_s5 + $0x110] ss:$8 sps:$4 sm:$0xff]  }
 0x587   : > { %v6997_v33 = vld [vmem:[%s8896_s5 + $0x170] ss:$8 sps:$4 sm:$0xff]   ;;  %v7002_v36 = vld [vmem:[%s8896_s5 + $0x184] ss:$8 sps:$4 sm:$0xff]  }
 0x588   : > { %v3420_v39 = vpack.c.bf16 %v3320_v34, %v3317_v30 }
 0x58a   : > { %3957 = vmatprep.mubr.bf16.mxu1 %v3420_v39 }
 0x58b   : > { %v3324_v51 = vpop.f32.mrb[176].mxu1  ;;  %3958 = vmatmul.mubr.bf16.vlgmr.msra.gmra.mrb[224].mxu1 %v3419_v27 }
 0x58c   : > { %v3325_v42 = vadd.f32 %v8229_v57, %v3324_v51  ;;  %v3326_v37 = vpop.f32.mrb[177].mxu1  ;;  %4059 = vmatpush1.bf16.msra.mxu1 %v6976_v41  ;;  %v6982_v57 = vld [vmem:[%s8896_s5 + $0x120] ss:$8 sps:$4 sm:$0xff]   ;;  %v7005_v51 = vld [vmem:[%s8896_s5 + $0x194] ss:$8 sps:$4 sm:$0xff]  }
 0x58d   : > { %v3327_v45 = vpop.f32.mrb[178].mxu1  ;;  %4060 = vmatprep.subr.bf16.mxu1 %v6981_v46 }
 0x58e   : > { %v3328_v52 = vadd.f32 %v8231_v6, %v3327_v45  ;;  %v3329_v54 = vpop.f32.mrb[179].mxu1 }
 0x590   : > { %v8295_v43 = vpack.c.bf16 %v3328_v52, %v3325_v42  ;;  %4061 = vmatpush1.bf16.msra.mxu1 %v6979_v48  ;;  %v7003_v48 = vld [vmem:[%s8896_s5 + $0x190] ss:$8 sps:$4 sm:$0xff]  }
 0x591   : > { %4062 = vmatprep.subr.bf16.mxu1 %v6984_v47  ;;  %v7008_v47 = vld [vmem:[%s8896_s5 + $0x1a4] ss:$8 sps:$4 sm:$0xff]  }
 0x592   : > { %3967 = vmatprep.mubr.bf16.mxu1 %v8295_v43 }
 0x593   : > { %v3332_v56 = vpop.f32.mrb[180].mxu1  ;;  %3968 = vmatmul.mubr.bf16.gmra.mrb[228].mxu1 %v3420_v39 }
 0x594   : > { %v3333_v58 = vadd.f32 %v8233_v61, %v3332_v56  ;;  %v3334_v6 = vpop.f32.mrb[181].mxu1  ;;  %4063 = vmatpush1.bf16.msra.mxu1 %v6982_v57  ;;  %v6988_v61 = vld [vmem:[%s8896_s5 + $0x140] ss:$8 sps:$4 sm:$0xff]  }
 0x595   : > { %v3335_v60 = vpop.f32.mrb[182].mxu1  ;;  %4064 = vmatprep.subr.bf16.mxu1 %v6987_v53  ;;  %v7011_v53 = vld [vmem:[%s8896_s5 + $0x1b4] ss:$8 sps:$4 sm:$0xff]   ;;  %v7009_v6 = vld [vmem:[%s8896_s5 + $0x1b0] ss:$8 sps:$4 sm:$0xff]  }
 0x596   : > { %v3336_v1 = vadd.f32 %v8235_v0, %v3335_v60  ;;  %v3337_v9 = vpop.f32.mrb[183].mxu1  ;;  %v7014_v60 = vld [vmem:[%s8896_s5 + $0x1c4] ss:$8 sps:$4 sm:$0xff]  }
 0x598   : > { %v8312_v10 = vpack.c.bf16 %v3336_v1, %v3333_v58  ;;  %4065 = vmatpush1.bf16.msra.mxu1 %v6985_v7 }
 0x599   : > { %4066 = vmatprep.subr.bf16.mxu1 %v6990_v63 }
 0x59a   : > { %3977 = vmatprep.mubr.bf16.mxu1 %v8312_v10 }
 0x59b   : > { %v3340_v15 = vpop.f32.mrb[184].mxu1  ;;  %3978 = vmatmul.mubr.bf16.gmra.mrb[232].mxu1 %v8295_v43 }
 0x59c   : > { %v3341_v0 = vadd.f32 %v8237_v8, %v3340_v15  ;;  %v3342_v18 = vpop.f32.mrb[185].mxu1  ;;  %4067 = vmatpush1.bf16.msra.mxu1 %v6988_v61  ;;  %v6994_v8 = vld [vmem:[%s8896_s5 + $0x160] ss:$8 sps:$4 sm:$0xff]   ;;  %v7017_v61 = vld [vmem:[%s8896_s5 + $0x1d4] ss:$8 sps:$4 sm:$0xff]  }
 0x59d   : > { %v3343_v21 = vpop.f32.mrb[186].mxu1  ;;  %4068 = vmatprep.subr.bf16.mxu1 %v6993_v13 }
 0x59e   : > { %v3344_v24 = vadd.f32 %v8239_v11, %v3343_v21  ;;  %v3345_v25 = vpop.f32.mrb[187].mxu1 }
 0x59f   : > { %v7023_v25 = vld [vmem:[%s8896_s5 + $0x1f4] ss:$8 sps:$4 sm:$0xff]  }
 0x5a0   : > { %v8330_v27 = vpack.c.bf16 %v3344_v24, %v3341_v0  ;;  %4069 = vmatpush1.bf16.msra.mxu1 %v6991_v19  ;;  %v7015_v0 = vld [vmem:[%s8896_s5 + $0x1d0] ss:$8 sps:$4 sm:$0xff]   ;;  %v7020_v19 = vld [vmem:[%s8896_s5 + $0x1e4] ss:$8 sps:$4 sm:$0xff]  }
 0x5a1   : > { %4070 = vmatprep.subr.bf16.mxu1 %v6996_v22 }
 0x5a2   : > { %3987 = vmatprep.mubr.bf16.mxu1 %v8330_v27 }
 0x5a3   : > { %v3348_v30 = vpop.f32.mrb[188].mxu1  ;;  %3988 = vmatmul.mubr.bf16.gmra.mrb[236].mxu1 %v8312_v10 }
 0x5a4   : > { %v3349_v11 = vadd.f32 %v8241_v14, %v3348_v30  ;;  %v3350_v31 = vpop.f32.mrb[189].mxu1  ;;  %4071 = vmatpush1.bf16.msra.mxu1 %v6994_v8  ;;  %v7000_v14 = vld [vmem:[%s8896_s5 + $0x180] ss:$8 sps:$4 sm:$0xff]   ;;  %v7021_v30 = vld [vmem:[%s8896_s5 + $0x1f0] ss:$8 sps:$4 sm:$0xff]  }
 0x5a5   : > { %v3351_v34 = vpop.f32.mrb[190].mxu1  ;;  %4072 = vmatprep.subr.bf16.mxu1 %v6999_v28  ;;  %v7026_v31 = vld [vmem:[%s8896_s5 + $0x204] ss:$8 sps:$4 sm:$0xff]  }
 0x5a6   : > { %v3352_v39 = vadd.f32 %v8243_v17, %v3351_v34  ;;  %v3353_v41 = vpop.f32.mrb[191].mxu1 }
 0x5a8   : > { %v8348_v46 = vpack.c.bf16 %v3352_v39, %v3349_v11  ;;  %4073 = vmatpush1.bf16.msra.mxu1 %v6997_v33 }
 0x5a9   : > { %4074 = vmatprep.subr.bf16.mxu1 %v7002_v36 }
 0x5aa   : > { %3997 = vmatprep.mubr.bf16.mxu1 %v8348_v46 }
 0x5ab   : > { %v3356_v42 = vpop.f32.mrb[192].mxu1  ;;  %3998 = vmatmul.mubr.bf16.gmra.mrb[240].mxu1 %v8330_v27 }
 0x5ac   : > { %v3357_v17 = vadd.f32 %v8245_v20, %v3356_v42  ;;  %v3358_v37 = vpop.f32.mrb[193].mxu1  ;;  %4075 = vmatpush1.bf16.msra.mxu1 %v7000_v14  ;;  %v7006_v20 = vld [vmem:[%s8896_s5 + $0x1a0] ss:$8 sps:$4 sm:$0xff]  }
 0x5ad   : > { %v3359_v45 = vpop.f32.mrb[194].mxu1  ;;  %4076 = vmatprep.subr.bf16.mxu1 %v7005_v51 }
 0x5ae   : > { %v3360_v52 = vadd.f32 %v8247_v23, %v3359_v45  ;;  %v3361_v54 = vpop.f32.mrb[195].mxu1 }
 0x5af   : > { %v7029_v54 = vld [vmem:[%s8896_s5 + $0x214] ss:$8 sps:$4 sm:$0xff]  }
 0x5b0   : > { %v8366_v57 = vpack.c.bf16 %v3360_v52, %v3357_v17  ;;  %4077 = vmatpush1.bf16.msra.mxu1 %v7003_v48 }
 0x5b1   : > { %4078 = vmatprep.subr.bf16.mxu1 %v7008_v47 }
 0x5b2   : > { %4007 = vmatprep.mubr.bf16.mxu1 %v8366_v57 }
 0x5b3   : > { %v3364_v56 = vpop.f32.mrb[196].mxu1  ;;  %4008 = vmatmul.mubr.bf16.gmra.mrb[244].mxu1 %v8348_v46 }
 0x5b4   : > { %v3365_v23 = vadd.f32 %v8249_v26, %v3364_v56  ;;  %v3366_v58 = vpop.f32.mrb[197].mxu1  ;;  %4079 = vmatpush1.bf16.msra.mxu1 %v7006_v20  ;;  %v7012_v26 = vld [vmem:[%s8896_s5 + $0x1c0] ss:$8 sps:$4 sm:$0xff]  }
 0x5b5   : > { %v3367_v7 = vpop.f32.mrb[198].mxu1  ;;  %4080 = vmatprep.subr.bf16.mxu1 %v7011_v53 }
 0x5b6   : > { %v3368_v63 = vadd.f32 %v8251_v29, %v3367_v7  ;;  %v3369_v1 = vpop.f32.mrb[199].mxu1  ;;  %v7035_v7 = vld [vmem:[%s8896_s5 + $0x234] ss:$8 sps:$4 sm:$0xff]  }
 0x5b7   : > { %v7033_v1 = vld [vmem:[%s8896_s5 + $0x230] ss:$8 sps:$4 sm:$0xff]  }
 0x5b8   : > { %v8384_v9 = vpack.c.bf16 %v3368_v63, %v3365_v23  ;;  %4081 = vmatpush1.bf16.msra.mxu1 %v7009_v6  ;;  %v7032_v23 = vld [vmem:[%s8896_s5 + $0x224] ss:$8 sps:$4 sm:$0xff]  }
 0x5b9   : > { %4082 = vmatprep.subr.bf16.mxu1 %v7014_v60 }
 0x5ba   : > { %4017 = vmatprep.mubr.bf16.mxu1 %v8384_v9 }
 0x5bb   : > { %v3372_v13 = vpop.f32.mrb[200].mxu1  ;;  %4018 = vmatmul.mubr.bf16.gmra.mrb[248].mxu1 %v8366_v57 }
 0x5bc   : > { %v3373_v29 = vadd.f32 %v8253_v32, %v3372_v13  ;;  %v3374_v15 = vpop.f32.mrb[201].mxu1  ;;  %4083 = vmatpush1.bf16.msra.mxu1 %v7012_v26  ;;  %v7018_v32 = vld [vmem:[%s8896_s5 + $0x1e0] ss:$8 sps:$4 sm:$0xff]  }
 0x5bd   : > { %v3375_v18 = vpop.f32.mrb[202].mxu1  ;;  %4084 = vmatprep.subr.bf16.mxu1 %v7017_v61  ;;  %v7038_v61 = vld [vmem:[%s8896_s5 + $0x244] ss:$8 sps:$4 sm:$0xff]   ;;  %v7041_v15 = vld [vmem:[%s8896_s5 + $0x254] ss:$8 sps:$4 sm:$0xff]  }
 0x5be   : > { %v3376_v21 = vadd.f32 %v8255_v35, %v3375_v18  ;;  %v3377_v22 = vpop.f32.mrb[203].mxu1  ;;  %v7042_v18 = vld [vmem:[%s8896_s5 + $0x260] ss:$8 sps:$4 sm:$0xff]  }
 0x5bf   : > { %v7049_v22 = vld [vmem:[%s8899_s8] sm:$0xff]  }
 0x5c0   : > { %v8402_v24 = vpack.c.bf16 %v3376_v21, %v3373_v29  ;;  %4085 = vmatpush1.bf16.msra.mxu1 %v7015_v0  ;;  %v7036_v29 = vld [vmem:[%s8896_s5 + $0x240] ss:$8 sps:$4 sm:$0xff]   ;;  %v7044_v0 = vld [vmem:[%s8896_s5 + $0x264] ss:$8 sps:$4 sm:$0xff]  }
 0x5c1   : > { %4086 = vmatprep.subr.bf16.mxu1 %v7020_v19  ;;  %v7047_v19 = vld [vmem:[%s8896_s5 + $0x274] ss:$8 sps:$4 sm:$0xff]   ;;  %v7048_v21 = vld [vmem:[%s8899_s8 + $0x40] sm:$0xff]  }
 0x5c2   : > { %4027 = vmatprep.mubr.bf16.mxu1 %v8402_v24  ;;  %6002 = vmatprep.subr.bf16.mxu0 %v7048_v21 }
 0x5c3   : > { %v3380_v8 = vpop.f32.mrb[204].mxu1  ;;  %4028 = vmatmul.mubr.bf16.gmra.mrb[252].mxu1 %v8384_v9  ;;  %6003 = vmatpush3.bf16.msra.mxu0 %v7049_v22 }
 0x5c4   : > { %v3381_v35 = vadd.f32 %v8257_v40, %v3380_v8  ;;  %v3382_v28 = vpop.f32.mrb[205].mxu1  ;;  %4087 = vmatpush1.bf16.msra.mxu1 %v7018_v32  ;;  %v7050_v32 = vld [vmem:[%s8899_s8 + $0x48] sm:$0xff]  }
 0x5c5   : > { %v3383_v11 = vpop.f32.mrb[206].mxu1  ;;  %4088 = vmatprep.subr.bf16.mxu1 %v7023_v25  ;;  %v7045_v25 = vld [vmem:[%s8896_s5 + $0x270] ss:$8 sps:$4 sm:$0xff]   ;;  %v7051_v8 = vld [vmem:[%s8899_s8 + $0x8] sm:$0xff]   ;;  %6004 = vmatprep.subr.bf16.mxu0 %v7050_v32 }
 0x5c6   : > { %v3384_v33 = vadd.f32 %v8259_v44, %v3383_v11  ;;  %v3385_v34 = vpop.f32.mrb[207].mxu1  ;;  %v7053_v28 = vld [vmem:[%s8899_s8 + $0x10] sm:$0xff]   ;;  %v7055_v11 = vld [vmem:[%s8899_s8 + $0x18] sm:$0xff]  }
 0x5c7   : > { %6005 = vmatpush3.bf16.msra.mxu0 %v7051_v8  ;;  %v7058_v34 = vld [vmem:[%s8899_s8 + $0x68] sm:$0xff]  }
 0x5c8   : > { %v8420_v36 = vpack.c.bf16 %v3384_v33, %v3381_v35  ;;  %4089 = vmatpush1.bf16.msra.mxu1 %v7021_v30  ;;  %v7052_v35 = vld [vmem:[%s8899_s8 + $0x50] sm:$0xff]   ;;  %v7054_v30 = vld [vmem:[%s8899_s8 + $0x58] sm:$0xff]   ;;  %v7057_v33 = vld [vmem:[%s8899_s8 + $0x20] sm:$0xff]  }
 0x5c9   : > { %4191 = vmatprep.subr.bf16.mxu1 %v7026_v31  ;;  %6006 = vmatprep.subr.bf16.mxu0 %v7052_v35  ;;  %v7056_v31 = vld [vmem:[%s8899_s8 + $0x60] sm:$0xff]  }
 0x5ca   : > { %4037 = vmatprep.mubr.bf16.mxu1 %v8420_v36 }
 0x5cb   : > { %v3388_v40 = vpop.f32.mrb[208].mxu1  ;;  %4038 = vmatmul.mubr.bf16.gmra.mrb[0].mxu1 %v8402_v24  ;;  %6007 = vmatpush3.bf16.msra.mxu0 %v7053_v28 }
 0x5cc   : > { %v3389_v39 = vadd.f32 %v8261_v50, %v3388_v40  ;;  %v3390_v41 = vpop.f32.mrb[209].mxu1  ;;  %6008 = vmatprep.subr.bf16.mxu0 %v7054_v30 }
 0x5cd   : > { %v3391_v14 = vpop.f32.mrb[210].mxu1 }
 0x5ce   : > { %v3392_v51 = vadd.f32 %v8263_v38, %v3391_v14  ;;  %v3393_v42 = vpop.f32.mrb[211].mxu1  ;;  %v7024_v38 = vld [vmem:[%s8896_s5 + $0x200] ss:$8 sps:$4 sm:$0xff]  }
 0x5cf   : > { %6009 = vmatpush3.bf16.msra.mxu0 %v7055_v11 }
 0x5d0   : > { %v8426_v17 = vpack.c.bf16 %v3392_v51, %v3389_v39  ;;  %6010 = vmatprep.subr.bf16.mxu0 %v7056_v31 }
 0x5d2   : > { %4047 = vmatprep.mubr.bf16.mxu1 %v8426_v17 }
 0x5d3   : > { %4048 = vmatmul.mubr.bf16.gmra.mrb[4].mxu1 %v8420_v36  ;;  %v3396_v44 = vpop.f32.mrb[212].mxu1  ;;  %6011 = vmatpush3.bf16.msra.mxu0 %v7057_v33 }
 0x5d4   : > { %4090 = vmatprep.mubr.bf16.mxu1 %v8312_v10  ;;  %v3397_v37 = vadd.f32 %v8265_v55, %v3396_v44  ;;  %v3398_v48 = vpop.f32.mrb[213].mxu1  ;;  %6012 = vmatprep.subr.bf16.mxu0 %v7058_v34 }
 0x5d5   : > { %v3399_v45 = vpop.f32.mrb[214].mxu1 }
 0x5d6   : > { %v3400_v50 = vadd.f32 %v8267_v59, %v3399_v45  ;;  %v3401_v47 = vpop.f32.mrb[215].mxu1  ;;  %v7027_v59 = vld [vmem:[%s8896_s5 + $0x210] ss:$8 sps:$4 sm:$0xff]  }
 0x5d8   : > { %v8433_v52 = vpack.c.bf16 %v3400_v50, %v3397_v37 }
 0x5db   : > { %4091 = vmatmul.mubr.bf16.vlgmr.msra.gmra.mrb[224].mxu1 %v8295_v43  ;;  %v3404_v20 = vpop.f32.mrb[216].mxu1 }
 0x5dc   : > { %4100 = vmatprep.mubr.bf16.mxu1 %v8330_v27  ;;  %v3405_v55 = vadd.f32 %v8269_v62, %v3404_v20  ;;  %v3406_v53 = vpop.f32.mrb[217].mxu1  ;;  %4192 = vmatpush1.bf16.msra.mxu1 %v7024_v38  ;;  %v7030_v62 = vld [vmem:[%s8896_s5 + $0x220] ss:$8 sps:$4 sm:$0xff]  }
 0x5dd   : > { %v3407_v56 = vpop.f32.mrb[218].mxu1  ;;  %4193 = vmatprep.subr.bf16.mxu1 %v7029_v54 }
 0x5de   : > { %v3408_v58 = vadd.f32 %v8271_v4, %v3407_v56  ;;  %v3409_v43 = vpop.f32.mrb[219].mxu1 }
 0x5e0   : > { %v8451_v6 = vpack.c.bf16 %v3408_v58, %v3405_v55  ;;  %4194 = vmatpush1.bf16.msra.mxu1 %v7027_v59 }
 0x5e1   : > { %4195 = vmatprep.subr.bf16.mxu1 %v7032_v23 }
 0x5e3   : > { %4101 = vmatmul.mubr.bf16.gmra.mrb[228].mxu1 %v8312_v10  ;;  %v3412_v60 = vpop.f32.mrb[220].mxu1 }
 0x5e4   : > { %4110 = vmatprep.mubr.bf16.mxu1 %v8348_v46  ;;  %v8462_v4 = vadd.f32 %v8273_v12, %v3412_v60  ;;  %v3414_v63 = vpop.f32.mrb[221].mxu1  ;;  %4196 = vmatpush1.bf16.msra.mxu1 %v7030_v62 }
 0x5e5   : > { %v3415_v26 = vpop.f32.mrb[222].mxu1  ;;  %4197 = vmatprep.subr.bf16.mxu1 %v7035_v7 }
 0x5e6   : > { %v8471_v10 = vadd.f32 %v8275_v16, %v3415_v26  ;;  %v3417_v13 = vpop.f32.mrb[223].mxu1  ;;  %v7039_v16 = vld [vmem:[%s8896_s5 + $0x250] ss:$8 sps:$4 sm:$0xff]  }
 0x5e8   : > { %v3432_v12 = vpack.c.bf16 %v8471_v10, %v8462_v4  ;;  %4198 = vmatpush1.bf16.msra.mxu1 %v7033_v1 }
 0x5e9   : > { %4199 = vmatprep.subr.bf16.mxu1 %v7038_v61 }
 0x5eb   : > { %4111 = vmatmul.mubr.bf16.gmra.mrb[232].mxu1 %v8330_v27 }
 0x5ec   : > { %4120 = vmatprep.mubr.bf16.mxu1 %v8366_v57  ;;  %4200 = vmatpush1.bf16.msra.mxu1 %v7036_v29 }
 0x5ed   : > { %4201 = vmatprep.subr.bf16.mxu1 %v7041_v15 }
 0x5f0   : > { %4202 = vmatpush1.bf16.msra.mxu1 %v7039_v16 }
 0x5f1   : > { %4203 = vmatprep.subr.bf16.mxu1 %v7044_v0 }
 0x5f3   : > { %4121 = vmatmul.mubr.bf16.gmra.mrb[236].mxu1 %v8348_v46 }
 0x5f4   : > { %4130 = vmatprep.mubr.bf16.mxu1 %v8384_v9  ;;  %4204 = vmatpush1.bf16.msra.mxu1 %v7042_v18 }
 0x5f5   : > { %4205 = vmatprep.subr.bf16.mxu1 %v7047_v19 }
 0x5f8   : > { %4206 = vmatpush1.bf16.msra.mxu1 %v7045_v25 }
 0x5f9   : > { %4706 = vmatprep.subr.bf16.mxu1 %v7144_v49 }
 0x5fb   : > { %4131 = vmatmul.mubr.bf16.gmra.mrb[240].mxu1 %v8366_v57 }
 0x5fc   : > { %4140 = vmatprep.mubr.bf16.mxu1 %v8402_v24 }
 0x603   : > { %4141 = vmatmul.mubr.bf16.gmra.mrb[244].mxu1 %v8384_v9 }
 0x604   : > { %4150 = vmatprep.mubr.bf16.mxu1 %v8420_v36 }
 0x60b   : > { %4151 = vmatmul.mubr.bf16.gmra.mrb[248].mxu1 %v8402_v24 }
 0x60c   : > { %4160 = vmatprep.mubr.bf16.mxu1 %v8426_v17 }
 0x613   : > { %4161 = vmatmul.mubr.bf16.gmra.mrb[252].mxu1 %v8420_v36 }
 0x614   : > { %4170 = vmatprep.mubr.bf16.mxu1 %v8433_v52 }
 0x61b   : > { %4171 = vmatmul.mubr.bf16.gmra.mrb[0].mxu1 %v8426_v17 }
 0x61c   : > { %4180 = vmatprep.mubr.bf16.mxu1 %v8451_v6 }
 0x623   : > { %4181 = vmatmul.mubr.bf16.gmra.mrb[4].mxu1 %v8433_v52 }
 0x624   : > { %4223 = vmatprep.mubr.bf16.mxu1 %v7144_v49 }
 0x62b   : > { %4224 = vmatmul.mubr.bf16.vlgmr.msra.gmra.mrb[224].mxu1 %v8330_v27  ;;  %v7059_v27 = vld [vmem:[%s8899_s8 + $0x28] sm:$0xff]  }
 0x62c   : > { %4233 = vmatprep.mubr.bf16.mxu1 %v7144_v49  ;;  %6013 = vmatpush3.bf16.msra.mxu0 %v7059_v27 }
 0x633   : > { %4234 = vmatmul.mubr.bf16.gmra.mrb[228].mxu1 %v8348_v46  ;;  %v7060_v46 = vld [vmem:[%s8899_s8 + $0x70] sm:$0xff]  }
 0x634   : > { %4243 = vmatprep.mubr.bf16.mxu1 %v7144_v49  ;;  %6014 = vmatprep.subr.bf16.mxu0 %v7060_v46 }
 0x63b   : > { %4244 = vmatmul.mubr.bf16.gmra.mrb[232].mxu1 %v8366_v57  ;;  %v7061_v57 = vld [vmem:[%s8899_s8 + $0x30] sm:$0xff]  }
 0x63c   : > { %4253 = vmatprep.mubr.bf16.mxu1 %v7144_v49  ;;  %6015 = vmatpush3.bf16.msra.mxu0 %v7061_v57 }
 0x643   : > { %4254 = vmatmul.mubr.bf16.gmra.mrb[236].mxu1 %v8384_v9  ;;  %v7062_v9 = vld [vmem:[%s8899_s8 + $0x78] sm:$0xff]  }
 0x644   : > { %4263 = vmatprep.mubr.bf16.mxu1 %v7144_v49  ;;  %6016 = vmatprep.subr.bf16.mxu0 %v7062_v9 }
 0x64b   : > { %4264 = vmatmul.mubr.bf16.gmra.mrb[240].mxu1 %v8402_v24  ;;  %v7063_v24 = vld [vmem:[%s8899_s8 + $0x38] sm:$0xff]  }
 0x64c   : > { %4273 = vmatprep.mubr.bf16.mxu1 %v7144_v49  ;;  %6017 = vmatpush3.bf16.msra.mxu0 %v7063_v24 }
 0x653   : > { %4274 = vmatmul.mubr.bf16.gmra.mrb[244].mxu1 %v8420_v36  ;;  %v3513_v36 = vld [vmem:[%s8897_s6] sm:$0x3] }
 0x654   : > { %4283 = vmatprep.mubr.bf16.mxu1 %v7144_v49  ;;  %v8587_v40 = vrot.slane %v3513_v36, %v836_v3  ;;  %v8591_v39 = vrot.slane %v3513_v36, %v840_v5 }
 0x65b   : > { %4284 = vmatmul.mubr.bf16.gmra.mrb[248].mxu1 %v8426_v17 }
 0x65c   : > { %4293 = vmatprep.mubr.bf16.mxu1 %v7144_v49 }
 0x663   : > { %4294 = vmatmul.mubr.bf16.gmra.mrb[252].mxu1 %v8433_v52 }
 0x664   : > { %4303 = vmatprep.mubr.bf16.mxu1 %v7144_v49 }
 0x66b   : > { %4304 = vmatmul.mubr.bf16.gmra.mrb[0].mxu1 %v8451_v6 }
 0x66c   : > { %4313 = vmatprep.mubr.bf16.mxu1 %v7144_v49 }
 0x673   : > { %4314 = vmatmul.mubr.bf16.gmra.mrb[4].mxu1 %v3432_v12 }
 0x6fe   : > { %v4225_v41 = vpop.f32.mrb[224].mxu1 }
 0x6ff   : > { %v6321_v14 = vadd.f32 %v4225_v41, %v8587_v40  ;;  %v4227_v51 = vpop.f32.mrb[225].mxu1 }
 0x700   : > { %v6322_v42 = vadd.f32 %v4227_v51, %v8591_v39  ;;  %v4229_v17 = vpop.f32.mrb[226].mxu1 }
 0x701   : > { %v6323_v44 = vadd.f32 %v4229_v17, %v8587_v40  ;;  %v4231_v37 = vpop.f32.mrb[227].mxu1  ;;  %v4324_v45 = vmax.f32 %v6321_v14, 0.0 }
 0x702   : > { %v6324_v48 = vadd.f32 %v4231_v37, %v8591_v39  ;;  %v4325_v3 = vmax.f32 %v6322_v42, 0.0 }
 0x703   : > { %v4326_v50 = vmax.f32 %v6323_v44, 0.0 }
 0x704   : > { %v4327_v47 = vmax.f32 %v6324_v48, 0.0 }
 0x705   : > { %v4364_v52 = vpack.c.bf16 %v4326_v50, %v4324_v45 }
 0x706   : > { %v4365_v2 = vpack.c.bf16 %v4327_v47, %v4325_v3  ;;  %v4235_v5 = vpop.f32.mrb[228].mxu1 }
 0x707   : > { %v6325_v38 = vadd.f32 %v4235_v5, %v8587_v40  ;;  %v4237_v54 = vpop.f32.mrb[229].mxu1 }
 0x708   : > { %v6326_v20 = vadd.f32 %v4237_v54, %v8591_v39  ;;  %v4239_v55 = vpop.f32.mrb[230].mxu1  ;;  %4544 = vmatprep.mubr.bf16.mxu0 %v4365_v2 }
 0x709   : > { %v6327_v53 = vadd.f32 %v4239_v55, %v8587_v40  ;;  %v4241_v59 = vpop.f32.mrb[231].mxu1  ;;  %4545 = vmatmul.mubr.bf16.vlgmr.msra.gmra.mrb[112].mxu0 %v4364_v52  ;;  %v4328_v23 = vmax.f32 %v6325_v38, 0.0 }
 0x70a   : > { %v6328_v56 = vadd.f32 %v4241_v59, %v8591_v39  ;;  %v4329_v43 = vmax.f32 %v6326_v20, 0.0 }
 0x70b   : > { %v4330_v58 = vmax.f32 %v6327_v53, 0.0 }
 0x70c   : > { %v4331_v6 = vmax.f32 %v6328_v56, 0.0 }
 0x70d   : > { %v4366_v62 = vpack.c.bf16 %v4330_v58, %v4328_v23 }
 0x70e   : > { %v4367_v7 = vpack.c.bf16 %v4331_v6, %v4329_v43  ;;  %v4245_v60 = vpop.f32.mrb[232].mxu1 }
 0x70f   : > { %v6329_v4 = vadd.f32 %v4245_v60, %v8587_v40  ;;  %v4247_v63 = vpop.f32.mrb[233].mxu1 }
 0x710   : > { %v6330_v1 = vadd.f32 %v4247_v63, %v8591_v39  ;;  %v4249_v26 = vpop.f32.mrb[234].mxu1  ;;  %4552 = vmatprep.mubr.bf16.mxu0 %v4367_v7 }
 0x711   : > { %v6331_v61 = vadd.f32 %v4249_v26, %v8587_v40  ;;  %v4251_v10 = vpop.f32.mrb[235].mxu1  ;;  %4553 = vmatmul.mubr.bf16.gmra.mrb[116].mxu0 %v4366_v62  ;;  %v4332_v12 = vmax.f32 %v6329_v4, 0.0 }
 0x712   : > { %v6332_v13 = vadd.f32 %v4251_v10, %v8591_v39  ;;  %v4333_v15 = vmax.f32 %v6330_v1, 0.0 }
 0x713   : > { %v4334_v29 = vmax.f32 %v6331_v61, 0.0 }
 0x714   : > { %v4335_v16 = vmax.f32 %v6332_v13, 0.0 }
 0x715   : > { %v4368_v0 = vpack.c.bf16 %v4334_v29, %v4332_v12 }
 0x716   : > { %v4369_v18 = vpack.c.bf16 %v4335_v16, %v4333_v15  ;;  %v4255_v19 = vpop.f32.mrb[236].mxu1 }
 0x717   : > { %v6333_v21 = vadd.f32 %v4255_v19, %v8587_v40  ;;  %v4257_v22 = vpop.f32.mrb[237].mxu1 }
 0x718   : > { %v6334_v32 = vadd.f32 %v4257_v22, %v8591_v39  ;;  %v4259_v25 = vpop.f32.mrb[238].mxu1  ;;  %4560 = vmatprep.mubr.bf16.mxu0 %v4369_v18 }
 0x719   : > { %v6335_v8 = vadd.f32 %v4259_v25, %v8587_v40  ;;  %v4261_v35 = vpop.f32.mrb[239].mxu1  ;;  %4561 = vmatmul.mubr.bf16.gmra.mrb[120].mxu0 %v4368_v0  ;;  %v4336_v30 = vmax.f32 %v6333_v21, 0.0 }
 0x71a   : > { %v6336_v28 = vadd.f32 %v4261_v35, %v8591_v39  ;;  %v4337_v31 = vmax.f32 %v6334_v32, 0.0 }
 0x71b   : > { %v4338_v11 = vmax.f32 %v6335_v8, 0.0 }
 0x71c   : > { %v4339_v33 = vmax.f32 %v6336_v28, 0.0 }
 0x71d   : > { %v4370_v34 = vpack.c.bf16 %v4338_v11, %v4336_v30 }
 0x71e   : > { %v4371_v27 = vpack.c.bf16 %v4339_v33, %v4337_v31  ;;  %v4265_v46 = vpop.f32.mrb[240].mxu1 }
 0x71f   : > { %v6337_v57 = vadd.f32 %v4265_v46, %v8587_v40  ;;  %v4267_v9 = vpop.f32.mrb[241].mxu1 }
 0x720   : > { %v6338_v24 = vadd.f32 %v4267_v9, %v8591_v39  ;;  %v4269_v36 = vpop.f32.mrb[242].mxu1  ;;  %4568 = vmatprep.mubr.bf16.mxu0 %v4371_v27 }
 0x721   : > { %v6339_v41 = vadd.f32 %v4269_v36, %v8587_v40  ;;  %v4271_v14 = vpop.f32.mrb[243].mxu1  ;;  %4569 = vmatmul.mubr.bf16.gmra.mrb[124].mxu0 %v4370_v34  ;;  %v4340_v42 = vmax.f32 %v6337_v57, 0.0 }
 0x722   : > { %v6340_v51 = vadd.f32 %v4271_v14, %v8591_v39  ;;  %v4341_v44 = vmax.f32 %v6338_v24, 0.0 }
 0x723   : > { %v4342_v17 = vmax.f32 %v6339_v41, 0.0 }
 0x724   : > { %v4343_v37 = vmax.f32 %v6340_v51, 0.0 }
 0x725   : > { %v4372_v48 = vpack.c.bf16 %v4342_v17, %v4340_v42 }
 0x726   : > { %v4373_v45 = vpack.c.bf16 %v4343_v37, %v4341_v44  ;;  %v4275_v50 = vpop.f32.mrb[244].mxu1 }
 0x727   : > { %v6341_v3 = vadd.f32 %v4275_v50, %v8587_v40  ;;  %v4277_v47 = vpop.f32.mrb[245].mxu1 }
 0x728   : > { %v6342_v52 = vadd.f32 %v4277_v47, %v8591_v39  ;;  %v4279_v2 = vpop.f32.mrb[246].mxu1  ;;  %4576 = vmatprep.mubr.bf16.mxu0 %v4373_v45 }
 0x729   : > { %v6343_v5 = vadd.f32 %v4279_v2, %v8587_v40  ;;  %v4281_v38 = vpop.f32.mrb[247].mxu1  ;;  %4577 = vmatmul.mubr.bf16.gmra.mrb[128].mxu0 %v4372_v48  ;;  %v4344_v20 = vmax.f32 %v6341_v3, 0.0 }
 0x72a   : > { %v6344_v54 = vadd.f32 %v4281_v38, %v8591_v39  ;;  %v4345_v53 = vmax.f32 %v6342_v52, 0.0 }
 0x72b   : > { %v4346_v55 = vmax.f32 %v6343_v5, 0.0 }
 0x72c   : > { %v4347_v59 = vmax.f32 %v6344_v54, 0.0 }
 0x72d   : > { %v4374_v56 = vpack.c.bf16 %v4346_v55, %v4344_v20  ;;  %v7066_v55 = vld [vmem:[%s8898_s7 + $0x4] ss:$8 sps:$4 sm:$0xff]  }
 0x72e   : > { %v4375_v23 = vpack.c.bf16 %v4347_v59, %v4345_v53  ;;  %v4285_v58 = vpop.f32.mrb[248].mxu1  ;;  %5834 = vmatprep.mubr.msk.bf16.mxu1 %vm4690_vm1, %v7066_v55 }
 0x72f   : > { %v6345_v43 = vadd.f32 %v4285_v58, %v8587_v40  ;;  %v4287_v6 = vpop.f32.mrb[249].mxu1 }
 0x730   : > { %v6346_v62 = vadd.f32 %v4287_v6, %v8591_v39  ;;  %v4289_v7 = vpop.f32.mrb[250].mxu1  ;;  %4584 = vmatprep.mubr.bf16.mxu0 %v4375_v23 }
 0x731   : > { %v6347_v60 = vadd.f32 %v4289_v7, %v8587_v40  ;;  %v4291_v4 = vpop.f32.mrb[251].mxu1  ;;  %4585 = vmatmul.mubr.bf16.gmra.mrb[132].mxu0 %v4374_v56  ;;  %v4348_v1 = vmax.f32 %v6345_v43, 0.0 }
 0x732   : > { %v6348_v63 = vadd.f32 %v4291_v4, %v8591_v39  ;;  %v4349_v61 = vmax.f32 %v6346_v62, 0.0 }
 0x733   : > { %v4350_v26 = vmax.f32 %v6347_v60, 0.0 }
 0x734   : > { %v4351_v10 = vmax.f32 %v6348_v63, 0.0 }
 0x735   : > { %v4376_v13 = vpack.c.bf16 %v4350_v26, %v4348_v1 }
 0x736   : > { %v4377_v12 = vpack.c.bf16 %v4351_v10, %v4349_v61  ;;  %v4295_v29 = vpop.f32.mrb[252].mxu1 }
 0x737   : > { %v6349_v15 = vadd.f32 %v4295_v29, %v8587_v40  ;;  %v4297_v16 = vpop.f32.mrb[253].mxu1 }
 0x738   : > { %v6350_v0 = vadd.f32 %v4297_v16, %v8591_v39  ;;  %v4299_v18 = vpop.f32.mrb[254].mxu1  ;;  %4592 = vmatprep.mubr.bf16.mxu0 %v4377_v12 }
 0x739   : > { %v6351_v19 = vadd.f32 %v4299_v18, %v8587_v40  ;;  %v4301_v21 = vpop.f32.mrb[255].mxu1  ;;  %4593 = vmatmul.mubr.bf16.gmra.mrb[136].mxu0 %v4376_v13  ;;  %v4352_v32 = vmax.f32 %v6349_v15, 0.0 }
 0x73a   : > { %v6352_v22 = vadd.f32 %v4301_v21, %v8591_v39  ;;  %v4353_v8 = vmax.f32 %v6350_v0, 0.0 }
 0x73b   : > { %v4354_v25 = vmax.f32 %v6351_v19, 0.0 }
 0x73c   : > { %v4355_v35 = vmax.f32 %v6352_v22, 0.0 }
 0x73d   : > { %v4378_v28 = vpack.c.bf16 %v4354_v25, %v4352_v32 }
 0x73e   : > { %v4379_v30 = vpack.c.bf16 %v4355_v35, %v4353_v8  ;;  %v4305_v11 = vpop.f32.mrb[0].mxu1 }
 0x73f   : > { %v6353_v31 = vadd.f32 %v4305_v11, %v8587_v40  ;;  %v4307_v33 = vpop.f32.mrb[1].mxu1 }
 0x740   : > { %v6354_v34 = vadd.f32 %v4307_v33, %v8591_v39  ;;  %v4309_v27 = vpop.f32.mrb[2].mxu1  ;;  %4600 = vmatprep.mubr.bf16.mxu0 %v4379_v30 }
 0x741   : > { %v6355_v46 = vadd.f32 %v4309_v27, %v8587_v40  ;;  %v4311_v57 = vpop.f32.mrb[3].mxu1  ;;  %4601 = vmatmul.mubr.bf16.gmra.mrb[140].mxu0 %v4378_v28  ;;  %v4356_v24 = vmax.f32 %v6353_v31, 0.0 }
 0x742   : > { %v6356_v9 = vadd.f32 %v4311_v57, %v8591_v39  ;;  %v4357_v41 = vmax.f32 %v6354_v34, 0.0 }
 0x743   : > { %v4358_v36 = vmax.f32 %v6355_v46, 0.0 }
 0x744   : > { %v4359_v14 = vmax.f32 %v6356_v9, 0.0 }
 0x745   : > { %v4380_v51 = vpack.c.bf16 %v4358_v36, %v4356_v24 }
 0x746   : > { %v4381_v42 = vpack.c.bf16 %v4359_v14, %v4357_v41  ;;  %v4315_v17 = vpop.f32.mrb[4].mxu1 }
 0x747   : > { %v6357_v44 = vadd.f32 %v4315_v17, %v8587_v40  ;;  %v4317_v37 = vpop.f32.mrb[5].mxu1 }
 0x748   : > { %v6358_v48 = vadd.f32 %v4317_v37, %v8591_v39  ;;  %v4319_v45 = vpop.f32.mrb[6].mxu1  ;;  %4608 = vmatprep.mubr.bf16.mxu0 %v4381_v42 }
 0x749   : > { %v6359_v50 = vadd.f32 %v4319_v45, %v8587_v40  ;;  %v4321_v3 = vpop.f32.mrb[7].mxu1  ;;  %4609 = vmatmul.mubr.bf16.gmra.mrb[144].mxu0 %v4380_v51  ;;  %v4360_v52 = vmax.f32 %v6357_v44, 0.0  ;;  %v7091_v40 = vld [vmem:[%s8900_s9 + $0xc0] sm:$0xff]  }
 0x74a   : > { %v6360_v47 = vadd.f32 %v4321_v3, %v8591_v39  ;;  %v4361_v5 = vmax.f32 %v6358_v48, 0.0  ;;  %v7092_v39 = vld [vmem:[%s8900_s9 + $0x80] sm:$0xff]   ;;  %6100 = vmatprep.subr.bf16.mxu0 %v7091_v40 }
 0x74b   : > { %v4362_v2 = vmax.f32 %v6359_v50, 0.0  ;;  %6101 = vmatpush3.bf16.msra.mxu0 %v7092_v39 }
 0x74c   : > { %v4363_v38 = vmax.f32 %v6360_v47, 0.0 }
 0x74d   : > { %v4382_v54 = vpack.c.bf16 %v4362_v2, %v4360_v52 }
 0x74e   : > { %v4383_v20 = vpack.c.bf16 %v4363_v38, %v4361_v5 }
 0x750   : > { %4616 = vmatprep.mubr.bf16.mxu0 %v4383_v20 }
 0x751   : > { %4617 = vmatmul.mubr.bf16.gmra.mrb[148].mxu0 %v4382_v54 }
 0x7dc   : > { %v6018_v53 = vpop.f32.mrb[112].mxu0 }
 0x7dd   : > { %v6019_v59 = vpop.f32.mrb[113].mxu0 }
 0x7de   : > { %v6020_v56 = vadd.f32 %v6019_v59, %v6018_v53  ;;  %v6021_v23 = vpop.f32.mrb[114].mxu0 }
 0x7df   : > { %v6022_v58 = vpop.f32.mrb[115].mxu0 }
 0x7e0   : > { %v6023_v43 = vadd.f32 %v6022_v58, %v6021_v23 }
 0x7e2   : > { %v4635_v6 = vpack.c.bf16 %v6023_v43, %v6020_v56 }
 0x7e4   : > { %v6024_v62 = vpop.f32.mrb[116].mxu0  ;;  %4707 = vmatpush1.bf16.msra.mxu1 %v4635_v6  ;;  %v7079_v6 = vld [vmem:[%s8900_s9 + $0x40] sm:$0xff]  }
 0x7e5   : > { %v6025_v7 = vpop.f32.mrb[117].mxu0  ;;  %4708 = vmatprep.subr.bf16.mxu1 %v7144_v49 }
 0x7e6   : > { %v6026_v60 = vadd.f32 %v6025_v7, %v6024_v62  ;;  %v6027_v4 = vpop.f32.mrb[118].mxu0  ;;  %v7064_v7 = vld [vmem:[%s8898_s7] ss:$8 sps:$4 sm:$0xff]  }
 0x7e7   : > { %v6028_v63 = vpop.f32.mrb[119].mxu0 }
 0x7e8   : > { %v6029_v1 = vadd.f32 %v6028_v63, %v6027_v4  ;;  %v7081_v4 = vld [vmem:[%s8900_s9 + $0x48] sm:$0xff]  }
 0x7e9   : > { %v7082_v63 = vld [vmem:[%s8900_s9 + $0x8] sm:$0xff]  }
 0x7ea   : > { %v4636_v26 = vpack.c.bf16 %v6029_v1, %v6026_v60  ;;  %v7069_v60 = vld [vmem:[%s8898_s7 + $0x14] ss:$8 sps:$4 sm:$0xff]  }
 0x7eb   : > { %v7083_v1 = vld [vmem:[%s8900_s9 + $0x50] sm:$0xff]  }
 0x7ec   : > { %v6030_v61 = vpop.f32.mrb[120].mxu0  ;;  %4709 = vmatpush1.bf16.msra.mxu1 %v4636_v26  ;;  %v7067_v26 = vld [vmem:[%s8898_s7 + $0x10] ss:$8 sps:$4 sm:$0xff]  }
 0x7ed   : > { %v6031_v10 = vpop.f32.mrb[121].mxu0  ;;  %4710 = vmatprep.subr.bf16.mxu1 %v7144_v49 }
 0x7ee   : > { %v6032_v13 = vadd.f32 %v6031_v10, %v6030_v61  ;;  %v6033_v12 = vpop.f32.mrb[122].mxu0  ;;  %v7072_v61 = vld [vmem:[%s8898_s7 + $0x24] ss:$8 sps:$4 sm:$0xff]   ;;  %v7084_v10 = vld [vmem:[%s8900_s9 + $0x10] sm:$0xff]  }
 0x7ef   : > { %v6034_v29 = vpop.f32.mrb[123].mxu0 }
 0x7f0   : > { %v6035_v15 = vadd.f32 %v6034_v29, %v6033_v12  ;;  %v7086_v12 = vld [vmem:[%s8900_s9 + $0x18] sm:$0xff]   ;;  %v7087_v29 = vld [vmem:[%s8900_s9 + $0x60] sm:$0xff]  }
 0x7f2   : > { %v4637_v16 = vpack.c.bf16 %v6035_v15, %v6032_v13  ;;  %v7085_v13 = vld [vmem:[%s8900_s9 + $0x58] sm:$0xff]   ;;  %v7070_v15 = vld [vmem:[%s8898_s7 + $0x20] ss:$8 sps:$4 sm:$0xff]  }
 0x7f4   : > { %v6036_v0 = vpop.f32.mrb[124].mxu0  ;;  %4711 = vmatpush1.bf16.msra.mxu1 %v4637_v16  ;;  %v7075_v16 = vld [vmem:[%s8898_s7 + $0x34] ss:$8 sps:$4 sm:$0xff]  }
 0x7f5   : > { %v6037_v18 = vpop.f32.mrb[125].mxu0  ;;  %4712 = vmatprep.subr.bf16.mxu1 %v7144_v49 }
 0x7f6   : > { %v6038_v19 = vadd.f32 %v6037_v18, %v6036_v0  ;;  %v6039_v21 = vpop.f32.mrb[126].mxu0  ;;  %v7088_v0 = vld [vmem:[%s8900_s9 + $0x20] sm:$0xff]   ;;  %v7089_v18 = vld [vmem:[%s8900_s9 + $0x68] sm:$0xff]  }
 0x7f7   : > { %v6040_v22 = vpop.f32.mrb[127].mxu0 }
 0x7f8   : > { %v6041_v32 = vadd.f32 %v6040_v22, %v6039_v21  ;;  %v7073_v21 = vld [vmem:[%s8898_s7 + $0x30] ss:$8 sps:$4 sm:$0xff]   ;;  %v7078_v22 = vld [vmem:[%s8898_s7 + $0x44] ss:$8 sps:$4 sm:$0xff]  }
 0x7fa   : > { %v4638_v25 = vpack.c.bf16 %v6041_v32, %v6038_v19  ;;  %v7090_v19 = vld [vmem:[%s8900_s9 + $0x28] sm:$0xff]  }
 0x7fb   : > { %v7076_v32 = vld [vmem:[%s8898_s7 + $0x40] ss:$8 sps:$4 sm:$0xff]  }
 0x7fc   : > { %v6042_v8 = vpop.f32.mrb[128].mxu0  ;;  %4713 = vmatpush1.bf16.msra.mxu1 %v4638_v25  ;;  %v7097_v25 = vld [vmem:[%s8900_s9 + $0xc8] sm:$0xff]  }
 0x7fd   : > { %v6043_v35 = vpop.f32.mrb[129].mxu0  ;;  %4714 = vmatprep.subr.bf16.mxu1 %v7144_v49  ;;  %6102 = vmatprep.subr.bf16.mxu0 %v7097_v25  ;;  %v7131_v25 = vld [vmem:[%s8904_s13 + $0x20] sm:$0xff]  }
 0x7fe   : > { %v6044_v28 = vadd.f32 %v6043_v35, %v6042_v8  ;;  %v6045_v30 = vpop.f32.mrb[130].mxu0  ;;  %v7093_v8 = vld [vmem:[%s8900_s9 + $0x70] sm:$0xff]   ;;  %v7098_v35 = vld [vmem:[%s8900_s9 + $0x88] sm:$0xff]  }
 0x7ff   : > { %v6046_v11 = vpop.f32.mrb[131].mxu0  ;;  %6103 = vmatpush3.bf16.msra.mxu0 %v7098_v35 }
 0x800   : > { %v6047_v31 = vadd.f32 %v6046_v11, %v6045_v30  ;;  %v7100_v30 = vld [vmem:[%s8900_s9 + $0xd0] sm:$0xff]  }
 0x801   : > { %v7101_v11 = vld [vmem:[%s8900_s9 + $0x90] sm:$0xff]   ;;  %6104 = vmatprep.subr.bf16.mxu0 %v7100_v30 }
 0x802   : > { %v4639_v33 = vpack.c.bf16 %v6047_v31, %v6044_v28  ;;  %v7094_v28 = vld [vmem:[%s8900_s9 + $0x30] sm:$0xff]   ;;  %v7095_v31 = vld [vmem:[%s8900_s9 + $0x78] sm:$0xff]  }
 0x803   : > { %6105 = vmatpush3.bf16.msra.mxu0 %v7101_v11 }
 0x804   : > { %v6048_v34 = vpop.f32.mrb[132].mxu0  ;;  %4715 = vmatpush1.bf16.msra.mxu1 %v4639_v33  ;;  %v7096_v33 = vld [vmem:[%s8900_s9 + $0x38] sm:$0xff]  }
 0x805   : > { %v6049_v27 = vpop.f32.mrb[133].mxu0  ;;  %4716 = vmatprep.subr.bf16.mxu1 %v7144_v49 }
 0x806   : > { %v6050_v46 = vadd.f32 %v6049_v27, %v6048_v34  ;;  %v6051_v57 = vpop.f32.mrb[134].mxu0  ;;  %v7103_v34 = vld [vmem:[%s8900_s9 + $0xd8] sm:$0xff]  }
 0x807   : > { %v6052_v9 = vpop.f32.mrb[135].mxu0  ;;  %v7104_v27 = vld [vmem:[%s8900_s9 + $0x98] sm:$0xff]   ;;  %6106 = vmatprep.subr.bf16.mxu0 %v7103_v34  ;;  %v5839_v34 = vld [vmem:[%s8901_s10] ss:$0 sm:$0xff] }
 0x808   : > { %v6053_v24 = vadd.f32 %v6052_v9, %v6051_v57  ;;  %6107 = vmatpush3.bf16.msra.mxu0 %v7104_v27  ;;  %v7106_v57 = vld [vmem:[%s8900_s9 + $0xe0] sm:$0xff]  }
 0x809   : > { %v7107_v9 = vld [vmem:[%s8900_s9 + $0xa0] sm:$0xff]   ;;  %6108 = vmatprep.subr.bf16.mxu0 %v7106_v57 }
 0x80a   : > { %v4640_v36 = vpack.c.bf16 %v6053_v24, %v6050_v46  ;;  %v7145_v46 = vmov 0.0   ;;  %v7109_v24 = vld [vmem:[%s8900_s9 + $0xe8] sm:$0xff]  }
 0x80c   : > { %v6054_v41 = vpop.f32.mrb[136].mxu0  ;;  %4717 = vmatpush1.bf16.msra.mxu1 %v4640_v36  ;;  %6109 = vmatpush3.bf16.msra.mxu0 %v7107_v9  ;;  %v7110_v36 = vld [vmem:[%s8900_s9 + $0xa8] sm:$0xff]  }
 0x80d   : > { %v6055_v14 = vpop.f32.mrb[137].mxu0  ;;  %4718 = vmatprep.subr.bf16.mxu1 %v7144_v49  ;;  %6110 = vmatprep.subr.bf16.mxu0 %v7109_v24 }
 0x80e   : > { %v6056_v51 = vadd.f32 %v6055_v14, %v6054_v41  ;;  %v6057_v42 = vpop.f32.mrb[138].mxu0  ;;  %v7112_v41 = vld [vmem:[%s8900_s9 + $0xf0] sm:$0xff]  }
 0x80f   : > { %v6058_v17 = vpop.f32.mrb[139].mxu0  ;;  %v7113_v14 = vld [vmem:[%s8900_s9 + $0xb0] sm:$0xff]  }
 0x810   : > { %v6059_v44 = vadd.f32 %v6058_v17, %v6057_v42  ;;  %6111 = vmatpush3.bf16.msra.mxu0 %v7110_v36  ;;  %v7116_v42 = vld [vmem:[%s8900_s9 + $0xb8] sm:$0xff]  }
 0x811   : > { %6112 = vmatprep.subr.bf16.mxu0 %v7112_v41 }
 0x812   : > { %v4641_v37 = vpack.c.bf16 %v6059_v44, %v6056_v51  ;;  %v7115_v51 = vld [vmem:[%s8900_s9 + $0xf8] sm:$0xff]  }
 0x814   : > { %v6060_v48 = vpop.f32.mrb[140].mxu0  ;;  %4719 = vmatpush1.bf16.msra.mxu1 %v4641_v37  ;;  %6113 = vmatpush3.bf16.msra.mxu0 %v7113_v14 }
 0x815   : > { %v6061_v45 = vpop.f32.mrb[141].mxu0  ;;  %4720 = vmatprep.subr.bf16.mxu1 %v7144_v49  ;;  %6114 = vmatprep.subr.bf16.mxu0 %v7115_v51 }
 0x816   : > { %v6062_v50 = vadd.f32 %v6061_v45, %v6060_v48  ;;  %v6063_v3 = vpop.f32.mrb[142].mxu0 }
 0x817   : > { %v6064_v47 = vpop.f32.mrb[143].mxu0 }
 0x818   : > { %v6065_v52 = vadd.f32 %v6064_v47, %v6063_v3  ;;  %6115 = vmatpush3.bf16.msra.mxu0 %v7116_v42 }
 0x819   : > { %6169 = vmatprep.subr.bf16.mxu0 %v7145_v46 }
 0x81a   : > { %v4642_v2 = vpack.c.bf16 %v6065_v52, %v6062_v50 }
 0x81c   : > { %v6066_v5 = vpop.f32.mrb[144].mxu0  ;;  %4721 = vmatpush1.bf16.msra.mxu1 %v4642_v2  ;;  %v7099_v2 = vld [vmem:[%s8900_s9 + $0x100] sm:$0xff]  }
 0x81d   : > { %v6067_v38 = vpop.f32.mrb[145].mxu0  ;;  %4722 = vmatprep.subr.bf16.mxu1 %v7144_v49 }
 0x81e   : > { %v6068_v54 = vadd.f32 %v6067_v38, %v6066_v5  ;;  %v6069_v20 = vpop.f32.mrb[146].mxu0  ;;  %v7102_v38 = vld [vmem:[%s8900_s9 + $0x108] sm:$0xff]  }
 0x81f   : > { %v6070_v55 = vpop.f32.mrb[147].mxu0 }
 0x820   : > { %v6071_v40 = vadd.f32 %v6070_v55, %v6069_v20 }
 0x822   : > { %v4643_v39 = vpack.c.bf16 %v6071_v40, %v6068_v54  ;;  %v7105_v40 = vld [vmem:[%s8900_s9 + $0x110] sm:$0xff]  }
 0x824   : > { %v6072_v53 = vpop.f32.mrb[148].mxu0  ;;  %4723 = vmatpush1.bf16.msra.mxu1 %v4643_v39 }
 0x825   : > { %v6073_v59 = vpop.f32.mrb[149].mxu0  ;;  %4724 = vmatprep.subr.bf16.mxu1 %v7144_v49  ;;  %v7080_v49 = vld [vmem:[%s8900_s9] sm:$0xff]  }
 0x826   : > { %v6074_v56 = vadd.f32 %v6073_v59, %v6072_v53  ;;  %v6075_v23 = vpop.f32.mrb[150].mxu0  ;;  %v7108_v59 = vld [vmem:[%s8900_s9 + $0x118] sm:$0xff]  }
 0x827   : > { %v6076_v58 = vpop.f32.mrb[151].mxu0 }
 0x828   : > { %v6077_v43 = vadd.f32 %v6076_v58, %v6075_v23 }
 0x82a   : > { %v4644_v62 = vpack.c.bf16 %v6077_v43, %v6074_v56  ;;  %v7111_v43 = vld [vmem:[%s8900_s9 + $0x120] sm:$0xff]  }
 0x82c   : > { %4725 = vmatpush1.bf16.msra.mxu1 %v4644_v62 }
 0x82d   : > { %6078 = vmatprep.subr.bf16.mxu1 %v7079_v6 }
 0x82f   : > { %4739 = vmatmul.mubr.bf16.vlgmr.msra.gmra.mrb[8].mxu1 %v7064_v7  ;;  %v7119_v7 = vld [vmem:[%s8902_s11] sm:$0xff]  }
 0x830   : > { %5835 = vmatprep.mubr.msk.bf16.mxu1 %vm4690_vm1, %v7069_v60  ;;  %6079 = vmatpush3.bf16.msra.mxu1 %v7080_v49  ;;  %v7114_v60 = vld [vmem:[%s8900_s9 + $0x128] sm:$0xff]  }
 0x831   : > { %6080 = vmatprep.subr.bf16.mxu1 %v7081_v4  ;;  %v7120_v49 = vld [vmem:[%s8902_s11 + $0x8] sm:$0xff]  }
 0x834   : > { %6081 = vmatpush3.bf16.msra.mxu1 %v7082_v63 }
 0x835   : > { %6082 = vmatprep.subr.bf16.mxu1 %v7083_v1 }
 0x837   : > { %4747 = vmatmul.mubr.bf16.gmra.mrb[12].mxu1 %v7067_v26  ;;  %v7117_v26 = vld [vmem:[%s8900_s9 + $0x130] sm:$0xff]  }
 0x838   : > { %5836 = vmatprep.mubr.msk.bf16.mxu1 %vm4690_vm1, %v7072_v61  ;;  %6083 = vmatpush3.bf16.msra.mxu1 %v7084_v10 }
 0x839   : > { %6084 = vmatprep.subr.bf16.mxu1 %v7085_v13  ;;  %v7121_v13 = vld [vmem:[%s8902_s11 + $0x10] sm:$0xff]  }
 0x83c   : > { %6085 = vmatpush3.bf16.msra.mxu1 %v7086_v12  ;;  %v7118_v12 = vld [vmem:[%s8900_s9 + $0x138] sm:$0xff]  }
 0x83d   : > { %6086 = vmatprep.subr.bf16.mxu1 %v7087_v29  ;;  %v7122_v29 = vld [vmem:[%s8902_s11 + $0x18] sm:$0xff]  }
 0x83f   : > { %4755 = vmatmul.mubr.bf16.gmra.mrb[16].mxu1 %v7070_v15  ;;  %v7123_v15 = vld [vmem:[%s8902_s11 + $0x20] sm:$0xff]  }
 0x840   : > { %5837 = vmatprep.mubr.msk.bf16.mxu1 %vm4690_vm1, %v7075_v16  ;;  %6087 = vmatpush3.bf16.msra.mxu1 %v7088_v0  ;;  %v7124_v16 = vld [vmem:[%s8902_s11 + $0x28] sm:$0xff]   ;;  %v7125_v0 = vld [vmem:[%s8902_s11 + $0x30] sm:$0xff]  }
 0x841   : > { %6088 = vmatprep.subr.bf16.mxu1 %v7089_v18  ;;  %v7126_v18 = vld [vmem:[%s8902_s11 + $0x38] sm:$0xff]  }
 0x844   : > { %6089 = vmatpush3.bf16.msra.mxu1 %v7090_v19  ;;  %v7127_v19 = vld [vmem:[%s8904_s13] sm:$0xff]  }
 0x845   : > { %6090 = vmatprep.subr.bf16.mxu1 %v7093_v8  ;;  %v7132_v8 = vld [vmem:[%s8904_s13 + $0x28] sm:$0xff]  }
 0x847   : > { %4763 = vmatmul.mubr.bf16.gmra.mrb[20].mxu1 %v7073_v21  ;;  %v7128_v21 = vld [vmem:[%s8904_s13 + $0x8] sm:$0xff]  }
 0x848   : > { %5838 = vmatprep.mubr.msk.bf16.mxu1 %vm4690_vm1, %v7078_v22  ;;  %6091 = vmatpush3.bf16.msra.mxu1 %v7094_v28  ;;  %v7129_v22 = vld [vmem:[%s8904_s13 + $0x10] sm:$0xff]  }
 0x849   : > { %6092 = vmatprep.subr.bf16.mxu1 %v7095_v31 }
 0x84c   : > { %6093 = vmatpush3.bf16.msra.mxu1 %v7096_v33 }
 0x84d   : > { %6149 = vmatprep.subr.bf16.mxu1 %v7145_v46 }
 0x84f   : > { %4771 = vmatmul.mubr.bf16.gmra.mrb[24].mxu1 %v7076_v32  ;;  %v7130_v32 = vld [vmem:[%s8904_s13 + $0x18] sm:$0xff]  }
 0x902   : > { %v4740_v17 = vpop.f32.mrb[8].mxu1 }
 0x903   : > { %v4742_v44 = vpop.f32.mrb[9].mxu1 }
 0x904   : > { %v4743_v37 = vpop.f32.mrb[10].mxu1 }
 0x905   : > { %v4779_v48 = vpack.c.bf16 %v4743_v37, %v4740_v17  ;;  %v4745_v45 = vpop.f32.mrb[11].mxu1 }
 0x90a   : > { %v4748_v50 = vpop.f32.mrb[12].mxu1 }
 0x90b   : > { %v4750_v3 = vpop.f32.mrb[13].mxu1 }
 0x90c   : > { %v4751_v47 = vpop.f32.mrb[14].mxu1 }
 0x90d   : > { %v4780_v52 = vpack.c.bf16 %v4751_v47, %v4748_v50  ;;  %v4753_v5 = vpop.f32.mrb[15].mxu1 }
 0x90e   : > { %v7133_v5 = vld [vmem:[%s8904_s13 + $0x30] sm:$0xff]  }
 0x90f   : > { %5143 = vmatprep.mubr.bf16.mxu1 %v4780_v52 }
 0x910   : > { %5144 = vmatmul.mubr.bf16.vlgmr.msra.gmra.mrb[28].mxu1 %v4779_v48 }
 0x911   : > { %6150 = vmatpush3.bf16.msra.mxu1 %v7099_v2  ;;  %6165 = vmatprep.mubr.msk.bf16.mxu1 %vm7146_vm2, %v7145_v46 }
 0x912   : > { %6151 = vmatprep.subr.bf16.mxu1 %v7145_v46  ;;  %v4756_v54 = vpop.f32.mrb[16].mxu1 }
 0x913   : > { %v4758_v20 = vpop.f32.mrb[17].mxu1 }
 0x914   : > { %v4759_v55 = vpop.f32.mrb[18].mxu1 }
 0x915   : > { %6152 = vmatpush3.bf16.msra.mxu1 %v7102_v38  ;;  %v4781_v39 = vpack.c.bf16 %v4759_v55, %v4756_v54  ;;  %v4761_v53 = vpop.f32.mrb[19].mxu1  ;;  %v7134_v38 = vld [vmem:[%s8904_s13 + $0x38] sm:$0xff]   ;;  %v5880_v54 = vld [vmem:[%s8903_s12] ss:$0 sm:$0xff] }
 0x916   : > { %6153 = vmatprep.subr.bf16.mxu1 %v7145_v46 }
 0x919   : > { %6154 = vmatpush3.bf16.msra.mxu1 %v7105_v40 }
 0x91a   : > { %6155 = vmatprep.subr.bf16.mxu1 %v7145_v46  ;;  %v4764_v56 = vpop.f32.mrb[20].mxu1 }
 0x91b   : > { %v4766_v23 = vpop.f32.mrb[21].mxu1 }
 0x91c   : > { %v4767_v58 = vpop.f32.mrb[22].mxu1 }
 0x91d   : > { %6156 = vmatpush3.bf16.msra.mxu1 %v7108_v59  ;;  %v4782_v6 = vpack.c.bf16 %v4767_v58, %v4764_v56  ;;  %v4769_v62 = vpop.f32.mrb[23].mxu1 }
 0x91e   : > { %6157 = vmatprep.subr.bf16.mxu1 %v7145_v46 }
 0x91f   : > { %5184 = vmatprep.mubr.bf16.mxu0 %v4782_v6 }
 0x920   : > { %5185 = vmatmul.mubr.bf16.vlgmr.msra.gmra.mrb[152].mxu0 %v4781_v39 }
 0x921   : > { %6158 = vmatpush3.bf16.msra.mxu1 %v7111_v43  ;;  %6170 = vmatpush3.bf16.msra.mxu0 %v7119_v7 }
 0x922   : > { %6159 = vmatprep.subr.bf16.mxu1 %v7145_v46  ;;  %v4772_v4 = vpop.f32.mrb[24].mxu1  ;;  %6171 = vmatprep.subr.bf16.mxu0 %v7145_v46 }
 0x923   : > { %v4774_v63 = vpop.f32.mrb[25].mxu1  ;;  %6185 = vmatprep.mubr.msk.bf16.mxu0 %vm7146_vm2, %v7145_v46 }
 0x924   : > { %v4775_v1 = vpop.f32.mrb[26].mxu1 }
 0x925   : > { %6160 = vmatpush3.bf16.msra.mxu1 %v7114_v60  ;;  %v4783_v61 = vpack.c.bf16 %v4775_v1, %v4772_v4  ;;  %v4777_v10 = vpop.f32.mrb[27].mxu1  ;;  %6172 = vmatpush3.bf16.msra.mxu0 %v7120_v49 }
 0x926   : > { %6161 = vmatprep.subr.bf16.mxu1 %v7145_v46  ;;  %6173 = vmatprep.subr.bf16.mxu0 %v7145_v46 }
 0x929   : > { %6162 = vmatpush3.bf16.msra.mxu1 %v7117_v26  ;;  %6174 = vmatpush3.bf16.msra.mxu0 %v7121_v13 }
 0x92a   : > { %6163 = vmatprep.subr.bf16.mxu1 %v7145_v46  ;;  %6175 = vmatprep.subr.bf16.mxu0 %v7145_v46 }
 0x92d   : > { %6164 = vmatpush3.bf16.msra.mxu1 %v7118_v12  ;;  %6176 = vmatpush3.bf16.msra.mxu0 %v7122_v29 }
 0x92e   : > { %6177 = vmatprep.subr.bf16.mxu0 %v7145_v46  ;;  %6189 = vmatprep.subr.bf16.mxu1 %v7145_v46 }
 0x930   : > { %6166 = vmatmul.mubr.bf16.vlgmr.msra.gmra.mrb[32].mxu1 %v4783_v61 }
 0x931   : > { %6205 = vmatprep.mubr.msk.bf16.mxu1 %vm7146_vm2, %v7145_v46  ;;  %6178 = vmatpush3.bf16.msra.mxu0 %v7123_v15 }
 0x932   : > { %6179 = vmatprep.subr.bf16.mxu0 %v7145_v46  ;;  %6190 = vmatpush3.bf16.msra.mxu1 %v7127_v19 }
 0x933   : > { %6191 = vmatprep.subr.bf16.mxu1 %v7145_v46 }
 0x935   : > { %6180 = vmatpush3.bf16.msra.mxu0 %v7124_v16 }
 0x936   : > { %6181 = vmatprep.subr.bf16.mxu0 %v7145_v46  ;;  %6192 = vmatpush3.bf16.msra.mxu1 %v7128_v21 }
 0x937   : > { %6193 = vmatprep.subr.bf16.mxu1 %v7145_v46 }
 0x939   : > { %6182 = vmatpush3.bf16.msra.mxu0 %v7125_v0 }
 0x93a   : > { %6183 = vmatprep.subr.bf16.mxu0 %v7145_v46  ;;  %6194 = vmatpush3.bf16.msra.mxu1 %v7129_v22 }
 0x93b   : > { %6195 = vmatprep.subr.bf16.mxu1 %v7145_v46 }
 0x93d   : > { %6184 = vmatpush3.bf16.msra.mxu0 %v7126_v18 }
 0x93e   : > { %6196 = vmatpush3.bf16.msra.mxu1 %v7130_v32 }
 0x93f   : > { %6197 = vmatprep.subr.bf16.mxu1 %v7145_v46 }
 0x942   : > { %6198 = vmatpush3.bf16.msra.mxu1 %v7131_v25 }
 0x943   : > { %6199 = vmatprep.subr.bf16.mxu1 %v7145_v46 }
 0x946   : > { %6200 = vmatpush3.bf16.msra.mxu1 %v7132_v8 }
 0x947   : > { %6201 = vmatprep.subr.bf16.mxu1 %v7145_v46 }
 0x94a   : > { %6202 = vmatpush3.bf16.msra.mxu1 %v7133_v5 }
 0x94b   : > { %6203 = vmatprep.subr.bf16.mxu1 %v7145_v46  ;;  %v5889_v46 = vld [vmem:[%s8905_s14] ss:$0 sm:$0xff] }
 0x94e   : > { %6204 = vmatpush3.bf16.msra.mxu1 %v7134_v38 }
 0x9e3   : > { %v6094_v35 = vpop.f32.mrb[28].mxu1 }
 0x9e4   : > { %v6095_v28 = vpop.f32.mrb[29].mxu1 }
 0x9e5   : > { %v6096_v30 = vadd.f32 %v6095_v28, %v6094_v35  ;;  %v6097_v11 = vpop.f32.mrb[30].mxu1 }
 0x9e6   : > { %v6098_v31 = vpop.f32.mrb[31].mxu1 }
 0x9e7   : > { %v6099_v33 = vadd.f32 %v6098_v31, %v6097_v11  ;;  %v5146_v9 = vadd.f32 %v6096_v30, %v5839_v34 }
 0x9e9   : > { %v5149_v14 = vadd.f32 %v6099_v33, %v5839_v34 }
 0x9f3   : > { %v6116_v27 = vpop.f32.mrb[152].mxu0 }
 0x9f4   : > { %v6117_v57 = vpop.f32.mrb[153].mxu0 }
 0x9f5   : > { %v6118_v24 = vadd.f32 %v6117_v57, %v6116_v27  ;;  %v6119_v36 = vpop.f32.mrb[154].mxu0 }
 0x9f6   : > { %v6120_v41 = vpop.f32.mrb[155].mxu0 }
 0x9f7   : > { %v6121_v51 = vadd.f32 %v6120_v41, %v6119_v36  ;;  %v5187_v42 = vadd.f32 %v6118_v24, %v5146_v9 }
 0x9f9   : > { %v5190_v17 = vadd.f32 %v6121_v51, %v5149_v14 }
 0xa03   : > { %v5227_v44 = vpop.f32.mrb[32].mxu1 }
 0xa04   : > { %v5228_v37 = vadd.f32 %v5227_v44, %v5187_v42  ;;  %v6167_v48 = vpop.f32.mrb[33].mxu1 }
 0xa05   : > { %v5230_v45 = vpop.f32.mrb[34].mxu1 }
 0xa06   : > { %v5231_v50 = vadd.f32 %v5230_v45, %v5190_v17  ;;  %v6168_v3 = vpop.f32.mrb[35].mxu1  ;;  %v5234_v47 = vmax.f32 %v5228_v37, 0.0 }
 0xa08   : > { %v5235_v52 = vmax.f32 %v5231_v50, 0.0 }
 0xa0a   : > { %v5236_v2 = vpack.c.bf16 %v5235_v52, %v5234_v47 }
 0xa0c   : > { %6186 = vmatmul.mubr.bf16.vlgmr.msra.gmra.mrb[156].mxu0 %v5236_v2 }
 0xadf   : > { %v5342_v20 = vpop.f32.mrb[156].mxu0 }
 0xae0   : > { %v5343_v55 = vadd.f32 %v5880_v54, %v5342_v20  ;;  %v6187_v40 = vpop.f32.mrb[157].mxu0 }
 0xae1   : > { %v5345_v39 = vpop.f32.mrb[158].mxu0 }
 0xae2   : > { %v5346_v53 = vadd.f32 %v5880_v54, %v5345_v39  ;;  %v6188_v59 = vpop.f32.mrb[159].mxu0  ;;  %v5349_v56 = vmax.f32 %v5343_v55, 0.0 }
 0xae4   : > { %v5350_v23 = vmax.f32 %v5346_v53, 0.0 }
 0xae6   : > { %v5351_v58 = vpack.c.bf16 %v5350_v23, %v5349_v56 }
 0xae8   : > { %6206 = vmatmul.mubr.bf16.vlgmr.msra.gmra.mrb[36].mxu1 %v5351_v58 }
 0xbbb   : > { %v5457_v43 = vpop.f32.mrb[36].mxu1 }
 0xbbc   : > { %v5458_v6 = vadd.f32 %v5889_v46, %v5457_v43  ;;  %v6207_v62 = vpop.f32.mrb[37].mxu1 }
 0xbbd   : > { %v5460_v7 = vpop.f32.mrb[38].mxu1 }
 0xbbe   : > { %5464 = vst [vmem:[%s494_s28] sm:$0xff] %v5458_v6  ;;  %v5461_v60 = vadd.f32 %v5889_v46, %v5460_v7  ;;  %v6208_v49 = vpop.f32.mrb[39].mxu1 }
 0xbc0   : > { %5465 = vst [vmem:[%s494_s28 + $0x8] sm:$0xff] %v5461_v60 }
 0xbc1 PF: > { %s25_s18 = sadd.s32 1, %s7142_s18  }
 0xbc2   : > { %p22_p4 = scmp.ge.s32.totalorder %s25_s18, 4  }
 0xbc4   :  { %24 = sbr.rel (!%p22_p4) target bundleno = 1 (0x1), region = 110 }

</bundles_post_ra>
